<compile_context>
chip_gen: v5e
topology: v5e:2x2
jax: 0.10.0
libtpu: 0.0.40
codegen_flags: <defaults>
</compile_context>

<pallas_src>
import numpy as np
import jax
import jax.numpy as jnp
from jax import lax
from jax.experimental import pallas as pl
from jax.experimental.pallas import tpu as pltpu

VMEM_LIMIT = 32 * 1024 * 1024  # explicit scoped-VMEM budget (safe on v5e/v6e/v7x)


# ----------------------------- Pallas kernels ------------------------------

def _conv_pool_relu_kernel(x_ref, w_ref, b_ref, o_ref):
    """Fused valid conv (banded-weight matmuls) + bias + 2x2 max-pool + ReLU."""
    K = w_ref.shape[0]
    ncols = w_ref.shape[2]          # OW * Cout (pre-pool), pool-reordered cols
    hin = x_ref.shape[1]
    oh = hin - K + 1                # conv output height (pre-pool)
    h2 = oh // 2                    # pooled height
    half = ncols // 2               # pooled width in lanes ((OW/2) * Cout)

    # The whole conv = K accumulated MXU matmuls against the banded weight.
    acc = jnp.zeros((oh, ncols), jnp.float32)
    for kh in range(K):
        acc += jnp.dot(x_ref[0, kh:kh + oh, :], w_ref[kh],
                       preferred_element_type=jnp.float32)
    acc = acc + b_ref[...]

    # Row half of the 2x2 pool: exact 0/1 selection matmuls pick even/odd rows.
    col_idx = lax.broadcasted_iota(jnp.int32, (h2, oh), 1)
    two_row = 2 * lax.broadcasted_iota(jnp.int32, (h2, oh), 0)
    sel_even = (col_idx == two_row).astype(jnp.float32)
    sel_odd = (col_idx == two_row + 1).astype(jnp.float32)
    rows = jnp.maximum(
        jnp.dot(sel_even, acc, preferred_element_type=jnp.float32),
        jnp.dot(sel_odd, acc, preferred_element_type=jnp.float32))

    # Column half: band columns are ordered (even ow | odd ow), so this is a
    # max of two contiguous, 128-aligned lane halves.
    pooled = jnp.maximum(rows[:, :half], rows[:, half:])

    # ReLU (relu(maxpool(x)) exactly as in the reference), lane-dense store.
    o_ref[0] = jnp.maximum(pooled, 0.0).astype(o_ref.dtype)


def _fused_mlp_kernel(x_ref, w1_ref, b1_ref, w2_ref, b2_ref, o_ref):
    """relu(x @ w1 + b1) @ w2 + b2 with the hidden activation kept in VMEM."""
    h = jnp.dot(x_ref[...], w1_ref[...], preferred_element_type=jnp.float32)
    h = jnp.maximum(h + b1_ref[...], 0.0)
    o = jnp.dot(h, w2_ref[...], preferred_element_type=jnp.float32) + b2_ref[...]
    o_ref[...] = o.astype(o_ref.dtype)


# ------------------------------ Pallas wrappers -----------------------------

def conv_pool_relu(x, w_band, b_band):
    """Fused Conv2d(valid, stride 1) + bias + 2x2 max-pool + ReLU.

    x:      (N, H_in, W_in*Cin)   rows = h, lanes = w*Cin + ci
    w_band: (K, W_in*Cin, OW*Cout) banded weight, pool-reordered columns
    b_band: (1, OW*Cout)
    returns (N, OH//2, (OW//2)*Cout) in the same (h, w*C) lane-dense layout.
    """
    N, hin, win = x.shape
    K, win2, ncols = w_band.shape
    assert win == win2, (win, win2)
    oh = hin - K + 1
    h2, outw = oh // 2, ncols // 2
    return pl.pallas_call(
        _conv_pool_relu_kernel,
        out_shape=jax.ShapeDtypeStruct((N, h2, outw), jnp.float32),
        grid=(N,),
        in_specs=[
            pl.BlockSpec((1, hin, win), lambda n: (n, 0, 0)),
            pl.BlockSpec((K, win, ncols), lambda n: (0, 0, 0)),
            pl.BlockSpec((1, ncols), lambda n: (0, 0)),
        ],
        out_specs=pl.BlockSpec((1, h2, outw), lambda n: (n, 0, 0)),
        compiler_params=pltpu.CompilerParams(
            dimension_semantics=("parallel",),
            vmem_limit_bytes=VMEM_LIMIT),
    )(x, w_band, b_band)


def fused_mlp(x, w1, b1, w2, b2):
    """relu(x @ w1 + b1) @ w2 + b2 in one pallas_call; grid tiles the batch."""
    M, K1 = x.shape
    H = w1.shape[1]
    O = w2.shape[1]
    if M % 256 == 0:
        tm = 256
    elif M % 128 == 0:
        tm = 128
    else:
        tm = M                      # tiny batches: a single batch block
    return pl.pallas_call(
        _fused_mlp_kernel,
        out_shape=jax.ShapeDtypeStruct((M, O), jnp.float32),
        grid=(M // tm,),
        in_specs=[
            pl.BlockSpec((tm, K1), lambda i: (i, 0)),
            pl.BlockSpec((K1, H), lambda i: (0, 0)),
            pl.BlockSpec((1, H), lambda i: (0, 0)),
            pl.BlockSpec((H, O), lambda i: (0, 0)),
            pl.BlockSpec((1, O), lambda i: (0, 0)),
        ],
        out_specs=pl.BlockSpec((tm, O), lambda i: (i, 0)),
        compiler_params=pltpu.CompilerParams(
            dimension_semantics=("parallel",),
            vmem_limit_bytes=VMEM_LIMIT),
    )(x, w1, b1, w2, b2)


# --------------------- one-time host-side weight prep -----------------------

def _band_conv_weight(w, b, ow):
    """PyTorch (Cout, Cin, K, K) conv weight -> banded (K, W_in*Cin, OW*Cout)
    matmul weight with pool-friendly column order (even ow first, then odd ow),
    plus the matching (1, OW*Cout) bias row."""
    w = np.asarray(w, np.float32)
    cout, cin, k, _ = w.shape
    win = ow + k - 1
    col_order = list(range(0, ow, 2)) + list(range(1, ow, 2))
    band = np.zeros((k, win * cin, ow * cout), np.float32)
    for kh in range(k):
        for q, o in enumerate(col_order):
            for kw in range(k):
                wi = o + kw
                band[kh, wi * cin:(wi + 1) * cin, q * cout:(q + 1) * cout] = \
                    w[:, :, kh, kw].T
    bias = np.tile(np.asarray(b, np.float32), ow)[None, :]
    return jnp.asarray(band), jnp.asarray(bias)


def prepare_params(params):
    """Precompute every weight layout the kernels need (runs once, on host)."""
    w1b, b1b = _band_conv_weight(params["conv1_w"], params["conv1_b"], ow=24)
    w2b, b2b = _band_conv_weight(params["conv2_w"], params["conv2_b"], ow=8)
    # Fold PyTorch's NCHW flatten (x.view(-1, 1024)) into fc1: permute fc1's
    # input dimension from (c, h, w) order to the kernel's (h, w, c) order.
    C, H, W = 64, 4, 4
    perm = np.array([c * H * W + h * W + w
                     for h in range(H) for w in range(W) for c in range(C)],
                    np.int32)
    fc1_wt = jnp.asarray(np.asarray(params["fc1_w"], np.float32).T[perm])
    fc2_wt = jnp.asarray(np.asarray(params["fc2_w"], np.float32).T)
    return {
        "conv1_w": w1b, "conv1_b": b1b,
        "conv2_w": w2b, "conv2_b": b2b,
        "fc1_w": fc1_wt, "fc1_b": jnp.asarray(params["fc1_b"]).reshape(1, -1),
        "fc2_w": fc2_wt, "fc2_b": jnp.asarray(params["fc2_b"]).reshape(1, -1),
    }


# --------------------------------- forward ----------------------------------

def net_forward(x_nchw, p):
    N, C, H, W = x_nchw.shape
    x = x_nchw.reshape(N, H, W)                             # Cin=1: (h, w) layout
    x = conv_pool_relu(x, p["conv1_w"], p["conv1_b"])       # (N, 12, 12*32)
    x = conv_pool_relu(x, p["conv2_w"], p["conv2_b"])       # (N,  4,  4*64)
    x = x.reshape(N, 1024)                                  # (h, w, c) flatten
    return fused_mlp(x, p["fc1_w"], p["fc1_b"], p["fc2_w"], p["fc2_b"])


# --------------------------- deterministic init ------------------------------

def init_params(key):
    def uniform(k, shape, fan_in):
        bound = 1.0 / jnp.sqrt(jnp.float32(fan_in))
        return jax.random.uniform(k, shape, jnp.float32, -bound, bound)

    ks = jax.random.split(key, 8)
    return {
        "conv1_w": uniform(ks[0], (32, 1, 5, 5), 1 * 5 * 5),
        "conv1_b": uniform(ks[1], (32,), 1 * 5 * 5),
        "conv2_w": uniform(ks[2], (64, 32, 5, 5), 32 * 5 * 5),
        "conv2_b": uniform(ks[3], (64,), 32 * 5 * 5),
        "fc1_w":   uniform(ks[4], (128, 1024), 1024),
        "fc1_b":   uniform(ks[5], (128,), 1024),
        "fc2_w":   uniform(ks[6], (10, 128), 128),
        "fc2_b":   uniform(ks[7], (10,), 128),
    }


if __name__ == "__main__":
    key = jax.random.PRNGKey(0)
    k_params, k_x = jax.random.split(key)
    params = prepare_params(init_params(k_params))
    # Net's forward implies 1x28x28 inputs (flatten to 1024 after two conv/pool stages).
    x = jax.random.normal(k_x, (2, 1, 28, 28), dtype=jnp.float32)

    out = jax.jit(net_forward)(x, params)
    out = jax.block_until_ready(out)
    assert out.shape == (2, 10), out.shape
    print("KERNEL_OK")
</pallas_src>

<mosaic_0001>
module attributes {stable_mosaic.version = 11 : i64} {
  func.func @_conv_pool_relu_kernel(%arg0: i32, %arg1: memref<1x12x384xf32, #tpu.memory_space<vmem>>, %arg2: memref<5x384x512xf32, #tpu.memory_space<vmem>>, %arg3: memref<1x512xf32, #tpu.memory_space<vmem>>, %arg4: memref<1x4x256xf32, #tpu.memory_space<vmem>>) attributes {dimension_semantics = [#tpu.dimension_semantics<parallel>], iteration_bounds = array<i64: 2>, scalar_prefetch = 0 : i64, scratch_operands = 0 : i64, tpu.core_type = #tpu.core_type<tc>, window_params = [{transform_indices = @transform_0, window_bounds = array<i64: 1, 12, 384>}, {pipeline_mode = #tpu.pipeline_mode<synchronous>, transform_indices = @transform_1, window_bounds = array<i64: 5, 384, 512>}, {pipeline_mode = #tpu.pipeline_mode<synchronous>, transform_indices = @transform_2, window_bounds = array<i64: 1, 512>}, {transform_indices = @transform_3, window_bounds = array<i64: 1, 4, 256>}]} {
    %cst = arith.constant 0.000000e+00 : f32
    %0 = vector.broadcast %cst : f32 to vector<8x512xf32>
    %c0 = arith.constant 0 : index
    %c0_0 = arith.constant 0 : index
    %c0_1 = arith.constant 0 : index
    %1 = vector.load %arg1[%c0, %c0_0, %c0_1] : memref<1x12x384xf32, #tpu.memory_space<vmem>>, vector<1x8x384xf32>
    %2 = vector.shape_cast %1 : vector<1x8x384xf32> to vector<8x384xf32>
    %c0_2 = arith.constant 0 : index
    %c0_3 = arith.constant 0 : index
    %c0_4 = arith.constant 0 : index
    %3 = vector.load %arg2[%c0_2, %c0_3, %c0_4] : memref<5x384x512xf32, #tpu.memory_space<vmem>>, vector<1x384x512xf32>
    %4 = vector.shape_cast %3 : vector<1x384x512xf32> to vector<384x512xf32>
    %cst_5 = arith.constant dense<0.000000e+00> : vector<8x512xf32>
    %5 = tpu.matmul %2, %4, %cst_5 {dimension_numbers = #tpu.dot_dimension_numbers<[1], [0], [0], [1], [0, 0, 1, 1], [], []>} : vector<8x384xf32>, vector<384x512xf32>, vector<8x512xf32> -> vector<8x512xf32>
    %6 = arith.addf %0, %5 : vector<8x512xf32>
    %c0_6 = arith.constant 0 : index
    %c1 = arith.constant 1 : index
    %c0_7 = arith.constant 0 : index
    %7 = vector.load %arg1[%c0_6, %c1, %c0_7] : memref<1x12x384xf32, #tpu.memory_space<vmem>>, vector<1x8x384xf32>
    %8 = vector.shape_cast %7 : vector<1x8x384xf32> to vector<8x384xf32>
    %c1_8 = arith.constant 1 : index
    %c0_9 = arith.constant 0 : index
    %c0_10 = arith.constant 0 : index
    %9 = vector.load %arg2[%c1_8, %c0_9, %c0_10] : memref<5x384x512xf32, #tpu.memory_space<vmem>>, vector<1x384x512xf32>
    %10 = vector.shape_cast %9 : vector<1x384x512xf32> to vector<384x512xf32>
    %cst_11 = arith.constant dense<0.000000e+00> : vector<8x512xf32>
    %11 = tpu.matmul %8, %10, %cst_11 {dimension_numbers = #tpu.dot_dimension_numbers<[1], [0], [0], [1], [0, 0, 1, 1], [], []>} : vector<8x384xf32>, vector<384x512xf32>, vector<8x512xf32> -> vector<8x512xf32>
    %12 = arith.addf %6, %11 : vector<8x512xf32>
    %c0_12 = arith.constant 0 : index
    %c2 = arith.constant 2 : index
    %c0_13 = arith.constant 0 : index
    %13 = vector.load %arg1[%c0_12, %c2, %c0_13] : memref<1x12x384xf32, #tpu.memory_space<vmem>>, vector<1x8x384xf32>
    %14 = vector.shape_cast %13 : vector<1x8x384xf32> to vector<8x384xf32>
    %c2_14 = arith.constant 2 : index
    %c0_15 = arith.constant 0 : index
    %c0_16 = arith.constant 0 : index
    %15 = vector.load %arg2[%c2_14, %c0_15, %c0_16] : memref<5x384x512xf32, #tpu.memory_space<vmem>>, vector<1x384x512xf32>
    %16 = vector.shape_cast %15 : vector<1x384x512xf32> to vector<384x512xf32>
    %cst_17 = arith.constant dense<0.000000e+00> : vector<8x512xf32>
    %17 = tpu.matmul %14, %16, %cst_17 {dimension_numbers = #tpu.dot_dimension_numbers<[1], [0], [0], [1], [0, 0, 1, 1], [], []>} : vector<8x384xf32>, vector<384x512xf32>, vector<8x512xf32> -> vector<8x512xf32>
    %18 = arith.addf %12, %17 : vector<8x512xf32>
    %c0_18 = arith.constant 0 : index
    %c3 = arith.constant 3 : index
    %c0_19 = arith.constant 0 : index
    %19 = vector.load %arg1[%c0_18, %c3, %c0_19] : memref<1x12x384xf32, #tpu.memory_space<vmem>>, vector<1x8x384xf32>
    %20 = vector.shape_cast %19 : vector<1x8x384xf32> to vector<8x384xf32>
    %c3_20 = arith.constant 3 : index
    %c0_21 = arith.constant 0 : index
    %c0_22 = arith.constant 0 : index
    %21 = vector.load %arg2[%c3_20, %c0_21, %c0_22] : memref<5x384x512xf32, #tpu.memory_space<vmem>>, vector<1x384x512xf32>
    %22 = vector.shape_cast %21 : vector<1x384x512xf32> to vector<384x512xf32>
    %cst_23 = arith.constant dense<0.000000e+00> : vector<8x512xf32>
    %23 = tpu.matmul %20, %22, %cst_23 {dimension_numbers = #tpu.dot_dimension_numbers<[1], [0], [0], [1], [0, 0, 1, 1], [], []>} : vector<8x384xf32>, vector<384x512xf32>, vector<8x512xf32> -> vector<8x512xf32>
    %24 = arith.addf %18, %23 : vector<8x512xf32>
    %c0_24 = arith.constant 0 : index
    %c4 = arith.constant 4 : index
    %c0_25 = arith.constant 0 : index
    %25 = vector.load %arg1[%c0_24, %c4, %c0_25] : memref<1x12x384xf32, #tpu.memory_space<vmem>>, vector<1x8x384xf32>
    %26 = vector.shape_cast %25 : vector<1x8x384xf32> to vector<8x384xf32>
    %c4_26 = arith.constant 4 : index
    %c0_27 = arith.constant 0 : index
    %c0_28 = arith.constant 0 : index
    %27 = vector.load %arg2[%c4_26, %c0_27, %c0_28] : memref<5x384x512xf32, #tpu.memory_space<vmem>>, vector<1x384x512xf32>
    %28 = vector.shape_cast %27 : vector<1x384x512xf32> to vector<384x512xf32>
    %cst_29 = arith.constant dense<0.000000e+00> : vector<8x512xf32>
    %29 = tpu.matmul %26, %28, %cst_29 {dimension_numbers = #tpu.dot_dimension_numbers<[1], [0], [0], [1], [0, 0, 1, 1], [], []>} : vector<8x384xf32>, vector<384x512xf32>, vector<8x512xf32> -> vector<8x512xf32>
    %30 = arith.addf %24, %29 : vector<8x512xf32>
    %c0_30 = arith.constant 0 : index
    %c0_31 = arith.constant 0 : index
    %31 = vector.load %arg3[%c0_30, %c0_31] : memref<1x512xf32, #tpu.memory_space<vmem>>, vector<1x512xf32>
    %32 = vector.broadcast %31 : vector<1x512xf32> to vector<8x512xf32>
    %33 = arith.addf %30, %32 : vector<8x512xf32>
    %34 = tpu.iota {dimensions = array<i32: 1>} : vector<4x8xi32>
    %35 = tpu.iota {dimensions = array<i32: 0>} : vector<4x8xi32>
    %c2_i32 = arith.constant 2 : i32
    %36 = vector.broadcast %c2_i32 : i32 to vector<4x8xi32>
    %37 = arith.muli %36, %35 : vector<4x8xi32>
    %38 = arith.cmpi eq, %34, %37 : vector<4x8xi32>
    %39 = arith.extui %38 : vector<4x8xi1> to vector<4x8xi32>
    %40 = arith.sitofp %39 : vector<4x8xi32> to vector<4x8xf32>
    %c1_i32 = arith.constant 1 : i32
    %41 = vector.broadcast %c1_i32 : i32 to vector<4x8xi32>
    %42 = arith.addi %37, %41 : vector<4x8xi32>
    %43 = arith.cmpi eq, %34, %42 : vector<4x8xi32>
    %44 = arith.extui %43 : vector<4x8xi1> to vector<4x8xi32>
    %45 = arith.sitofp %44 : vector<4x8xi32> to vector<4x8xf32>
    %cst_32 = arith.constant dense<0.000000e+00> : vector<4x512xf32>
    %46 = tpu.matmul %40, %33, %cst_32 {dimension_numbers = #tpu.dot_dimension_numbers<[1], [0], [0], [1], [0, 0, 1, 1], [], []>} : vector<4x8xf32>, vector<8x512xf32>, vector<4x512xf32> -> vector<4x512xf32>
    %cst_33 = arith.constant dense<0.000000e+00> : vector<4x512xf32>
    %47 = tpu.matmul %45, %33, %cst_33 {dimension_numbers = #tpu.dot_dimension_numbers<[1], [0], [0], [1], [0, 0, 1, 1], [], []>} : vector<4x8xf32>, vector<8x512xf32>, vector<4x512xf32> -> vector<4x512xf32>
    %48 = arith.maximumf %46, %47 : vector<4x512xf32>
    %49 = vector.extract_strided_slice %48 {offsets = [0, 0], sizes = [4, 256], strides = [1, 1]} : vector<4x512xf32> to vector<4x256xf32>
    %50 = vector.extract_strided_slice %48 {offsets = [0, 256], sizes = [4, 256], strides = [1, 1]} : vector<4x512xf32> to vector<4x256xf32>
    %51 = arith.maximumf %49, %50 : vector<4x256xf32>
    %cst_34 = arith.constant 0.000000e+00 : f32
    %52 = vector.broadcast %cst_34 : f32 to vector<4x256xf32>
    %53 = arith.maximumf %51, %52 : vector<4x256xf32>
    %c0_35 = arith.constant 0 : index
    %c0_36 = arith.constant 0 : index
    %c0_37 = arith.constant 0 : index
    %54 = vector.load %arg4[%c0_35, %c0_36, %c0_37] : memref<1x4x256xf32, #tpu.memory_space<vmem>>, vector<1x4x256xf32>
    %55 = vector.shape_cast %54 : vector<1x4x256xf32> to vector<4x256xf32>
    %56 = vector.shape_cast %53 : vector<4x256xf32> to vector<1x4x256xf32>
    tpu.vector_store %arg4[%c0_35, %c0_36, %c0_37], %56 {strides = array<i32>} : memref<1x4x256xf32, #tpu.memory_space<vmem>>, vector<1x4x256xf32>,
    return
  }
  func.func @transform_0(%arg0: i32) -> (i32, i32, i32) {
    %c0_i32 = arith.constant 0 : i32
    %c0_i32_0 = arith.constant 0 : i32
    %c0_i32_1 = arith.constant 0 : i32
    return %arg0, %c0_i32, %c0_i32_0 : i32, i32, i32
  }
  func.func @transform_1(%arg0: i32) -> (i32, i32, i32) {
    %c0_i32 = arith.constant 0 : i32
    %c0_i32_0 = arith.constant 0 : i32
    %c0_i32_1 = arith.constant 0 : i32
    %c0_i32_2 = arith.constant 0 : i32
    return %c0_i32, %c0_i32_0, %c0_i32_1 : i32, i32, i32
  }
  func.func @transform_2(%arg0: i32) -> (i32, i32) {
    %c0_i32 = arith.constant 0 : i32
    %c0_i32_0 = arith.constant 0 : i32
    %c0_i32_1 = arith.constant 0 : i32
    return %c0_i32, %c0_i32_0 : i32, i32
  }
  func.func @transform_3(%arg0: i32) -> (i32, i32, i32) {
    %c0_i32 = arith.constant 0 : i32
    %c0_i32_0 = arith.constant 0 : i32
    %c0_i32_1 = arith.constant 0 : i32
    return %arg0, %c0_i32, %c0_i32_0 : i32, i32, i32
  }
}

module attributes {stable_mosaic.version = 11 : i64} {
  func.func @_conv_pool_relu_kernel(%arg0: i32, %arg1: memref<1x28x28xf32, #tpu.memory_space<vmem>>, %arg2: memref<5x28x768xf32, #tpu.memory_space<vmem>>, %arg3: memref<1x768xf32, #tpu.memory_space<vmem>>, %arg4: memref<1x12x384xf32, #tpu.memory_space<vmem>>) attributes {dimension_semantics = [#tpu.dimension_semantics<parallel>], iteration_bounds = array<i64: 2>, scalar_prefetch = 0 : i64, scratch_operands = 0 : i64, tpu.core_type = #tpu.core_type<tc>, window_params = [{transform_indices = @transform_0, window_bounds = array<i64: 1, 28, 28>}, {pipeline_mode = #tpu.pipeline_mode<synchronous>, transform_indices = @transform_1, window_bounds = array<i64: 5, 28, 768>}, {pipeline_mode = #tpu.pipeline_mode<synchronous>, transform_indices = @transform_2, window_bounds = array<i64: 1, 768>}, {transform_indices = @transform_3, window_bounds = array<i64: 1, 12, 384>}]} {
    %cst = arith.constant 0.000000e+00 : f32
    %0 = vector.broadcast %cst : f32 to vector<24x768xf32>
    %c0 = arith.constant 0 : index
    %c0_0 = arith.constant 0 : index
    %c0_1 = arith.constant 0 : index
    %1 = vector.load %arg1[%c0, %c0_0, %c0_1] : memref<1x28x28xf32, #tpu.memory_space<vmem>>, vector<1x24x28xf32>
    %2 = vector.shape_cast %1 : vector<1x24x28xf32> to vector<24x28xf32>
    %c0_2 = arith.constant 0 : index
    %c0_3 = arith.constant 0 : index
    %c0_4 = arith.constant 0 : index
    %3 = vector.load %arg2[%c0_2, %c0_3, %c0_4] : memref<5x28x768xf32, #tpu.memory_space<vmem>>, vector<1x28x768xf32>
    %4 = vector.shape_cast %3 : vector<1x28x768xf32> to vector<28x768xf32>
    %cst_5 = arith.constant dense<0.000000e+00> : vector<24x768xf32>
    %5 = tpu.matmul %2, %4, %cst_5 {dimension_numbers = #tpu.dot_dimension_numbers<[1], [0], [0], [1], [0, 0, 1, 1], [], []>} : vector<24x28xf32>, vector<28x768xf32>, vector<24x768xf32> -> vector<24x768xf32>
    %6 = arith.addf %0, %5 : vector<24x768xf32>
    %c0_6 = arith.constant 0 : index
    %c1 = arith.constant 1 : index
    %c0_7 = arith.constant 0 : index
    %7 = vector.load %arg1[%c0_6, %c1, %c0_7] : memref<1x28x28xf32, #tpu.memory_space<vmem>>, vector<1x24x28xf32>
    %8 = vector.shape_cast %7 : vector<1x24x28xf32> to vector<24x28xf32>
    %c1_8 = arith.constant 1 : index
    %c0_9 = arith.constant 0 : index
    %c0_10 = arith.constant 0 : index
    %9 = vector.load %arg2[%c1_8, %c0_9, %c0_10] : memref<5x28x768xf32, #tpu.memory_space<vmem>>, vector<1x28x768xf32>
    %10 = vector.shape_cast %9 : vector<1x28x768xf32> to vector<28x768xf32>
    %cst_11 = arith.constant dense<0.000000e+00> : vector<24x768xf32>
    %11 = tpu.matmul %8, %10, %cst_11 {dimension_numbers = #tpu.dot_dimension_numbers<[1], [0], [0], [1], [0, 0, 1, 1], [], []>} : vector<24x28xf32>, vector<28x768xf32>, vector<24x768xf32> -> vector<24x768xf32>
    %12 = arith.addf %6, %11 : vector<24x768xf32>
    %c0_12 = arith.constant 0 : index
    %c2 = arith.constant 2 : index
    %c0_13 = arith.constant 0 : index
    %13 = vector.load %arg1[%c0_12, %c2, %c0_13] : memref<1x28x28xf32, #tpu.memory_space<vmem>>, vector<1x24x28xf32>
    %14 = vector.shape_cast %13 : vector<1x24x28xf32> to vector<24x28xf32>
    %c2_14 = arith.constant 2 : index
    %c0_15 = arith.constant 0 : index
    %c0_16 = arith.constant 0 : index
    %15 = vector.load %arg2[%c2_14, %c0_15, %c0_16] : memref<5x28x768xf32, #tpu.memory_space<vmem>>, vector<1x28x768xf32>
    %16 = vector.shape_cast %15 : vector<1x28x768xf32> to vector<28x768xf32>
    %cst_17 = arith.constant dense<0.000000e+00> : vector<24x768xf32>
    %17 = tpu.matmul %14, %16, %cst_17 {dimension_numbers = #tpu.dot_dimension_numbers<[1], [0], [0], [1], [0, 0, 1, 1], [], []>} : vector<24x28xf32>, vector<28x768xf32>, vector<24x768xf32> -> vector<24x768xf32>
    %18 = arith.addf %12, %17 : vector<24x768xf32>
    %c0_18 = arith.constant 0 : index
    %c3 = arith.constant 3 : index
    %c0_19 = arith.constant 0 : index
    %19 = vector.load %arg1[%c0_18, %c3, %c0_19] : memref<1x28x28xf32, #tpu.memory_space<vmem>>, vector<1x24x28xf32>
    %20 = vector.shape_cast %19 : vector<1x24x28xf32> to vector<24x28xf32>
    %c3_20 = arith.constant 3 : index
    %c0_21 = arith.constant 0 : index
    %c0_22 = arith.constant 0 : index
    %21 = vector.load %arg2[%c3_20, %c0_21, %c0_22] : memref<5x28x768xf32, #tpu.memory_space<vmem>>, vector<1x28x768xf32>
    %22 = vector.shape_cast %21 : vector<1x28x768xf32> to vector<28x768xf32>
    %cst_23 = arith.constant dense<0.000000e+00> : vector<24x768xf32>
    %23 = tpu.matmul %20, %22, %cst_23 {dimension_numbers = #tpu.dot_dimension_numbers<[1], [0], [0], [1], [0, 0, 1, 1], [], []>} : vector<24x28xf32>, vector<28x768xf32>, vector<24x768xf32> -> vector<24x768xf32>
    %24 = arith.addf %18, %23 : vector<24x768xf32>
    %c0_24 = arith.constant 0 : index
    %c4 = arith.constant 4 : index
    %c0_25 = arith.constant 0 : index
    %25 = vector.load %arg1[%c0_24, %c4, %c0_25] : memref<1x28x28xf32, #tpu.memory_space<vmem>>, vector<1x24x28xf32>
    %26 = vector.shape_cast %25 : vector<1x24x28xf32> to vector<24x28xf32>
    %c4_26 = arith.constant 4 : index
    %c0_27 = arith.constant 0 : index
    %c0_28 = arith.constant 0 : index
    %27 = vector.load %arg2[%c4_26, %c0_27, %c0_28] : memref<5x28x768xf32, #tpu.memory_space<vmem>>, vector<1x28x768xf32>
    %28 = vector.shape_cast %27 : vector<1x28x768xf32> to vector<28x768xf32>
    %cst_29 = arith.constant dense<0.000000e+00> : vector<24x768xf32>
    %29 = tpu.matmul %26, %28, %cst_29 {dimension_numbers = #tpu.dot_dimension_numbers<[1], [0], [0], [1], [0, 0, 1, 1], [], []>} : vector<24x28xf32>, vector<28x768xf32>, vector<24x768xf32> -> vector<24x768xf32>
    %30 = arith.addf %24, %29 : vector<24x768xf32>
    %c0_30 = arith.constant 0 : index
    %c0_31 = arith.constant 0 : index
    %31 = vector.load %arg3[%c0_30, %c0_31] : memref<1x768xf32, #tpu.memory_space<vmem>>, vector<1x768xf32>
    %32 = vector.broadcast %31 : vector<1x768xf32> to vector<24x768xf32>
    %33 = arith.addf %30, %32 : vector<24x768xf32>
    %34 = tpu.iota {dimensions = array<i32: 1>} : vector<12x24xi32>
    %35 = tpu.iota {dimensions = array<i32: 0>} : vector<12x24xi32>
    %c2_i32 = arith.constant 2 : i32
    %36 = vector.broadcast %c2_i32 : i32 to vector<12x24xi32>
    %37 = arith.muli %36, %35 : vector<12x24xi32>
    %38 = arith.cmpi eq, %34, %37 : vector<12x24xi32>
    %39 = arith.extui %38 : vector<12x24xi1> to vector<12x24xi32>
    %40 = arith.sitofp %39 : vector<12x24xi32> to vector<12x24xf32>
    %c1_i32 = arith.constant 1 : i32
    %41 = vector.broadcast %c1_i32 : i32 to vector<12x24xi32>
    %42 = arith.addi %37, %41 : vector<12x24xi32>
    %43 = arith.cmpi eq, %34, %42 : vector<12x24xi32>
    %44 = arith.extui %43 : vector<12x24xi1> to vector<12x24xi32>
    %45 = arith.sitofp %44 : vector<12x24xi32> to vector<12x24xf32>
    %cst_32 = arith.constant dense<0.000000e+00> : vector<12x768xf32>
    %46 = tpu.matmul %40, %33, %cst_32 {dimension_numbers = #tpu.dot_dimension_numbers<[1], [0], [0], [1], [0, 0, 1, 1], [], []>} : vector<12x24xf32>, vector<24x768xf32>, vector<12x768xf32> -> vector<12x768xf32>
    %cst_33 = arith.constant dense<0.000000e+00> : vector<12x768xf32>
    %47 = tpu.matmul %45, %33, %cst_33 {dimension_numbers = #tpu.dot_dimension_numbers<[1], [0], [0], [1], [0, 0, 1, 1], [], []>} : vector<12x24xf32>, vector<24x768xf32>, vector<12x768xf32> -> vector<12x768xf32>
    %48 = arith.maximumf %46, %47 : vector<12x768xf32>
    %49 = vector.extract_strided_slice %48 {offsets = [0, 0], sizes = [12, 384], strides = [1, 1]} : vector<12x768xf32> to vector<12x384xf32>
    %50 = vector.extract_strided_slice %48 {offsets = [0, 384], sizes = [12, 384], strides = [1, 1]} : vector<12x768xf32> to vector<12x384xf32>
    %51 = arith.maximumf %49, %50 : vector<12x384xf32>
    %cst_34 = arith.constant 0.000000e+00 : f32
    %52 = vector.broadcast %cst_34 : f32 to vector<12x384xf32>
    %53 = arith.maximumf %51, %52 : vector<12x384xf32>
    %c0_35 = arith.constant 0 : index
    %c0_36 = arith.constant 0 : index
    %c0_37 = arith.constant 0 : index
    %54 = vector.load %arg4[%c0_35, %c0_36, %c0_37] : memref<1x12x384xf32, #tpu.memory_space<vmem>>, vector<1x12x384xf32>
    %55 = vector.shape_cast %54 : vector<1x12x384xf32> to vector<12x384xf32>
    %56 = vector.shape_cast %53 : vector<12x384xf32> to vector<1x12x384xf32>
    tpu.vector_store %arg4[%c0_35, %c0_36, %c0_37], %56 {strides = array<i32>} : memref<1x12x384xf32, #tpu.memory_space<vmem>>, vector<1x12x384xf32>,
    return
  }
  func.func @transform_0(%arg0: i32) -> (i32, i32, i32) {
    %c0_i32 = arith.constant 0 : i32
    %c0_i32_0 = arith.constant 0 : i32
    %c0_i32_1 = arith.constant 0 : i32
    return %arg0, %c0_i32, %c0_i32_0 : i32, i32, i32
  }
  func.func @transform_1(%arg0: i32) -> (i32, i32, i32) {
    %c0_i32 = arith.constant 0 : i32
    %c0_i32_0 = arith.constant 0 : i32
    %c0_i32_1 = arith.constant 0 : i32
    %c0_i32_2 = arith.constant 0 : i32
    return %c0_i32, %c0_i32_0, %c0_i32_1 : i32, i32, i32
  }
  func.func @transform_2(%arg0: i32) -> (i32, i32) {
    %c0_i32 = arith.constant 0 : i32
    %c0_i32_0 = arith.constant 0 : i32
    %c0_i32_1 = arith.constant 0 : i32
    return %c0_i32, %c0_i32_0 : i32, i32
  }
  func.func @transform_3(%arg0: i32) -> (i32, i32, i32) {
    %c0_i32 = arith.constant 0 : i32
    %c0_i32_0 = arith.constant 0 : i32
    %c0_i32_1 = arith.constant 0 : i32
    return %arg0, %c0_i32, %c0_i32_0 : i32, i32, i32
  }
}

module attributes {stable_mosaic.version = 11 : i64} {
  func.func @_fused_mlp_kernel(%arg0: i32, %arg1: memref<2x1024xf32, #tpu.memory_space<vmem>>, %arg2: memref<1024x128xf32, #tpu.memory_space<vmem>>, %arg3: memref<1x128xf32, #tpu.memory_space<vmem>>, %arg4: memref<128x10xf32, #tpu.memory_space<vmem>>, %arg5: memref<1x10xf32, #tpu.memory_space<vmem>>, %arg6: memref<2x10xf32, #tpu.memory_space<vmem>>) attributes {dimension_semantics = [#tpu.dimension_semantics<parallel>], iteration_bounds = array<i64: 1>, scalar_prefetch = 0 : i64, scratch_operands = 0 : i64, tpu.core_type = #tpu.core_type<tc>, window_params = [{transform_indices = @transform_0, window_bounds = array<i64: 2, 1024>}, {pipeline_mode = #tpu.pipeline_mode<synchronous>, transform_indices = @transform_1, window_bounds = array<i64: 1024, 128>}, {pipeline_mode = #tpu.pipeline_mode<synchronous>, transform_indices = @transform_2, window_bounds = array<i64: 1, 128>}, {pipeline_mode = #tpu.pipeline_mode<synchronous>, transform_indices = @transform_3, window_bounds = array<i64: 128, 10>}, {pipeline_mode = #tpu.pipeline_mode<synchronous>, transform_indices = @transform_4, window_bounds = array<i64: 1, 10>}, {transform_indices = @transform_5, window_bounds = array<i64: 2, 10>}]} {
    %c0 = arith.constant 0 : index
    %c0_0 = arith.constant 0 : index
    %0 = vector.load %arg1[%c0, %c0_0] : memref<2x1024xf32, #tpu.memory_space<vmem>>, vector<2x1024xf32>
    %c0_1 = arith.constant 0 : index
    %c0_2 = arith.constant 0 : index
    %1 = vector.load %arg2[%c0_1, %c0_2] : memref<1024x128xf32, #tpu.memory_space<vmem>>, vector<1024x128xf32>
    %cst = arith.constant dense<0.000000e+00> : vector<2x128xf32>
    %2 = tpu.matmul %0, %1, %cst {dimension_numbers = #tpu.dot_dimension_numbers<[1], [0], [0], [1], [0, 0, 1, 1], [], []>} : vector<2x1024xf32>, vector<1024x128xf32>, vector<2x128xf32> -> vector<2x128xf32>
    %c0_3 = arith.constant 0 : index
    %c0_4 = arith.constant 0 : index
    %3 = vector.load %arg3[%c0_3, %c0_4] : memref<1x128xf32, #tpu.memory_space<vmem>>, vector<1x128xf32>
    %4 = vector.broadcast %3 : vector<1x128xf32> to vector<2x128xf32>
    %5 = arith.addf %2, %4 : vector<2x128xf32>
    %cst_5 = arith.constant 0.000000e+00 : f32
    %6 = vector.broadcast %cst_5 : f32 to vector<2x128xf32>
    %7 = arith.maximumf %5, %6 : vector<2x128xf32>
    %c0_6 = arith.constant 0 : index
    %c0_7 = arith.constant 0 : index
    %8 = vector.load %arg4[%c0_6, %c0_7] : memref<128x10xf32, #tpu.memory_space<vmem>>, vector<128x10xf32>
    %cst_8 = arith.constant dense<0.000000e+00> : vector<2x10xf32>
    %9 = tpu.matmul %7, %8, %cst_8 {dimension_numbers = #tpu.dot_dimension_numbers<[1], [0], [0], [1], [0, 0, 1, 1], [], []>} : vector<2x128xf32>, vector<128x10xf32>, vector<2x10xf32> -> vector<2x10xf32>
    %c0_9 = arith.constant 0 : index
    %c0_10 = arith.constant 0 : index
    %10 = vector.load %arg5[%c0_9, %c0_10] : memref<1x10xf32, #tpu.memory_space<vmem>>, vector<1x10xf32>
    %11 = vector.broadcast %10 : vector<1x10xf32> to vector<2x10xf32>
    %12 = arith.addf %9, %11 : vector<2x10xf32>
    %c0_11 = arith.constant 0 : index
    %c0_12 = arith.constant 0 : index
    %13 = vector.load %arg6[%c0_11, %c0_12] : memref<2x10xf32, #tpu.memory_space<vmem>>, vector<2x10xf32>
    tpu.vector_store %arg6[%c0_11, %c0_12], %12 {strides = array<i32>} : memref<2x10xf32, #tpu.memory_space<vmem>>, vector<2x10xf32>,
    return
  }
  func.func @transform_0(%arg0: i32) -> (i32, i32) {
    %c0_i32 = arith.constant 0 : i32
    %c0_i32_0 = arith.constant 0 : i32
    return %arg0, %c0_i32 : i32, i32
  }
  func.func @transform_1(%arg0: i32) -> (i32, i32) {
    %c0_i32 = arith.constant 0 : i32
    %c0_i32_0 = arith.constant 0 : i32
    %c0_i32_1 = arith.constant 0 : i32
    return %c0_i32, %c0_i32_0 : i32, i32
  }
  func.func @transform_2(%arg0: i32) -> (i32, i32) {
    %c0_i32 = arith.constant 0 : i32
    %c0_i32_0 = arith.constant 0 : i32
    %c0_i32_1 = arith.constant 0 : i32
    return %c0_i32, %c0_i32_0 : i32, i32
  }
  func.func @transform_3(%arg0: i32) -> (i32, i32) {
    %c0_i32 = arith.constant 0 : i32
    %c0_i32_0 = arith.constant 0 : i32
    %c0_i32_1 = arith.constant 0 : i32
    return %c0_i32, %c0_i32_0 : i32, i32
  }
  func.func @transform_4(%arg0: i32) -> (i32, i32) {
    %c0_i32 = arith.constant 0 : i32
    %c0_i32_0 = arith.constant 0 : i32
    %c0_i32_1 = arith.constant 0 : i32
    return %c0_i32, %c0_i32_0 : i32, i32
  }
  func.func @transform_5(%arg0: i32) -> (i32, i32) {
    %c0_i32 = arith.constant 0 : i32
    %c0_i32_0 = arith.constant 0 : i32
    return %arg0, %c0_i32 : i32, i32
  }
}

</mosaic_0001>

<bundles_post_ra>
// kernel: net_forward.5
= control target key start
LH: loop header
LB: loop body
LE: loop exit
PB: predicated region body
PF: predicated region fallthrough
CT: control target
= control target key end

     0   :  { %10 = vsyncpa [#allocation3], 0  ;;  %s652_s0 = inlined_call_operand.vmem [shape: f32[2,1024], index: 0, kind: input, shape index: {}]   ;;  %s653_s1 = inlined_call_operand.hbm [shape: f32[1024,128], index: 1, kind: input, shape index: {}]   ;;  %s654_s2 = inlined_call_operand.hbm [shape: f32[1,128], index: 2, kind: input, shape index: {}]   ;;  %s655_s3 = inlined_call_operand.vmem [shape: f32[128,10], index: 3, kind: input, shape index: {}]   ;;  %s656_s4 = inlined_call_operand.hbm [shape: f32[1,10], index: 4, kind: input, shape index: {}]   ;;  %s657_s5 = inlined_call_operand.hbm [shape: f32[2,10], index: 5, kind: output, shape index: {}]  }
   0x1   :  { %11 = vsyncpa [#allocation6], 0  ;;  %s33_s20 = sshll.u32 %s654_s2, 4  ;;  %s34_s20 = int_to_ptr.hbm [resolvable:$true] %s33_s20 }
   0x2   :  { %12 = vsyncpa [#allocation4], 0  ;;  %s550_s21 = smov [#allocation5]   ;;  %s19_s25 = sshll.u32 %s653_s1, 4  ;;  %s20_s25 = int_to_ptr.hbm [resolvable:$true] %s19_s25 }
   0x3   :  { %s35_s22 = sshll.u32 %s550_s21, 4  ;;  %s551_s26 = smov [#allocation2]   ;;  %s36_s22 = int_to_ptr.vmem [resolvable:$true] %s35_s22 }
   0x4   :  { %38 = dma.hbm_to_vmem [thread:$0]  %s34_s20, 16, %s36_s22, [#allocation6]  }
   0x5   :  { %s21_s27 = sshll.u32 %s551_s26, 4  ;;  %s552_s28 = smov 128   ;;  %s22_s27 = int_to_ptr.vmem [resolvable:$true] %s21_s27 }
   0x6   :  { %s553_s29 = smov 8   ;;  %s46_s2 = sshll.u32 %s656_s4, 4  ;;  %s47_s2 = int_to_ptr.hbm [resolvable:$true] %s46_s2 }
   0x7   :  { %27 = dma.hbm_to_vmem [thread:$0]  %s20_s25, 16384, %s22_s27, [#allocation3], %s552_s28, %s552_s28, %s553_s29  }
   0x8   :  { %s554_s7 = smov [#allocation7]  }
   0x9   :  { %s48_s8 = sshll.u32 %s554_s7, 4  ;;  %s49_s8 = int_to_ptr.vmem [resolvable:$true] %s48_s8 }
   0xa   :  { %51 = dma.hbm_to_vmem [thread:$0]  %s47_s2, 16, %s49_s8, [#allocation6]  }
   0xb   :  { %544 = dma.done.wait [#allocation3], 16384  }
   0xc   :  { %545 = vsyncadd [#allocation3], 4294950912 }
   0xd   :  { %546 = dma.done.wait [#allocation6], 32  }
   0xe   :  { %547 = vsyncadd [#allocation6], 4294967264  ;;  %v113_v0 = vld [vmem:[#allocation2 + $0x178] sm:$0xff]  ;;  %v112_v2 = vld [vmem:[#allocation2 + $0x170] sm:$0xff]  ;;  %s429_s16 = sshll.u32 %s657_s5, 4  ;;  %vm420_vm0 = vcmask 74752   ;;  %s430_s16 = int_to_ptr.hbm [resolvable:$true] %s429_s16 }
   0xf   :  { %v81_v1 = vld [vmem:[#allocation2 + $0x78] sm:$0xff]  ;;  %259 = vmatpush.msra.mxu2 %v113_v0  ;;  %v80_v4 = vld [vmem:[#allocation2 + $0x70] sm:$0xff]  ;;  %v111_v6 = vld [vmem:[#allocation2 + $0x168] sm:$0xff] }
  0x10   :  { %219 = vmatpush.msra.mxu0 %v81_v1  ;;  %v129_v3 = vld [vmem:[#allocation2 + $0x1f8] sm:$0xff]  ;;  %v128_v7 = vld [vmem:[#allocation2 + $0x1f0] sm:$0xff]  ;;  %v79_v8 = vld [vmem:[#allocation2 + $0x68] sm:$0xff] }
  0x11   :  { %v97_v5 = vld [vmem:[#allocation2 + $0xf8] sm:$0xff]  ;;  %279 = vmatpush.msra.mxu3 %v129_v3  ;;  %260 = vmatpush.msra.mxu2 %v112_v2  ;;  %v96_v9 = vld [vmem:[#allocation2 + $0xf0] sm:$0xff]  ;;  %v127_v10 = vld [vmem:[#allocation2 + $0x1e8] sm:$0xff] }
  0x12   :  { %239 = vmatpush.msra.mxu1 %v97_v5  ;;  %220 = vmatpush.msra.mxu0 %v80_v4  ;;  %v110_v11 = vld [vmem:[#allocation2 + $0x160] sm:$0xff]  ;;  %v95_v13 = vld [vmem:[#allocation2 + $0xe8] sm:$0xff]  ;;  %v109_v16 = vld [vmem:[#allocation2 + $0x158] sm:$0xff] }
  0x13   :  { %280 = vmatpush.msra.mxu3 %v128_v7  ;;  %v78_v12 = vld [vmem:[#allocation2 + $0x60] sm:$0xff]  ;;  %261 = vmatpush.msra.mxu2 %v111_v6  ;;  %v77_v17 = vld [vmem:[#allocation2 + $0x58] sm:$0xff]  ;;  %v108_v20 = vld [vmem:[#allocation2 + $0x150] sm:$0xff] }
  0x14   :  { %240 = vmatpush.msra.mxu1 %v96_v9  ;;  %221 = vmatpush.msra.mxu0 %v79_v8  ;;  %v126_v14 = vld [vmem:[#allocation2 + $0x1e0] sm:$0xff]  ;;  %v125_v18 = vld [vmem:[#allocation2 + $0x1d8] sm:$0xff]  ;;  %v76_v21 = vld [vmem:[#allocation2 + $0x50] sm:$0xff] }
  0x15   :  { %v94_v15 = vld [vmem:[#allocation2 + $0xe0] sm:$0xff]  ;;  %281 = vmatpush.msra.mxu3 %v127_v10  ;;  %262 = vmatpush.msra.mxu2 %v110_v11  ;;  %v93_v19 = vld [vmem:[#allocation2 + $0xd8] sm:$0xff]  ;;  %v124_v22 = vld [vmem:[#allocation2 + $0x1d0] sm:$0xff] }
  0x16   :  { %241 = vmatpush.msra.mxu1 %v95_v13  ;;  %222 = vmatpush.msra.mxu0 %v78_v12  ;;  %v92_v23 = vld [vmem:[#allocation2 + $0xd0] sm:$0xff]  ;;  %v107_v24 = vld [vmem:[#allocation2 + $0x148] sm:$0xff]  ;;  %v106_v28 = vld [vmem:[#allocation2 + $0x140] sm:$0xff] }
  0x17   :  { %282 = vmatpush.msra.mxu3 %v126_v14  ;;  %263 = vmatpush.msra.mxu2 %v109_v16  ;;  %v75_v25 = vld [vmem:[#allocation2 + $0x48] sm:$0xff]  ;;  %v74_v29 = vld [vmem:[#allocation2 + $0x40] sm:$0xff]  ;;  %v105_v32 = vld [vmem:[#allocation2 + $0x138] sm:$0xff] }
  0x18   :  { %242 = vmatpush.msra.mxu1 %v94_v15  ;;  %223 = vmatpush.msra.mxu0 %v77_v17  ;;  %v123_v26 = vld [vmem:[#allocation2 + $0x1c8] sm:$0xff]  ;;  %v122_v30 = vld [vmem:[#allocation2 + $0x1c0] sm:$0xff]  ;;  %v73_v33 = vld [vmem:[#allocation2 + $0x38] sm:$0xff] }
  0x19   :  { %283 = vmatpush.msra.mxu3 %v125_v18  ;;  %264 = vmatpush.msra.mxu2 %v108_v20  ;;  %v91_v27 = vld [vmem:[#allocation2 + $0xc8] sm:$0xff]  ;;  %v90_v31 = vld [vmem:[#allocation2 + $0xc0] sm:$0xff]  ;;  %v121_v34 = vld [vmem:[#allocation2 + $0x1b8] sm:$0xff] }
  0x1a   :  { %243 = vmatpush.msra.mxu1 %v93_v19  ;;  %224 = vmatpush.msra.mxu0 %v76_v21  ;;  %v89_v35 = vld [vmem:[#allocation2 + $0xb8] sm:$0xff]  ;;  %v104_v36 = vld [vmem:[#allocation2 + $0x130] sm:$0xff]  ;;  %v103_v40 = vld [vmem:[#allocation2 + $0x128] sm:$0xff] }
  0x1b   :  { %284 = vmatpush.msra.mxu3 %v124_v22  ;;  %265 = vmatpush.msra.mxu2 %v107_v24  ;;  %v72_v37 = vld [vmem:[#allocation2 + $0x30] sm:$0xff]  ;;  %v71_v41 = vld [vmem:[#allocation2 + $0x28] sm:$0xff]  ;;  %v102_v44 = vld [vmem:[#allocation2 + $0x120] sm:$0xff] }
  0x1c   :  { %244 = vmatpush.msra.mxu1 %v92_v23  ;;  %225 = vmatpush.msra.mxu0 %v75_v25  ;;  %v120_v38 = vld [vmem:[#allocation2 + $0x1b0] sm:$0xff]  ;;  %v119_v42 = vld [vmem:[#allocation2 + $0x1a8] sm:$0xff]  ;;  %v70_v45 = vld [vmem:[#allocation2 + $0x20] sm:$0xff] }
  0x1d   :  { %285 = vmatpush.msra.mxu3 %v123_v26  ;;  %266 = vmatpush.msra.mxu2 %v106_v28  ;;  %v88_v39 = vld [vmem:[#allocation2 + $0xb0] sm:$0xff]  ;;  %v87_v43 = vld [vmem:[#allocation2 + $0xa8] sm:$0xff]  ;;  %v118_v46 = vld [vmem:[#allocation2 + $0x1a0] sm:$0xff] }
  0x1e   :  { %245 = vmatpush.msra.mxu1 %v91_v27  ;;  %226 = vmatpush.msra.mxu0 %v74_v29  ;;  %v86_v47 = vld [vmem:[#allocation2 + $0xa0] sm:$0xff]  ;;  %v101_v48 = vld [vmem:[#allocation2 + $0x118] sm:$0xff]  ;;  %v100_v52 = vld [vmem:[#allocation2 + $0x110] sm:$0xff] }
  0x1f   :  { %286 = vmatpush.msra.mxu3 %v122_v30  ;;  %267 = vmatpush.msra.mxu2 %v105_v32  ;;  %v69_v49 = vld [vmem:[#allocation2 + $0x18] sm:$0xff]  ;;  %v68_v53 = vld [vmem:[#allocation2 + $0x10] sm:$0xff]  ;;  %v99_v56 = vld [vmem:[#allocation2 + $0x108] sm:$0xff] }
  0x20   :  { %246 = vmatpush.msra.mxu1 %v90_v31  ;;  %227 = vmatpush.msra.mxu0 %v73_v33  ;;  %v117_v50 = vld [vmem:[#allocation2 + $0x198] sm:$0xff]  ;;  %v116_v54 = vld [vmem:[#allocation2 + $0x190] sm:$0xff]  ;;  %v67_v57 = vld [vmem:[#allocation2 + $0x8] sm:$0xff] }
  0x21   :  { %287 = vmatpush.msra.mxu3 %v121_v34  ;;  %268 = vmatpush.msra.mxu2 %v104_v36  ;;  %v85_v51 = vld [vmem:[#allocation2 + $0x98] sm:$0xff]  ;;  %v84_v55 = vld [vmem:[#allocation2 + $0x90] sm:$0xff]  ;;  %v115_v58 = vld [vmem:[#allocation2 + $0x188] sm:$0xff] }
  0x22   :  { %247 = vmatpush.msra.mxu1 %v89_v35  ;;  %228 = vmatpush.msra.mxu0 %v72_v37  ;;  %v83_v59 = vld [vmem:[#allocation2 + $0x88] sm:$0xff]  ;;  %v98_v60 = vld [vmem:[#allocation2 + $0x100] sm:$0xff]  ;;  %v177_v62 = vld [vmem:[#allocation2 + $0x378] sm:$0xff] }
  0x23   :  { %288 = vmatpush.msra.mxu3 %v120_v38  ;;  %269 = vmatpush.msra.mxu2 %v103_v40  ;;  %v66_v61 = vld [vmem:[#allocation2] sm:$0xff]  ;;  %v145_v0 = vld [vmem:[#allocation2 + $0x278] sm:$0xff]  ;;  %v176_v2 = vld [vmem:[#allocation2 + $0x370] sm:$0xff] }
  0x24   :  { %248 = vmatpush.msra.mxu1 %v88_v39  ;;  %229 = vmatpush.msra.mxu0 %v71_v41  ;;  %v114_v63 = vld [vmem:[#allocation2 + $0x180] sm:$0xff]  ;;  %v193_v1 = vld [vmem:[#allocation2 + $0x3f8] sm:$0xff]  ;;  %v144_v4 = vld [vmem:[#allocation2 + $0x270] sm:$0xff] }
  0x25   :  { %289 = vmatpush.msra.mxu3 %v119_v42  ;;  %270 = vmatpush.msra.mxu2 %v102_v44  ;;  %v82_v3 = vld [vmem:[#allocation2 + $0x80] sm:$0xff]  ;;  %v161_v5 = vld [vmem:[#allocation2 + $0x2f8] sm:$0xff]  ;;  %v175_v6 = vld [vmem:[#allocation2 + $0x368] sm:$0xff] }
  0x26   :  { %249 = vmatpush.msra.mxu1 %v87_v43  ;;  %230 = vmatpush.msra.mxu0 %v70_v45  ;;  %v192_v7 = vld [vmem:[#allocation2 + $0x3f0] sm:$0xff]  ;;  %v143_v8 = vld [vmem:[#allocation2 + $0x268] sm:$0xff]  ;;  %v174_v10 = vld [vmem:[#allocation2 + $0x360] sm:$0xff] }
  0x27   :  { %290 = vmatpush.msra.mxu3 %v118_v46  ;;  %271 = vmatpush.msra.mxu2 %v101_v48  ;;  %v160_v9 = vld [vmem:[#allocation2 + $0x2f0] sm:$0xff]  ;;  %v191_v11 = vld [vmem:[#allocation2 + $0x3e8] sm:$0xff]  ;;  %v142_v12 = vld [vmem:[#allocation2 + $0x260] sm:$0xff] }
  0x28   :  { %250 = vmatpush.msra.mxu1 %v86_v47  ;;  %231 = vmatpush.msra.mxu0 %v69_v49  ;;  %v159_v13 = vld [vmem:[#allocation2 + $0x2e8] sm:$0xff]  ;;  %v64_v14 = vld [vmem:[%s652_s0] sm:$0xff]  ;;  %v190_v16 = vld [vmem:[#allocation2 + $0x3e0] sm:$0xff] }
  0x29   :  { %291 = vmatpush.msra.mxu3 %v117_v50  ;;  %272 = vmatpush.msra.mxu2 %v100_v52  ;;  %v173_v15 = vld [vmem:[#allocation2 + $0x358] sm:$0xff]  ;;  %200 = vst [vmem:[#allocation1] ss:$4 sm:$0xff] %v64_v14  ;;  %v158_v18 = vld [vmem:[#allocation2 + $0x2e0] sm:$0xff]  ;;  %v172_v19 = vld [vmem:[#allocation2 + $0x350] sm:$0xff] }
  0x2a   :  { %251 = vmatpush.msra.mxu1 %v85_v51  ;;  %232 = vmatpush.msra.mxu0 %v68_v53  ;;  %v141_v17 = vld [vmem:[#allocation2 + $0x258] sm:$0xff]  ;;  %v140_v21 = vld [vmem:[#allocation2 + $0x250] sm:$0xff]  ;;  %v171_v23 = vld [vmem:[#allocation2 + $0x348] sm:$0xff] }
  0x2b   :  { %292 = vmatpush.msra.mxu3 %v116_v54  ;;  %273 = vmatpush.msra.mxu2 %v99_v56  ;;  %v189_v20 = vld [vmem:[#allocation2 + $0x3d8] sm:$0xff]  ;;  %v188_v24 = vld [vmem:[#allocation2 + $0x3d0] sm:$0xff]  ;;  %v65_v25 = vld [vmem:[%s652_s0 + $0x8] sm:$0xff] }
  0x2c   :  { %252 = vmatpush.msra.mxu1 %v84_v55  ;;  %233 = vmatpush.msra.mxu0 %v67_v57  ;;  %v157_v22 = vld [vmem:[#allocation2 + $0x2d8] sm:$0xff]  ;;  %v139_v26 = vld [vmem:[#allocation2 + $0x248] sm:$0xff]  ;;  %v156_v27 = vld [vmem:[#allocation2 + $0x2d0] sm:$0xff]  ;;  %202 = vst [vmem:[#allocation1 + $0x20] ss:$4 sm:$0xff] %v65_v25 }
  0x2d   :  { %293 = vmatpush.msra.mxu3 %v115_v58  ;;  %274 = vmatpush.msra.mxu2 %v98_v60  ;;  %v170_v28 = vld [vmem:[#allocation2 + $0x340] sm:$0xff]  ;;  %v187_v29 = vld [vmem:[#allocation2 + $0x3c8] sm:$0xff]  ;;  %v169_v32 = vld [vmem:[#allocation2 + $0x338] sm:$0xff] }
  0x2e   :  { %253 = vmatpush.msra.mxu1 %v83_v59  ;;  %234 = vmatpush.msra.mxu0 %v66_v61  ;;  %v138_v30 = vld [vmem:[#allocation2 + $0x240] sm:$0xff]  ;;  %v155_v31 = vld [vmem:[#allocation2 + $0x2c8] sm:$0xff]  ;;  %v137_v34 = vld [vmem:[#allocation2 + $0x238] sm:$0xff] }
  0x2f   :  { %339 = vmatpush.msrb.mxu2 %v177_v62  ;;  %294 = vmatpush.msra.mxu3 %v114_v63  ;;  %v186_v33 = vld [vmem:[#allocation2 + $0x3c0] sm:$0xff]  ;;  %v168_v36 = vld [vmem:[#allocation2 + $0x330] sm:$0xff]  ;;  %v185_v37 = vld [vmem:[#allocation2 + $0x3b8] sm:$0xff] }
  0x30   :  { %299 = vmatpush.msrb.mxu0 %v145_v0  ;;  %254 = vmatpush.msra.mxu1 %v82_v3  ;;  %v154_v35 = vld [vmem:[#allocation2 + $0x2c0] sm:$0xff]  ;;  %v136_v38 = vld [vmem:[#allocation2 + $0x230] sm:$0xff]  ;;  %v153_v39 = vld [vmem:[#allocation2 + $0x2b8] sm:$0xff] }
  0x31   :  { %359 = vmatpush.msrb.mxu3 %v193_v1  ;;  %340 = vmatpush.msrb.mxu2 %v176_v2  ;;  %v167_v40 = vld [vmem:[#allocation2 + $0x328] sm:$0xff]  ;;  %v184_v41 = vld [vmem:[#allocation2 + $0x3b0] sm:$0xff]  ;;  %v166_v44 = vld [vmem:[#allocation2 + $0x320] sm:$0xff] }
  0x32   :  { %300 = vmatpush.msrb.mxu0 %v144_v4  ;;  %319 = vmatpush.msrb.mxu1 %v161_v5  ;;  %v135_v42 = vld [vmem:[#allocation2 + $0x228] sm:$0xff]  ;;  %v152_v43 = vld [vmem:[#allocation2 + $0x2b0] sm:$0xff]  ;;  %v134_v47 = vld [vmem:[#allocation2 + $0x220] sm:$0xff] }
  0x33   :  { %341 = vmatpush.msrb.mxu2 %v175_v6  ;;  %360 = vmatpush.msrb.mxu3 %v192_v7  ;;  %v183_v45 = vld [vmem:[#allocation2 + $0x3a8] sm:$0xff]  ;;  %v165_v49 = vld [vmem:[#allocation2 + $0x318] sm:$0xff]  ;;  %v182_v50 = vld [vmem:[#allocation2 + $0x3a0] sm:$0xff] }
  0x34   :  { %301 = vmatpush.msrb.mxu0 %v143_v8  ;;  %320 = vmatpush.msrb.mxu1 %v160_v9  ;;  %v205_v46 = vld.sshfl [vmem:[#allocation1 + $0x10] sm:$0xff pattern:$0x73625140]  ;;  %v203_v51 = vld.sshfl [vmem:[#allocation1] sm:$0xff pattern:$0x73625140] }
  0x35   :  { %342 = vmatpush.msrb.mxu2 %v174_v10  ;;  %361 = vmatpush.msrb.mxu3 %v191_v11  ;;  %v151_v48 = vld [vmem:[#allocation2 + $0x2a8] sm:$0xff]  ;;  %v206_v52 = vld.sshfl [vmem:[#allocation1 + $0x18] sm:$0xff pattern:$0x73625140]  ;;  %v133_v53 = vld [vmem:[#allocation2 + $0x218] sm:$0xff] }
  0x36   :  { %302 = vmatpush.msrb.mxu0 %v142_v12  ;;  %321 = vmatpush.msrb.mxu1 %v159_v13  ;;  %v150_v54 = vld [vmem:[#allocation2 + $0x2a0] sm:$0xff]  ;;  %v164_v55 = vld [vmem:[#allocation2 + $0x310] sm:$0xff]  ;;  %v181_v56 = vld [vmem:[#allocation2 + $0x398] sm:$0xff] }
  0x37   :  { %343 = vmatpush.msrb.mxu2 %v173_v15  ;;  %362 = vmatpush.msrb.mxu3 %v190_v16  ;;  %v204_v57 = vld.sshfl [vmem:[#allocation1 + $0x8] sm:$0xff pattern:$0x73625140]  ;;  %v132_v58 = vld [vmem:[#allocation2 + $0x210] sm:$0xff]  ;;  %v149_v59 = vld [vmem:[#allocation2 + $0x298] sm:$0xff] }
  0x38   :  { %303 = vmatpush.msrb.mxu0 %v141_v17  ;;  %322 = vmatpush.msrb.mxu1 %v158_v18  ;;  %v163_v60 = vld [vmem:[#allocation2 + $0x308] sm:$0xff]  ;;  %v180_v61 = vld [vmem:[#allocation2 + $0x390] sm:$0xff]  ;;  %v162_v0 = vld [vmem:[#allocation2 + $0x300] sm:$0xff] }
  0x39   :  { %344 = vmatpush.msrb.mxu2 %v172_v19  ;;  %363 = vmatpush.msrb.mxu3 %v189_v20  ;;  %v131_v62 = vld [vmem:[#allocation2 + $0x208] sm:$0xff]  ;;  %v148_v63 = vld [vmem:[#allocation2 + $0x290] sm:$0xff]  ;;  %v130_v3 = vld [vmem:[#allocation2 + $0x200] sm:$0xff] }
  0x3a   :  { %304 = vmatpush.msrb.mxu0 %v140_v21  ;;  %323 = vmatpush.msrb.mxu1 %v157_v22  ;;  %v179_v1 = vld [vmem:[#allocation2 + $0x388] sm:$0xff]  ;;  %v178_v5 = vld [vmem:[#allocation2 + $0x380] sm:$0xff]  ;;  %v207_v6 = vld.sshfl [vmem:[#allocation1 + $0x20] sm:$0xff pattern:$0x73625140] }
  0x3b   :  { %345 = vmatpush.msrb.mxu2 %v171_v23  ;;  %364 = vmatpush.msrb.mxu3 %v188_v24  ;;  %v209_v2 = vld.sshfl [vmem:[#allocation1 + $0x30] sm:$0xff pattern:$0x73625140]  ;;  %v210_v7 = vld.sshfl [vmem:[#allocation1 + $0x38] sm:$0xff pattern:$0x73625140] }
  0x3c   :  { %305 = vmatpush.msrb.mxu0 %v139_v26  ;;  %324 = vmatpush.msrb.mxu1 %v156_v27  ;;  %v147_v4 = vld [vmem:[#allocation2 + $0x288] sm:$0xff]  ;;  %v146_v8 = vld [vmem:[#allocation2 + $0x280] sm:$0xff]  ;;  %v395_v9 = vld [vmem:[%s655_s3 + $0x78] sm:$0xff] }
  0x3d   :  { %346 = vmatpush.msrb.mxu2 %v170_v28  ;;  %365 = vmatpush.msrb.mxu3 %v187_v29  ;;  %v208_v10 = vld.sshfl [vmem:[#allocation1 + $0x28] sm:$0xff pattern:$0x73625140]  ;;  %v394_v11 = vld [vmem:[%s655_s3 + $0x70] sm:$0xff]  ;;  %v392_v13 = vld [vmem:[%s655_s3 + $0x60] sm:$0xff] }
  0x3e   :  { %306 = vmatpush.msrb.mxu0 %v138_v30  ;;  %325 = vmatpush.msrb.mxu1 %v155_v31  ;;  %v393_v12 = vld [vmem:[%s655_s3 + $0x68] sm:$0xff]  ;;  %v391_v14 = vld [vmem:[%s655_s3 + $0x58] sm:$0xff]  ;;  %v390_v15 = vld [vmem:[%s655_s3 + $0x50] sm:$0xff] }
  0x3f   :  { %347 = vmatpush.msrb.mxu2 %v169_v32  ;;  %366 = vmatpush.msrb.mxu3 %v186_v33  ;;  %v389_v16 = vld [vmem:[%s655_s3 + $0x48] sm:$0xff]  ;;  %v388_v17 = vld [vmem:[%s655_s3 + $0x40] sm:$0xff]  ;;  %v387_v18 = vld [vmem:[%s655_s3 + $0x38] sm:$0xff] }
  0x40   :  { %307 = vmatpush.msrb.mxu0 %v137_v34  ;;  %326 = vmatpush.msrb.mxu1 %v154_v35  ;;  %v386_v19 = vld [vmem:[%s655_s3 + $0x30] sm:$0xff]  ;;  %v385_v20 = vld [vmem:[%s655_s3 + $0x28] sm:$0xff]  ;;  %v384_v21 = vld [vmem:[%s655_s3 + $0x20] sm:$0xff] }
  0x41   :  { %348 = vmatpush.msrb.mxu2 %v168_v36  ;;  %367 = vmatpush.msrb.mxu3 %v185_v37  ;;  %v383_v22 = vld [vmem:[%s655_s3 + $0x18] sm:$0xff]  ;;  %v382_v23 = vld [vmem:[%s655_s3 + $0x10] sm:$0xff]  ;;  %v381_v24 = vld [vmem:[%s655_s3 + $0x8] sm:$0xff] }
  0x42   :  { %308 = vmatpush.msrb.mxu0 %v136_v38  ;;  %327 = vmatpush.msrb.mxu1 %v153_v39  ;;  %v380_v25 = vld [vmem:[%s655_s3] sm:$0xff]  ;;  %v446_v26 = vld [vmem:[#allocation5] ss:$0 sm:$0xff]  ;;  %s555_s3 = smov [#allocation8]  }
  0x43   :  { %349 = vmatpush.msrb.mxu2 %v167_v40  ;;  %368 = vmatpush.msrb.mxu3 %v184_v41  ;;  %s427_s13 = sshll.u32 %s555_s3, 4  ;;  %s428_s13 = int_to_ptr.vmem [resolvable:$true] %s427_s13 }
  0x44   :  { %309 = vmatpush.msrb.mxu0 %v135_v42  ;;  %328 = vmatpush.msrb.mxu1 %v152_v43 }
  0x45   :  { %350 = vmatpush.msrb.mxu2 %v166_v44  ;;  %369 = vmatpush.msrb.mxu3 %v183_v45  ;;  %v447_v44 = vld [vmem:[#allocation7] ss:$0 sm:$0xff] }
  0x46   :  { %275 = vmatmul.f32.vlgmr.msra.gmra.mxu2 %v205_v46  ;;  %310 = vmatpush.msrb.mxu0 %v134_v47 }
  0x47   :  { %329 = vmatpush.msrb.mxu1 %v151_v48  ;;  %351 = vmatpush.msrb.mxu2 %v165_v49 }
  0x48   :  { %370 = vmatpush.msrb.mxu3 %v182_v50  ;;  %235 = vmatmul.f32.vlgmr.msra.gmra.mxu0 %v203_v51 }
  0x49   :  { %295 = vmatmul.f32.vlgmr.msra.gmra.mxu3 %v206_v52  ;;  %311 = vmatpush.msrb.mxu0 %v133_v53 }
  0x4a   :  { %330 = vmatpush.msrb.mxu1 %v150_v54  ;;  %352 = vmatpush.msrb.mxu2 %v164_v55 }
  0x4b   :  { %371 = vmatpush.msrb.mxu3 %v181_v56  ;;  %255 = vmatmul.f32.vlgmr.msra.gmra.mxu1 %v204_v57 }
  0x4c   :  { %312 = vmatpush.msrb.mxu0 %v132_v58  ;;  %331 = vmatpush.msrb.mxu1 %v149_v59 }
  0x4d   :  { %353 = vmatpush.msrb.mxu2 %v163_v60  ;;  %372 = vmatpush.msrb.mxu3 %v180_v61 }
  0x4e   :  { %313 = vmatpush.msrb.mxu0 %v131_v62  ;;  %332 = vmatpush.msrb.mxu1 %v148_v63 }
  0x4f   :  { %354 = vmatpush.msrb.mxu2 %v162_v0  ;;  %373 = vmatpush.msrb.mxu3 %v179_v1 }
  0x50   :  { %355 = vmatmul.f32.vlgmr.msrb.gmra.mxu2 %v209_v2  ;;  %314 = vmatpush.msrb.mxu0 %v130_v3 }
  0x51   :  { %333 = vmatpush.msrb.mxu1 %v147_v4  ;;  %374 = vmatpush.msrb.mxu3 %v178_v5 }
  0x52   :  { %315 = vmatmul.f32.vlgmr.msrb.gmra.mxu0 %v207_v6  ;;  %375 = vmatmul.f32.vlgmr.msrb.gmra.mxu3 %v210_v7 }
  0x53   :  { %334 = vmatpush.msrb.mxu1 %v146_v8  ;;  %400 = vmatpush.msra.mxu0 %v395_v9 }
  0x54   :  { %335 = vmatmul.f32.vlgmr.msrb.gmra.mxu1 %v208_v10 }
  0x55   :  { %401 = vmatpush.msra.mxu0 %v394_v11 }
  0x57   :  { %402 = vmatpush.msra.mxu0 %v393_v12 }
  0x59   :  { %403 = vmatpush.msra.mxu0 %v392_v13 }
  0x5b   :  { %404 = vmatpush.msra.mxu0 %v391_v14 }
  0x5d   :  { %405 = vmatpush.msra.mxu0 %v390_v15 }
  0x5f   :  { %406 = vmatpush.msra.mxu0 %v389_v16 }
  0x61   :  { %407 = vmatpush.msra.mxu0 %v388_v17 }
  0x63   :  { %408 = vmatpush.msra.mxu0 %v387_v18 }
  0x65   :  { %409 = vmatpush.msra.mxu0 %v386_v19 }
  0x67   :  { %410 = vmatpush.msra.mxu0 %v385_v20 }
  0x69   :  { %411 = vmatpush.msra.mxu0 %v384_v21 }
  0x6b   :  { %412 = vmatpush.msra.mxu0 %v383_v22 }
  0x6d   :  { %413 = vmatpush.msra.mxu0 %v382_v23 }
  0x6f   :  { %414 = vmatpush.msra.mxu0 %v381_v24 }
  0x71   :  { %415 = vmatpush.msra.mxu0 %v380_v25 }
  0xc5   :  { %v236_v27 = vpop.f32.mrf.mxu0 }
  0xc6   :  { %v237_v28 = vadd.f32 %v446_v26, %v236_v27 }
  0xc8   :  { %v256_v29 = vpop.f32.mrf.mxu1 }
  0xc9   :  { %v257_v30 = vadd.f32 %v256_v29, %v237_v28  ;;  %v276_v31 = vpop.f32.mrf.mxu2 }
  0xcb   :  { %v277_v32 = vadd.f32 %v276_v31, %v257_v30 }
  0xcc   :  { %v296_v33 = vpop.f32.mrf.mxu3 }
  0xcd   :  { %v297_v34 = vadd.f32 %v296_v33, %v277_v32 }
  0xcf   :  { %v316_v35 = vpop.f32.mrf.mxu0 }
  0xd0   :  { %v317_v36 = vadd.f32 %v316_v35, %v297_v34 }
  0xd1   :  { %v336_v37 = vpop.f32.mrf.mxu1 }
  0xd2   :  { %v337_v38 = vadd.f32 %v336_v37, %v317_v36 }
  0xd3   :  { %v356_v39 = vpop.f32.mrf.mxu2 }
  0xd4   :  { %v357_v40 = vadd.f32 %v356_v39, %v337_v38 }
  0xd5   :  { %v376_v41 = vpop.f32.mrf.mxu3 }
  0xd6   :  { %v377_v42 = vadd.f32 %v376_v41, %v357_v40 }
  0xd8   :  { %v379_v43 = vmax.f32 %v377_v42, 0.0 }
  0xda   :  { %416 = vmatmul.f32.vlgmr.msra.gmra.mxu0 %v379_v43 }
 0x157   :  { %v417_v45 = vpop.f32.mrf.mxu0 }
 0x158   :  { %v418_v46 = vadd.f32 %v447_v44, %v417_v45 }
 0x15a   :  { %421 = vst.msk [vmem:[#allocation8] sm:$0x3] %vm420_vm0, %v418_v46 }
 0x15b   :  { %432 = dma.vmem_to_hbm [thread:$0]  %s428_s13, 32, %s430_s16, [#allocation4]  }
 0x15c   :  { %548 = dma.done.wait [#allocation4], 32  }
 0x15d   :  { %549 = vsyncadd [#allocation4], 4294967264 }
 0x15e   :  { %437 = vsyncpa [#allocation3], 1 }
 0x15f   :  { %438 = vsyncpa [#allocation6], 1 }
 0x160   :  { %439 = vsyncpa [#allocation4], 1 }

// kernel: net_forward.3
= control target key start
LH: loop header
LB: loop body
LE: loop exit
PB: predicated region body
PF: predicated region fallthrough
CT: control target
= control target key end

     0   :  { %8 = vsyncpa [#allocation3], 0  ;;  %s2493_s0 = inlined_call_operand.vmem [shape: f32[2,28,28], index: 0, kind: input, shape index: {}]   ;;  %s2494_s1 = inlined_call_operand.hbm [shape: f32[5,28,768], index: 1, kind: input, shape index: {}]   ;;  %s2495_s2 = inlined_call_operand.hbm [shape: f32[1,768], index: 2, kind: input, shape index: {}]   ;;  %s2496_s3 = inlined_call_operand.vmem [shape: f32[2,12,384], index: 3, kind: output, shape index: {}]  }
   0x1   :  { %9 = vsyncpa [#allocation5], 0  ;;  %s2059_s12 = smov 0  }
   0x2 LB: > { %s125_s15 = sshll.u32 %s2494_s1, 4  ;;  %s1762_s16 = sadd.s32 4294967295, %s2032_s12   ;;  %s2032_s12 = sphi %s2059_s12, %s15_s12   ;;  %s126_s15 = int_to_ptr.hbm [resolvable:$true] %s125_s15 }
   0x3   : > { %p1764_p0 = scmp.ge.s32.totalorder %s2032_s12, 1  ;;  %p114_p1 = scmp.lt.s32.totalorder %s2032_s12, 3 }
   0x4   : > { %p1941_p2 = scmp.eq.s32.totalorder %s1762_s16, 0  ;;  %s2034_s18 = smov [#allocation2]  }
   0x5   : > { %p2070_p3 = pnand %p1764_p0, %p114_p1  ;;  %s127_s19 = sshll.u32 %s2034_s18, 4  ;;  %s128_s19 = int_to_ptr.vmem [resolvable:$true] %s127_s19 }
   0x6   : > { %s140_s22 = sshll.u32 %s2495_s2, 4  ;;  %s2035_s23 = smov [#allocation4]   ;;  %s141_s22 = int_to_ptr.hbm [resolvable:$true] %s140_s22 }
   0x7   : > { %p1934_p4 = pneg %p2070_p3  ;;  %s142_s24 = sshll.u32 %s2035_s23, 4  ;;  %s143_s24 = int_to_ptr.vmem [resolvable:$true] %s142_s24 }
   0x8   : > { %s2036_s25 = smov 768   ;;  %s2037_s26 = smov 48  }
   0x9   : > { %p1935_p5 = pnand %p1941_p2, %p1934_p4  ;;  %163 = sbr.rel (%p2070_p3) target bundleno = 518 (0x206), region = 32 }
   0xb   : > { %1937 = dma.hbm_to_vmem [thread:$0]  (!%p1935_p5), %s126_s15, 15360, %s128_s19, [#allocation3], %s2036_s25, %s2036_s25, %s2037_s26  }
   0xc   : > { %1940 = dma.hbm_to_vmem [thread:$0]  (!%p1935_p5), %s141_s22, 96, %s143_s24, [#allocation5]  }
   0xe   : > { %2023 = dma.done.wait (%p1941_p2), [#allocation3], 15360  }
   0xf   : > { %2025 = vsyncadd (%p1941_p2), [#allocation3], 4294951936 }
  0x10   : > { %2027 = dma.done.wait (%p1941_p2), [#allocation5], 96  }
  0x11   : > { %2029 = vsyncadd (%p1941_p2), [#allocation5], 4294967200  ;;  %p193_p6 = scmp.lt.s32.totalorder %s1762_s16, 1  ;;  %vm268_vm0 = vcmask 1043456   ;;  %v252_v0 = vld [vmem:[#allocation2 + $0x150] sm:$0xf] }
  0x12   : > { %v253_v1 = vld [vmem:[#allocation2 + $0x158] sm:$0xf]  ;;  %v254_v2 = vld [vmem:[#allocation2 + $0x160] sm:$0xf]  ;;  %1774 = vmatpush.msk.msra.mxu0 %vm268_vm0, %v252_v0  ;;  %v255_v3 = vld [vmem:[#allocation2 + $0x168] sm:$0xf] }
  0x13   : > { %s2501_s16 = smov (!%p193_p6, %s1762_s16), 1  ;;  %1778 = vmatpush.msk.msra.mxu1 %vm268_vm0, %v253_v1  ;;  %v246_v4 = vld [vmem:[#allocation2 + $0x120] sm:$0xff]  ;;  %v247_v5 = vld [vmem:[#allocation2 + $0x128] sm:$0xff]  ;;  %1782 = vmatpush.msk.msra.mxu2 %vm268_vm0, %v254_v2  ;;  %v248_v6 = vld [vmem:[#allocation2 + $0x130] sm:$0xff]  ;;  %vm258_vm1 = vcmask 228352   ;;  %vm1366_vm3 = vcmask 195584  }
  0x14   : > { %s1924_s27 = sshll.u32 %s2501_s16, 5  ;;  %1786 = vmatpush.msk.msra.mxu3 %vm268_vm0, %v255_v3  ;;  %v249_v7 = vld [vmem:[#allocation2 + $0x138] sm:$0xff]  ;;  %v240_v8 = vld [vmem:[#allocation2 + $0xf0] sm:$0xff]  ;;  %300 = vmatpush.msra.mxu0 %v246_v4  ;;  %v242_v10 = vld [vmem:[#allocation2 + $0x100] sm:$0xff]  ;;  %s1925_s4 = smul.u32 48, %s2501_s16 }
  0x15   : > { %326 = vmatpush.msra.mxu1 %v247_v5  ;;  %v241_v9 = vld [vmem:[#allocation2 + $0xf8] sm:$0xff]  ;;  %v243_v11 = vld [vmem:[#allocation2 + $0x108] sm:$0xff]  ;;  %s2096_s30 = scalar_lea.vmem %s2493_s0, %s1924_s27  ;;  %352 = vmatpush.msra.mxu2 %v248_v6  ;;  %v234_v12 = vld [vmem:[#allocation2 + $0xc0] sm:$0xff] }
  0x16   : > { %378 = vmatpush.msra.mxu3 %v249_v7  ;;  %v235_v13 = vld [vmem:[#allocation2 + $0xc8] sm:$0xff]  ;;  %301 = vmatpush.msra.mxu0 %v240_v8  ;;  %v236_v14 = vld [vmem:[#allocation2 + $0xd0] sm:$0xff]  ;;  %v237_v15 = vld [vmem:[#allocation2 + $0xd8] sm:$0xff]  ;;  %s2482_s7 = scalar_lea.vmem %s2496_s3, %s1925_s4 }
  0x17   : > { %327 = vmatpush.msra.mxu1 %v241_v9  ;;  %353 = vmatpush.msra.mxu2 %v242_v10  ;;  %v2099_v16 = vld [vmem:[%s2096_s30 + $0x1] sm:$0xff]  ;;  %v256_v17 = vld [vmem:[#allocation2 + $0x170] sm:$0xf]  ;;  %v257_v18 = vld [vmem:[#allocation2 + $0x178] sm:$0xf] }
  0x18   : > { %379 = vmatpush.msra.mxu3 %v243_v11  ;;  %302 = vmatpush.msra.mxu0 %v234_v12  ;;  %v224_v19 = vld [vmem:[#allocation2 + $0x90] sm:$0xf]  ;;  %v225_v20 = vld [vmem:[#allocation2 + $0x98] sm:$0xf]  ;;  %v250_v21 = vld [vmem:[#allocation2 + $0x140] sm:$0xff] }
  0x19   : > { %328 = vmatpush.msra.mxu1 %v235_v13  ;;  %354 = vmatpush.msra.mxu2 %v236_v14  ;;  %v251_v22 = vld [vmem:[#allocation2 + $0x148] sm:$0xff]  ;;  %v218_v23 = vld [vmem:[#allocation2 + $0x60] sm:$0xff]  ;;  %v244_v25 = vld [vmem:[#allocation2 + $0x110] sm:$0xff] }
  0x1a   : > { %380 = vmatpush.msra.mxu3 %v237_v15  ;;  %1775 = vmatmul.msk.f32.vlgmr.msra.gmra.mxu0 %vm258_vm1, %v2099_v16  ;;  %v219_v24 = vld [vmem:[#allocation2 + $0x68] sm:$0xff]  ;;  %v245_v26 = vld [vmem:[#allocation2 + $0x118] sm:$0xff]  ;;  %v212_v27 = vld [vmem:[#allocation2 + $0x30] sm:$0xff] }
  0x1b   : > { %1779 = vmatmul.msk.f32.vlgmr.msra.gmra.mxu1 %vm258_vm1, %v2099_v16  ;;  %1783 = vmatmul.msk.f32.vlgmr.msra.gmra.mxu2 %vm258_vm1, %v2099_v16  ;;  %v213_v28 = vld [vmem:[#allocation2 + $0x38] sm:$0xff]  ;;  %v2114_v29 = vld [vmem:[%s2096_s30 + $0x9] sm:$0xff]  ;;  %v238_v30 = vld [vmem:[#allocation2 + $0xe0] sm:$0xff] }
  0x1c   : > { %1787 = vmatmul.msk.f32.vlgmr.msra.gmra.mxu3 %vm258_vm1, %v2099_v16  ;;  %1790 = vmatpush.msk.msrb.mxu0 %vm268_vm0, %v256_v17  ;;  %v239_v31 = vld [vmem:[#allocation2 + $0xe8] sm:$0xff]  ;;  %v206_v32 = vld [vmem:[#allocation2] sm:$0xff]  ;;  %v228_v36 = vld [vmem:[#allocation2 + $0xb0] sm:$0xf] }
  0x1d   : > { %1794 = vmatpush.msk.msrb.mxu1 %vm268_vm0, %v257_v18  ;;  %1798 = vmatpush.msk.msrb.mxu2 %vm268_vm0, %v224_v19  ;;  %v207_v33 = vld [vmem:[#allocation2 + $0x8] sm:$0xff]  ;;  %v226_v34 = vld [vmem:[#allocation2 + $0xa0] sm:$0xf]  ;;  %v229_v37 = vld [vmem:[#allocation2 + $0xb8] sm:$0xf] }
  0x1e   : > { %1802 = vmatpush.msk.msrb.mxu3 %vm268_vm0, %v225_v20  ;;  %404 = vmatpush.msrb.mxu0 %v250_v21  ;;  %v227_v35 = vld [vmem:[#allocation2 + $0xa8] sm:$0xf]  ;;  %v220_v38 = vld [vmem:[#allocation2 + $0x70] sm:$0xff]  ;;  %v221_v39 = vld [vmem:[#allocation2 + $0x78] sm:$0xff] }
  0x1f   : > { %430 = vmatpush.msrb.mxu1 %v251_v22  ;;  %483 = vmatpush.msrb.mxu2 %v218_v23  ;;  %v222_v40 = vld [vmem:[#allocation2 + $0x80] sm:$0xff]  ;;  %v223_v41 = vld [vmem:[#allocation2 + $0x88] sm:$0xff]  ;;  %v2127_v42 = vld [vmem:[%s2096_s30 + $0x11] sm:$0xff] }
  0x20   : > { %509 = vmatpush.msrb.mxu3 %v219_v24  ;;  %405 = vmatpush.msrb.mxu0 %v244_v25  ;;  %v214_v43 = vld [vmem:[#allocation2 + $0x40] sm:$0xff]  ;;  %v215_v44 = vld [vmem:[#allocation2 + $0x48] sm:$0xff]  ;;  %v216_v45 = vld [vmem:[#allocation2 + $0x50] sm:$0xff] }
  0x21   : > { %431 = vmatpush.msrb.mxu1 %v245_v26  ;;  %484 = vmatpush.msrb.mxu2 %v212_v27  ;;  %v217_v46 = vld [vmem:[#allocation2 + $0x58] sm:$0xff]  ;;  %v208_v47 = vld [vmem:[#allocation2 + $0x10] sm:$0xff]  ;;  %v210_v49 = vld [vmem:[#allocation2 + $0x20] sm:$0xff] }
  0x22   : > { %510 = vmatpush.msrb.mxu3 %v213_v28  ;;  %1776 = vmatmul.msk.f32.gmra.mxu0 %vm258_vm1, %v2114_v29  ;;  %v209_v48 = vld [vmem:[#allocation2 + $0x18] sm:$0xff]  ;;  %v211_v50 = vld [vmem:[#allocation2 + $0x28] sm:$0xff]  ;;  %v203_v51 = vld [vmem:[%s2096_s30] sm:$0xff] }
  0x23   : > { %1780 = vmatmul.msk.f32.gmra.mxu1 %vm258_vm1, %v2114_v29  ;;  %1784 = vmatmul.msk.f32.gmra.mxu2 %vm258_vm1, %v2114_v29  ;;  %v204_v52 = vld [vmem:[%s2096_s30 + $0x8] sm:$0xff]  ;;  %v648_v53 = vld [vmem:[#allocation2 + $0x210] sm:$0xf]  ;;  %v649_v54 = vld [vmem:[#allocation2 + $0x218] sm:$0xf] }
  0x24   : > { %1788 = vmatmul.msk.f32.gmra.mxu3 %vm258_vm1, %v2114_v29  ;;  %406 = vmatpush.msrb.mxu0 %v238_v30  ;;  %v650_v55 = vld [vmem:[#allocation2 + $0x220] sm:$0xf]  ;;  %v651_v56 = vld [vmem:[#allocation2 + $0x228] sm:$0xf]  ;;  %v644_v59 = vld [vmem:[#allocation2 + $0x1f0] sm:$0xff] }
  0x25   : > { %432 = vmatpush.msrb.mxu1 %v239_v31  ;;  %485 = vmatpush.msrb.mxu2 %v206_v32  ;;  %v642_v57 = vld [vmem:[#allocation2 + $0x1e0] sm:$0xff]  ;;  %v643_v58 = vld [vmem:[#allocation2 + $0x1e8] sm:$0xff]  ;;  %v645_v60 = vld [vmem:[#allocation2 + $0x1f8] sm:$0xff] }
  0x26   : > { %511 = vmatpush.msrb.mxu3 %v207_v33  ;;  %1806 = vmatpush.msk.msra.mxu0 %vm268_vm0, %v226_v34  ;;  %v636_v61 = vld [vmem:[#allocation2 + $0x1b0] sm:$0xff]  ;;  %v637_v62 = vld [vmem:[#allocation2 + $0x1b8] sm:$0xff]  ;;  %v638_v63 = vld [vmem:[#allocation2 + $0x1c0] sm:$0xff] }
  0x27   : > { %1810 = vmatpush.msk.msra.mxu1 %vm268_vm0, %v227_v35  ;;  %1814 = vmatpush.msk.msra.mxu2 %vm268_vm0, %v228_v36  ;;  %v639_v0 = vld [vmem:[#allocation2 + $0x1c8] sm:$0xff]  ;;  %v205_v1 = vld [vmem:[%s2096_s30 + $0x10] sm:$0xff]  ;;  %v630_v2 = vld [vmem:[#allocation2 + $0x180] sm:$0xff] }
  0x28   : > { %1818 = vmatpush.msk.msra.mxu3 %vm268_vm0, %v229_v37  ;;  %535 = vmatpush.msra.mxu0 %v220_v38  ;;  %v631_v3 = vld [vmem:[#allocation2 + $0x188] sm:$0xff]  ;;  %v632_v4 = vld [vmem:[#allocation2 + $0x190] sm:$0xff]  ;;  %v633_v5 = vld [vmem:[#allocation2 + $0x198] sm:$0xff] }
  0x29   : > { %561 = vmatpush.msra.mxu1 %v221_v39  ;;  %587 = vmatpush.msra.mxu2 %v222_v40  ;;  %v652_v6 = vld [vmem:[#allocation2 + $0x230] sm:$0xf]  ;;  %v653_v7 = vld [vmem:[#allocation2 + $0x238] sm:$0xf]  ;;  %v646_v10 = vld [vmem:[#allocation2 + $0x200] sm:$0xff] }
  0x2a   : > { %613 = vmatpush.msra.mxu3 %v223_v41  ;;  %1777 = vmatmul.msk.f32.gmra.mxu0 %vm258_vm1, %v2127_v42  ;;  %v877_v8 = vld [vmem:[#allocation2 + $0x2d0] sm:$0xf]  ;;  %v878_v9 = vld [vmem:[#allocation2 + $0x2d8] sm:$0xf]  ;;  %v647_v11 = vld [vmem:[#allocation2 + $0x208] sm:$0xff] }
  0x2b   : > { %1781 = vmatmul.msk.f32.gmra.mxu1 %vm258_vm1, %v2127_v42  ;;  %1785 = vmatmul.msk.f32.gmra.mxu2 %vm258_vm1, %v2127_v42  ;;  %v871_v12 = vld [vmem:[#allocation2 + $0x2a0] sm:$0xff]  ;;  %v872_v13 = vld [vmem:[#allocation2 + $0x2a8] sm:$0xff]  ;;  %v640_v14 = vld [vmem:[#allocation2 + $0x1d0] sm:$0xff] }
  0x2c   : > { %1789 = vmatmul.msk.f32.gmra.mxu3 %vm258_vm1, %v2127_v42  ;;  %536 = vmatpush.msra.mxu0 %v214_v43  ;;  %v641_v15 = vld [vmem:[#allocation2 + $0x1d8] sm:$0xff]  ;;  %v634_v18 = vld [vmem:[#allocation2 + $0x1a0] sm:$0xff]  ;;  %v635_v19 = vld [vmem:[#allocation2 + $0x1a8] sm:$0xff] }
  0x2d   : > { %562 = vmatpush.msra.mxu1 %v215_v44  ;;  %588 = vmatpush.msra.mxu2 %v216_v45  ;;  %v866_v17 = vld [vmem:[#allocation2 + $0x278] sm:$0xff]  ;;  %v859_v20 = vld [vmem:[#allocation2 + $0x240] sm:$0xff]  ;;  %v860_v21 = vld [vmem:[#allocation2 + $0x248] sm:$0xff] }
  0x2e   : > { %614 = vmatpush.msra.mxu3 %v217_v46  ;;  %537 = vmatpush.msra.mxu0 %v208_v47  ;;  %v626_v22 = vld [vmem:[%s2096_s30 + $0x2] sm:$0xff]  ;;  %v627_v23 = vld [vmem:[%s2096_s30 + $0xa] sm:$0xff]  ;;  %v882_v27 = vld [vmem:[#allocation2 + $0x2f8] sm:$0xf] }
  0x2f   : > { %563 = vmatpush.msra.mxu1 %v209_v48  ;;  %589 = vmatpush.msra.mxu2 %v210_v49  ;;  %v879_v24 = vld [vmem:[#allocation2 + $0x2e0] sm:$0xf]  ;;  %v880_v25 = vld [vmem:[#allocation2 + $0x2e8] sm:$0xf]  ;;  %v881_v26 = vld [vmem:[#allocation2 + $0x2f0] sm:$0xf] }
  0x30   : > { %615 = vmatpush.msra.mxu3 %v211_v50  ;;  %v873_v28 = vld [vmem:[#allocation2 + $0x2b0] sm:$0xff]  ;;  %v875_v30 = vld [vmem:[#allocation2 + $0x2c0] sm:$0xff]  ;;  %v876_v31 = vld [vmem:[#allocation2 + $0x2c8] sm:$0xff] }
  0x31   : > { %v867_v32 = vld [vmem:[#allocation2 + $0x280] sm:$0xff]  ;;  %v868_v33 = vld [vmem:[#allocation2 + $0x288] sm:$0xff]  ;;  %v869_v34 = vld [vmem:[#allocation2 + $0x290] sm:$0xff] }
  0x32   : > { %1791 = vmatmul.msk.f32.vlgmr.msrb.gmra.mxu0 %vm258_vm1, %v2099_v16  ;;  %v870_v35 = vld [vmem:[#allocation2 + $0x298] sm:$0xff]  ;;  %v861_v37 = vld [vmem:[#allocation2 + $0x250] sm:$0xff]  ;;  %v863_v39 = vld [vmem:[#allocation2 + $0x260] sm:$0xff] }
  0x33   : > { %1795 = vmatmul.msk.f32.vlgmr.msrb.gmra.mxu1 %vm258_vm1, %v2099_v16  ;;  %1799 = vmatmul.msk.f32.vlgmr.msrb.gmra.mxu2 %vm258_vm1, %v203_v51  ;;  %v865_v16 = vld [vmem:[#allocation2 + $0x270] sm:$0xff]  ;;  %v862_v38 = vld [vmem:[#allocation2 + $0x258] sm:$0xff]  ;;  %v864_v40 = vld [vmem:[#allocation2 + $0x268] sm:$0xff] }
  0x34   : > { %1803 = vmatmul.msk.f32.vlgmr.msrb.gmra.mxu3 %vm258_vm1, %v203_v51  ;;  %1822 = vmatpush.msk.msrb.mxu0 %vm268_vm0, %v648_v53  ;;  %v628_v36 = vld [vmem:[%s2096_s30 + $0x12] sm:$0xff]  ;;  %v855_v41 = vld [vmem:[%s2096_s30 + $0x3] sm:$0xff] }
  0x35   : > { %1826 = vmatpush.msk.msrb.mxu1 %vm268_vm0, %v649_v54  ;;  %1830 = vmatpush.msk.msrb.mxu2 %vm268_vm0, %v650_v55  ;;  %v1106_v43 = vld [vmem:[#allocation2 + $0x390] sm:$0xf]  ;;  %v1107_v44 = vld [vmem:[#allocation2 + $0x398] sm:$0xf]  ;;  %v1108_v45 = vld [vmem:[#allocation2 + $0x3a0] sm:$0xf] }
  0x36   : > { %1834 = vmatpush.msk.msrb.mxu3 %vm268_vm0, %v651_v56  ;;  %694 = vmatpush.msrb.mxu0 %v642_v57  ;;  %v1109_v46 = vld [vmem:[#allocation2 + $0x3a8] sm:$0xf]  ;;  %v1100_v47 = vld [vmem:[#allocation2 + $0x360] sm:$0xff]  ;;  %v1102_v49 = vld [vmem:[#allocation2 + $0x370] sm:$0xff] }
  0x37   : > { %720 = vmatpush.msrb.mxu1 %v643_v58  ;;  %746 = vmatpush.msrb.mxu2 %v644_v59  ;;  %v1101_v48 = vld [vmem:[#allocation2 + $0x368] sm:$0xff]  ;;  %v1103_v50 = vld [vmem:[#allocation2 + $0x378] sm:$0xff]  ;;  %v1096_v53 = vld [vmem:[#allocation2 + $0x340] sm:$0xff] }
  0x38   : > { %772 = vmatpush.msrb.mxu3 %v645_v60  ;;  %695 = vmatpush.msrb.mxu0 %v636_v61  ;;  %v857_v54 = vld [vmem:[%s2096_s30 + $0x13] sm:$0xff]  ;;  %v1097_v55 = vld [vmem:[#allocation2 + $0x348] sm:$0xff]  ;;  %v1088_v56 = vld [vmem:[#allocation2 + $0x300] sm:$0xff] }
  0x39   : > { %721 = vmatpush.msrb.mxu1 %v637_v62  ;;  %747 = vmatpush.msrb.mxu2 %v638_v63  ;;  %v1089_v57 = vld [vmem:[#allocation2 + $0x308] sm:$0xff]  ;;  %v1090_v58 = vld [vmem:[#allocation2 + $0x310] sm:$0xff]  ;;  %v1091_v59 = vld [vmem:[#allocation2 + $0x318] sm:$0xff] }
  0x3a   : > { %1792 = vmatmul.msk.f32.gmra.mxu0 %vm258_vm1, %v2114_v29  ;;  %773 = vmatpush.msrb.mxu3 %v639_v0  ;;  %v1110_v62 = vld [vmem:[#allocation2 + $0x3b0] sm:$0xf]  ;;  %v1111_v63 = vld [vmem:[#allocation2 + $0x3b8] sm:$0xf]  ;;  %v1104_v0 = vld [vmem:[#allocation2 + $0x380] sm:$0xff] }
  0x3b   : > { %1796 = vmatmul.msk.f32.gmra.mxu1 %vm258_vm1, %v2114_v29  ;;  %1800 = vmatmul.msk.f32.gmra.mxu2 %vm258_vm1, %v204_v52  ;;  %v874_v29 = vld [vmem:[#allocation2 + $0x2b8] sm:$0xff] }
  0x3c   : > { %1804 = vmatmul.msk.f32.gmra.mxu3 %vm258_vm1, %v204_v52  ;;  %696 = vmatpush.msrb.mxu0 %v630_v2 }
  0x3d   : > { %722 = vmatpush.msrb.mxu1 %v631_v3  ;;  %748 = vmatpush.msrb.mxu2 %v632_v4 }
  0x3e   : > { %774 = vmatpush.msrb.mxu3 %v633_v5 }
  0x42   : > { %1793 = vmatmul.msk.f32.gmra.mxu0 %vm258_vm1, %v2127_v42 }
  0x43   : > { %1797 = vmatmul.msk.f32.gmra.mxu1 %vm258_vm1, %v2127_v42  ;;  %1801 = vmatmul.msk.f32.gmra.mxu2 %vm258_vm1, %v205_v1  ;;  %v856_v42 = vld [vmem:[%s2096_s30 + $0xb] sm:$0xff] }
  0x44   : > { %1805 = vmatmul.msk.f32.gmra.mxu3 %vm258_vm1, %v205_v1 }
  0x4a   : > { %1807 = vmatmul.msk.f32.vlgmr.msra.gmra.mxu0 %vm258_vm1, %v203_v51 }
  0x4b   : > { %1811 = vmatmul.msk.f32.vlgmr.msra.gmra.mxu1 %vm258_vm1, %v203_v51  ;;  %1815 = vmatmul.msk.f32.vlgmr.msra.gmra.mxu2 %vm258_vm1, %v203_v51 }
  0x4c   : > { %1819 = vmatmul.msk.f32.vlgmr.msra.gmra.mxu3 %vm258_vm1, %v203_v51  ;;  %1838 = vmatpush.msk.msra.mxu0 %vm268_vm0, %v652_v6  ;;  %v1094_v51 = vld [vmem:[#allocation2 + $0x330] sm:$0xff] }
  0x4d   : > { %1842 = vmatpush.msk.msra.mxu1 %vm268_vm0, %v653_v7  ;;  %1846 = vmatpush.msk.msra.mxu2 %vm268_vm0, %v877_v8  ;;  %v1098_v6 = vld [vmem:[#allocation2 + $0x350] sm:$0xff]  ;;  %v1099_v7 = vld [vmem:[#allocation2 + $0x358] sm:$0xff]  ;;  %v1092_v8 = vld [vmem:[#allocation2 + $0x320] sm:$0xff] }
  0x4e   : > { %1850 = vmatpush.msk.msra.mxu3 %vm268_vm0, %v878_v9  ;;  %798 = vmatpush.msra.mxu0 %v646_v10  ;;  %v1093_v9 = vld [vmem:[#allocation2 + $0x328] sm:$0xff] }
  0x4f   : > { %824 = vmatpush.msra.mxu1 %v647_v11  ;;  %923 = vmatpush.msra.mxu2 %v871_v12 }
  0x50   : > { %949 = vmatpush.msra.mxu3 %v872_v13  ;;  %799 = vmatpush.msra.mxu0 %v640_v14  ;;  %v1084_v14 = vld [vmem:[%s2096_s30 + $0x4] sm:$0xff] }
  0x51   : > { %825 = vmatpush.msra.mxu1 %v641_v15  ;;  %924 = vmatpush.msra.mxu2 %v865_v16 }
  0x52   : > { %1808 = vmatmul.msk.f32.gmra.mxu0 %vm258_vm1, %v204_v52  ;;  %950 = vmatpush.msra.mxu3 %v866_v17 }
  0x53   : > { %1812 = vmatmul.msk.f32.gmra.mxu1 %vm258_vm1, %v204_v52  ;;  %1816 = vmatmul.msk.f32.gmra.mxu2 %vm258_vm1, %v204_v52 }
  0x54   : > { %1820 = vmatmul.msk.f32.gmra.mxu3 %vm258_vm1, %v204_v52  ;;  %800 = vmatpush.msra.mxu0 %v634_v18  ;;  %v1095_v52 = vld [vmem:[#allocation2 + $0x338] sm:$0xff] }
  0x55   : > { %826 = vmatpush.msra.mxu1 %v635_v19  ;;  %925 = vmatpush.msra.mxu2 %v859_v20  ;;  %v1085_v19 = vld [vmem:[%s2096_s30 + $0xc] sm:$0xff] }
  0x56   : > { %951 = vmatpush.msra.mxu3 %v860_v21 }
  0x5a   : > { %1809 = vmatmul.msk.f32.gmra.mxu0 %vm258_vm1, %v205_v1 }
  0x5b   : > { %1813 = vmatmul.msk.f32.gmra.mxu1 %vm258_vm1, %v205_v1  ;;  %1817 = vmatmul.msk.f32.gmra.mxu2 %vm258_vm1, %v205_v1 }
  0x5c   : > { %1821 = vmatmul.msk.f32.gmra.mxu3 %vm258_vm1, %v205_v1  ;;  %v1105_v1 = vld [vmem:[#allocation2 + $0x388] sm:$0xff] }
  0x62   : > { %1823 = vmatmul.msk.f32.vlgmr.msrb.gmra.mxu0 %vm258_vm1, %v626_v22 }
  0x63   : > { %1827 = vmatmul.msk.f32.vlgmr.msrb.gmra.mxu1 %vm258_vm1, %v626_v22  ;;  %1831 = vmatmul.msk.f32.vlgmr.msrb.gmra.mxu2 %vm258_vm1, %v626_v22 }
  0x64   : > { %1835 = vmatmul.msk.f32.vlgmr.msrb.gmra.mxu3 %vm258_vm1, %v626_v22  ;;  %1854 = vmatpush.msk.msrb.mxu0 %vm268_vm0, %v879_v24  ;;  %v1086_v24 = vld [vmem:[%s2096_s30 + $0x14] sm:$0xff] }
  0x65   : > { %1858 = vmatpush.msk.msrb.mxu1 %vm268_vm0, %v880_v25  ;;  %1862 = vmatpush.msk.msrb.mxu2 %vm268_vm0, %v881_v26 }
  0x66   : > { %1866 = vmatpush.msk.msrb.mxu3 %vm268_vm0, %v882_v27  ;;  %975 = vmatpush.msrb.mxu0 %v873_v28 }
  0x67   : > { %1001 = vmatpush.msrb.mxu1 %v874_v29  ;;  %1027 = vmatpush.msrb.mxu2 %v875_v30 }
  0x68   : > { %1053 = vmatpush.msrb.mxu3 %v876_v31  ;;  %976 = vmatpush.msrb.mxu0 %v867_v32 }
  0x69   : > { %1002 = vmatpush.msrb.mxu1 %v868_v33  ;;  %1028 = vmatpush.msrb.mxu2 %v869_v34 }
  0x6a   : > { %1824 = vmatmul.msk.f32.gmra.mxu0 %vm258_vm1, %v627_v23  ;;  %1054 = vmatpush.msrb.mxu3 %v870_v35 }
  0x6b   : > { %1828 = vmatmul.msk.f32.gmra.mxu1 %vm258_vm1, %v627_v23  ;;  %1832 = vmatmul.msk.f32.gmra.mxu2 %vm258_vm1, %v627_v23 }
  0x6c   : > { %1836 = vmatmul.msk.f32.gmra.mxu3 %vm258_vm1, %v627_v23  ;;  %977 = vmatpush.msrb.mxu0 %v861_v37 }
  0x6d   : > { %1003 = vmatpush.msrb.mxu1 %v862_v38  ;;  %1029 = vmatpush.msrb.mxu2 %v863_v39 }
  0x6e   : > { %1055 = vmatpush.msrb.mxu3 %v864_v40 }
  0x72   : > { %1825 = vmatmul.msk.f32.gmra.mxu0 %vm258_vm1, %v628_v36 }
  0x73   : > { %1829 = vmatmul.msk.f32.gmra.mxu1 %vm258_vm1, %v628_v36  ;;  %1833 = vmatmul.msk.f32.gmra.mxu2 %vm258_vm1, %v628_v36 }
  0x74   : > { %1837 = vmatmul.msk.f32.gmra.mxu3 %vm258_vm1, %v628_v36 }
  0x7a   : > { %1839 = vmatmul.msk.f32.vlgmr.msra.gmra.mxu0 %vm258_vm1, %v626_v22 }
  0x7b   : > { %1843 = vmatmul.msk.f32.vlgmr.msra.gmra.mxu1 %vm258_vm1, %v626_v22  ;;  %1847 = vmatmul.msk.f32.vlgmr.msra.gmra.mxu2 %vm258_vm1, %v855_v41 }
  0x7c   : > { %1851 = vmatmul.msk.f32.vlgmr.msra.gmra.mxu3 %vm258_vm1, %v855_v41  ;;  %1870 = vmatpush.msk.msra.mxu0 %vm268_vm0, %v1106_v43 }
  0x7d   : > { %1874 = vmatpush.msk.msra.mxu1 %vm268_vm0, %v1107_v44  ;;  %1878 = vmatpush.msk.msra.mxu2 %vm268_vm0, %v1108_v45 }
  0x7e   : > { %1882 = vmatpush.msk.msra.mxu3 %vm268_vm0, %v1109_v46  ;;  %1152 = vmatpush.msra.mxu0 %v1100_v47 }
  0x7f   : > { %1178 = vmatpush.msra.mxu1 %v1101_v48  ;;  %1204 = vmatpush.msra.mxu2 %v1102_v49 }
  0x80   : > { %1230 = vmatpush.msra.mxu3 %v1103_v50  ;;  %1153 = vmatpush.msra.mxu0 %v1094_v51 }
  0x81   : > { %1179 = vmatpush.msra.mxu1 %v1095_v52  ;;  %1205 = vmatpush.msra.mxu2 %v1096_v53 }
  0x82   : > { %1840 = vmatmul.msk.f32.gmra.mxu0 %vm258_vm1, %v627_v23  ;;  %1231 = vmatpush.msra.mxu3 %v1097_v55 }
  0x83   : > { %1844 = vmatmul.msk.f32.gmra.mxu1 %vm258_vm1, %v627_v23  ;;  %1848 = vmatmul.msk.f32.gmra.mxu2 %vm258_vm1, %v856_v42 }
  0x84   : > { %1852 = vmatmul.msk.f32.gmra.mxu3 %vm258_vm1, %v856_v42  ;;  %1154 = vmatpush.msra.mxu0 %v1088_v56 }
  0x85   : > { %1180 = vmatpush.msra.mxu1 %v1089_v57  ;;  %1206 = vmatpush.msra.mxu2 %v1090_v58 }
  0x86   : > { %1232 = vmatpush.msra.mxu3 %v1091_v59 }
  0x8a   : > { %1841 = vmatmul.msk.f32.gmra.mxu0 %vm258_vm1, %v628_v36 }
  0x8b   : > { %1845 = vmatmul.msk.f32.gmra.mxu1 %vm258_vm1, %v628_v36  ;;  %1849 = vmatmul.msk.f32.gmra.mxu2 %vm258_vm1, %v857_v54 }
  0x8c   : > { %1853 = vmatmul.msk.f32.gmra.mxu3 %vm258_vm1, %v857_v54 }
  0x92   : > { %1855 = vmatmul.msk.f32.vlgmr.msrb.gmra.mxu0 %vm258_vm1, %v855_v41 }
  0x93   : > { %1859 = vmatmul.msk.f32.vlgmr.msrb.gmra.mxu1 %vm258_vm1, %v855_v41  ;;  %1863 = vmatmul.msk.f32.vlgmr.msrb.gmra.mxu2 %vm258_vm1, %v855_v41 }
  0x94   : > { %1867 = vmatmul.msk.f32.vlgmr.msrb.gmra.mxu3 %vm258_vm1, %v855_v41  ;;  %1886 = vmatpush.msk.msrb.mxu0 %vm268_vm0, %v1110_v62 }
  0x95   : > { %1890 = vmatpush.msk.msrb.mxu1 %vm268_vm0, %v1111_v63 }
  0x96   : > { %1256 = vmatpush.msrb.mxu0 %v1104_v0 }
  0x97   : > { %v2222_v60 = vpop.f32.mrf.mxu0  ;;  %1282 = vmatpush.msrb.mxu1 %v1105_v1 }
  0x98   : > { %v2224_v61 = vpop.f32.mrf.mxu1  ;;  %1257 = vmatpush.msrb.mxu0 %v1098_v6 }
  0x99   : > { %1283 = vmatpush.msrb.mxu1 %v1099_v7 }
  0x9a   : > { %1856 = vmatmul.msk.f32.gmra.mxu0 %vm258_vm1, %v856_v42 }
  0x9b   : > { %1860 = vmatmul.msk.f32.gmra.mxu1 %vm258_vm1, %v856_v42  ;;  %1864 = vmatmul.msk.f32.gmra.mxu2 %vm258_vm1, %v856_v42 }
  0x9c   : > { %1868 = vmatmul.msk.f32.gmra.mxu3 %vm258_vm1, %v856_v42  ;;  %1258 = vmatpush.msrb.mxu0 %v1092_v8 }
  0x9d   : > { %1284 = vmatpush.msrb.mxu1 %v1093_v9 }
  0x9e   : > { %v2232_v2 = vpop.f32.mrf.mxu2 }
  0x9f   : > { %v2234_v3 = vpop.f32.mrf.mxu3  ;;  %v2236_v4 = vpop.f32.mrf.mxu0 }
  0xa0   : > { %v2238_v5 = vpop.f32.mrf.mxu1 }
  0xa2   : > { %1857 = vmatmul.msk.f32.gmra.mxu0 %vm258_vm1, %v857_v54 }
  0xa3   : > { %1861 = vmatmul.msk.f32.gmra.mxu1 %vm258_vm1, %v857_v54  ;;  %1865 = vmatmul.msk.f32.gmra.mxu2 %vm258_vm1, %v857_v54 }
  0xa4   : > { %1869 = vmatmul.msk.f32.gmra.mxu3 %vm258_vm1, %v857_v54 }
  0xa6   : > { %v2244_v10 = vpop.f32.mrf.mxu2 }
  0xa7   : > { %v2246_v11 = vpop.f32.mrf.mxu3  ;;  %v2248_v12 = vpop.f32.mrf.mxu0 }
  0xa8   : > { %v2250_v13 = vpop.f32.mrf.mxu1 }
  0xaa   : > { %1871 = vmatmul.msk.f32.vlgmr.msra.gmra.mxu0 %vm258_vm1, %v1084_v14 }
  0xab   : > { %1875 = vmatmul.msk.f32.vlgmr.msra.gmra.mxu1 %vm258_vm1, %v1084_v14  ;;  %1879 = vmatmul.msk.f32.vlgmr.msra.gmra.mxu2 %vm258_vm1, %v1084_v14 }
  0xac   : > { %1883 = vmatmul.msk.f32.vlgmr.msra.gmra.mxu3 %vm258_vm1, %v1084_v14 }
  0xae   : > { %v2257_v15 = vpop.f32.mrf.mxu2 }
  0xaf   : > { %v2259_v16 = vpop.f32.mrf.mxu3  ;;  %v2261_v17 = vpop.f32.mrf.mxu0 }
  0xb0   : > { %v2263_v18 = vpop.f32.mrf.mxu1 }
  0xb2   : > { %1872 = vmatmul.msk.f32.gmra.mxu0 %vm258_vm1, %v1085_v19 }
  0xb3   : > { %1876 = vmatmul.msk.f32.gmra.mxu1 %vm258_vm1, %v1085_v19  ;;  %1880 = vmatmul.msk.f32.gmra.mxu2 %vm258_vm1, %v1085_v19 }
  0xb4   : > { %1884 = vmatmul.msk.f32.gmra.mxu3 %vm258_vm1, %v1085_v19 }
  0xb6   : > { %v2270_v20 = vpop.f32.mrf.mxu2 }
  0xb7   : > { %v2272_v21 = vpop.f32.mrf.mxu3  ;;  %v411_v22 = vpop.f32.mrf.mxu0 }
  0xb8   : > { %v437_v23 = vpop.f32.mrf.mxu1 }
  0xba   : > { %1873 = vmatmul.msk.f32.gmra.mxu0 %vm258_vm1, %v1086_v24 }
  0xbb   : > { %1877 = vmatmul.msk.f32.gmra.mxu1 %vm258_vm1, %v1086_v24  ;;  %1881 = vmatmul.msk.f32.gmra.mxu2 %vm258_vm1, %v1086_v24 }
  0xbc   : > { %1885 = vmatmul.msk.f32.gmra.mxu3 %vm258_vm1, %v1086_v24 }
  0xbe   : > { %v2279_v25 = vpop.f32.mrf.mxu2 }
  0xbf   : > { %v2281_v26 = vpop.f32.mrf.mxu3  ;;  %v414_v27 = vpop.f32.mrf.mxu0 }
  0xc0   : > { %v440_v28 = vpop.f32.mrf.mxu1 }
  0xc2   : > { %1887 = vmatmul.msk.f32.vlgmr.msrb.gmra.mxu0 %vm258_vm1, %v1084_v14 }
  0xc3   : > { %1891 = vmatmul.msk.f32.vlgmr.msrb.gmra.mxu1 %vm258_vm1, %v1084_v14 }
  0xc6   : > { %v493_v29 = vpop.f32.mrf.mxu2 }
  0xc7   : > { %v519_v30 = vpop.f32.mrf.mxu3  ;;  %v539_v31 = vpop.f32.mrf.mxu0  ;;  %v494_v59 = vadd.f32 %v493_v29, %v2248_v12 }
  0xc8   : > { %v565_v32 = vpop.f32.mrf.mxu1  ;;  %v540_v49 = vadd.f32 %v539_v31, %v2232_v2  ;;  %v520_v62 = vadd.f32 %v519_v30, %v2250_v13 }
  0xc9   : > { %v566_v50 = vadd.f32 %v565_v32, %v2234_v3 }
  0xca   : > { %1888 = vmatmul.msk.f32.gmra.mxu0 %vm258_vm1, %v1085_v19 }
  0xcb   : > { %1892 = vmatmul.msk.f32.gmra.mxu1 %vm258_vm1, %v1085_v19 }
  0xce   : > { %v591_v33 = vpop.f32.mrf.mxu2 }
  0xcf   : > { %v617_v34 = vpop.f32.mrf.mxu3  ;;  %v542_v35 = vpop.f32.mrf.mxu0 }
  0xd0   : > { %v568_v36 = vpop.f32.mrf.mxu1  ;;  %v543_v57 = vadd.f32 %v542_v35, %v2244_v10  ;;  %v618_v12 = vadd.f32 %v617_v34, %v2263_v18 }
  0xd1   : > { %v569_v58 = vadd.f32 %v568_v36, %v2246_v11  ;;  %v592_v11 = vadd.f32 %v591_v33, %v2261_v17 }
  0xd2   : > { %1889 = vmatmul.msk.f32.gmra.mxu0 %vm258_vm1, %v1086_v24 }
  0xd3   : > { %1893 = vmatmul.msk.f32.gmra.mxu1 %vm258_vm1, %v1086_v24 }
  0xd6   : > { %v594_v37 = vpop.f32.mrf.mxu2 }
  0xd7   : > { %v620_v38 = vpop.f32.mrf.mxu3  ;;  %v595_v39 = vadd.f32 %v594_v37, %v411_v22  ;;  %v545_v41 = vpop.f32.mrf.mxu0 }
  0xd8   : > { %v621_v40 = vadd.f32 %v620_v38, %v437_v23  ;;  %v571_v42 = vpop.f32.mrf.mxu1  ;;  %v546_v9 = vadd.f32 %v545_v41, %v2257_v15 }
  0xd9   : > { %v572_v10 = vadd.f32 %v571_v42, %v2259_v16 }
  0xde   : > { %v597_v43 = vpop.f32.mrf.mxu2 }
  0xdf   : > { %v623_v44 = vpop.f32.mrf.mxu3  ;;  %v598_v45 = vadd.f32 %v597_v43, %v414_v27  ;;  %v2289_v47 = vpop.f32.mrf.mxu0 }
  0xe0   : > { %v624_v46 = vadd.f32 %v623_v44, %v440_v28  ;;  %v2291_v48 = vpop.f32.mrf.mxu1 }
  0xe6   : > { %v750_v51 = vpop.f32.mrf.mxu2 }
  0xe7   : > { %v776_v52 = vpop.f32.mrf.mxu3  ;;  %v2295_v53 = vadd.f32 %v750_v51, %v540_v49  ;;  %v2299_v55 = vpop.f32.mrf.mxu0 }
  0xe8   : > { %v2297_v54 = vadd.f32 %v776_v52, %v566_v50  ;;  %v2301_v56 = vpop.f32.mrf.mxu1 }
  0xee   : > { %v753_v63 = vpop.f32.mrf.mxu2 }
  0xef   : > { %v779_v0 = vpop.f32.mrf.mxu3  ;;  %v2307_v1 = vadd.f32 %v753_v63, %v543_v57  ;;  %v704_v3 = vpop.f32.mrf.mxu0 }
  0xf0   : > { %v2309_v2 = vadd.f32 %v779_v0, %v569_v58  ;;  %v730_v6 = vpop.f32.mrf.mxu1  ;;  %v849_v7 = vadd.f32 %v704_v3, %v494_v59  ;;  %v1345_v59 = vlaneseq }
  0xf1   : > { %v850_v8 = vadd.f32 %v730_v6, %v520_v62 }
  0xf2   : > { %v2347_v6 = vshrl.u32 %v1345_v59, 7 }
  0xf6   : > { %v756_v14 = vpop.f32.mrf.mxu2 }
  0xf7   : > { %v782_v13 = vpop.f32.mrf.mxu3  ;;  %v2315_v19 = vadd.f32 %v756_v14, %v546_v9  ;;  %v802_v23 = vpop.f32.mrf.mxu0  ;;  %v491_v9 = vadd.f32 %v2279_v25, %v2236_v4  ;;  %v2363_v4 = vand.u32 127, %v1345_v59 }
  0xf8   : > { %v2317_v22 = vadd.f32 %v782_v13, %v572_v10  ;;  %v828_v24 = vpop.f32.mrf.mxu1  ;;  %v2319_v27 = vadd.f32 %v802_v23, %v592_v11  ;;  %v517_v10 = vadd.f32 %v2281_v26, %v2238_v5  ;;  %v488_v11 = vadd.f32 %v2270_v20, %v2222_v60  ;;  %v2359_v23 = vld [vmem:[#allocation4] sm:$0x3f] }
  0xf9   : > { %v2321_v28 = vadd.f32 %v828_v24, %v618_v12  ;;  %v514_v12 = vadd.f32 %v2272_v21, %v2224_v61  ;;  %v843_v14 = vadd.f32 %v2299_v55, %v491_v9  ;;  %v1350_v5 = vmul.u32 2, %v2347_v6 }
  0xfa   : > { %v844_v13 = vadd.f32 %v2301_v56, %v517_v10  ;;  %v837_v24 = vadd.f32 %v2289_v47, %v488_v11  ;;  %v1315_v56 = vperm.slane %v2359_v23, 0  ;;  %v1318_v11 = vperm.slane %v2359_v23, 3 }
  0xfb   : > { %vm2371_vm2 = vcmp.eq.s32.totalorder %v2363_v4, %v1350_v5 }
  0xfe   : > { %v927_v29 = vpop.f32.mrf.mxu2 }
  0xff   : > { %v953_v15 = vpop.f32.mrf.mxu3  ;;  %v805_v30 = vpop.f32.mrf.mxu0  ;;  %v1066_v21 = vadd.f32 %v927_v29, %v837_v24  ;;  %v2038_v24 = vmov 0.0  }
 0x100   : > { %v831_v16 = vpop.f32.mrf.mxu1  ;;  %v2323_v31 = vadd.f32 %v805_v30, %v595_v39  ;;  %v838_v30 = vadd.f32 %v2291_v48, %v514_v12 }
 0x101   : > { %v2325_v17 = vadd.f32 %v831_v16, %v621_v40 }
 0x102   : > { %v1067_v55 = vadd.f32 %v953_v15, %v838_v30 }
 0x106   : > { %v930_v18 = vpop.f32.mrf.mxu2 }
 0x107   : > { %v956_v32 = vpop.f32.mrf.mxu3  ;;  %v808_v33 = vpop.f32.mrf.mxu0  ;;  %v1072_v25 = vadd.f32 %v930_v18, %v843_v14 }
 0x108   : > { %v834_v34 = vpop.f32.mrf.mxu1  ;;  %v2327_v35 = vadd.f32 %v808_v33, %v598_v45  ;;  %v1073_v26 = vadd.f32 %v956_v32, %v844_v13  ;;  %v1316_v33 = vperm.slane %v2359_v23, 1 }
 0x109   : > { %v2329_v36 = vadd.f32 %v834_v34, %v624_v46 }
 0x10e   : > { %v933_v37 = vpop.f32.mrf.mxu2 }
 0x10f   : > { %v959_v38 = vpop.f32.mrf.mxu3  ;;  %v979_v41 = vpop.f32.mrf.mxu0  ;;  %v1078_v60 = vadd.f32 %v933_v37, %v849_v7 }
 0x110   : > { %v1005_v42 = vpop.f32.mrf.mxu1  ;;  %v1079_v20 = vadd.f32 %v959_v38, %v850_v8  ;;  %v2376_v8 = vadd.s32 8, %v2347_v6  ;;  %v1068_v37 = vadd.f32 %v979_v41, %v2295_v53  ;;  %v2389_v53 = vsel %vm2371_vm2, 1.0, %v2038_v24 }
 0x111   : > { %v1069_v38 = vadd.f32 %v1005_v42, %v2297_v54 }
 0x116   : > { %v2331_v43 = vpop.f32.mrf.mxu2 }
 0x117   : > { %v2333_v44 = vpop.f32.mrf.mxu3  ;;  %v982_v39 = vpop.f32.mrf.mxu0 }
 0x118   : > { %v1008_v49 = vpop.f32.mrf.mxu1 }
 0x119   : > { %v1075_v13 = vadd.f32 %v1008_v49, %v2309_v2 }
 0x11e   : > { %v2335_v40 = vpop.f32.mrf.mxu2 }
 0x11f   : > { %v2337_v50 = vpop.f32.mrf.mxu3  ;;  %v985_v51 = vpop.f32.mrf.mxu0 }
 0x120   : > { %v1011_v52 = vpop.f32.mrf.mxu1 }
 0x126   : > { %v2339_v45 = vpop.f32.mrf.mxu2 }
 0x127   : > { %v2341_v46 = vpop.f32.mrf.mxu3  ;;  %v1156_v57 = vpop.f32.mrf.mxu0 }
 0x128   : > { %v1182_v58 = vpop.f32.mrf.mxu1  ;;  %v1295_v29 = vadd.f32 %v1156_v57, %v1066_v21  ;;  %v1080_v57 = vadd.f32 %v985_v51, %v2315_v19 }
 0x129   : > { %v1296_v15 = vadd.f32 %v1182_v58, %v1067_v55  ;;  %v1081_v58 = vadd.f32 %v1011_v52, %v2317_v22 }
 0x12a   : > { %v1327_v54 = vadd.f32 %v1315_v56, %v1295_v29 }
 0x12e   : > { %v2343_v62 = vpop.f32.mrf.mxu2 }
 0x12f   : > { %v2345_v63 = vpop.f32.mrf.mxu3  ;;  %v1159_v0 = vpop.f32.mrf.mxu0  ;;  %v1297_v30 = vadd.f32 %v2343_v62, %v1068_v37 }
 0x130   : > { %v1185_v3 = vpop.f32.mrf.mxu1  ;;  %v1301_v9 = vadd.f32 %v1159_v0, %v1072_v25  ;;  %v1317_v0 = vperm.slane %v2359_v23, 2  ;;  %v1298_v25 = vadd.f32 %v2345_v63, %v1069_v38 }
 0x131   : > { %v1302_v48 = vadd.f32 %v1185_v3, %v1073_v26  ;;  %v1074_v3 = vadd.f32 %v982_v39, %v2307_v1  ;;  %v1328_v1 = vadd.f32 %v1316_v33, %v1296_v15  ;;  %v1351_v39 = vmul.u32 2, %v2376_v8 }
 0x132   : > { %v1333_v12 = vadd.f32 %v1315_v56, %v1301_v9  ;;  %v1329_v62 = vadd.f32 %v1317_v0, %v1297_v30  ;;  %v2411_v63 = vadd.f32 %v1318_v11, %v1298_v25  ;;  %v1070_v9 = vadd.f32 %v2331_v43, %v2319_v27 }
 0x133   : > { %v1334_v14 = vadd.f32 %v1316_v33, %v1302_v48  ;;  %vm1353_vm4 = vcmp.eq.s32.totalorder %v2363_v4, %v1351_v39  ;;  %v1071_v48 = vadd.f32 %v2333_v44, %v2321_v28 }
 0x136   : > { %v1211_v16 = vpop.f32.mrf.mxu2 }
 0x137   : > { %v1237_v61 = vpop.f32.mrf.mxu3  ;;  %v1162_v34 = vpop.f32.mrf.mxu0  ;;  %v1303_v2 = vadd.f32 %v1211_v16, %v1074_v3 }
 0x138   : > { %v1188_v47 = vpop.f32.mrf.mxu1  ;;  %v1307_v59 = vadd.f32 %v1162_v34, %v1078_v60  ;;  %v1304_v49 = vadd.f32 %v1237_v61, %v1075_v13  ;;  %v2416_v61 = vsel %vm1353_vm4, 1.0, %v2038_v24  ;;  %v1082_v34 = vadd.f32 %v2339_v45, %v2327_v35 }
 0x139   : > { %v1308_v10 = vadd.f32 %v1188_v47, %v1079_v20  ;;  %v2402_v20 = vadd.f32 %v1317_v0, %v1303_v2  ;;  %v1083_v47 = vadd.f32 %v2341_v46, %v2329_v36 }
 0x13a   : > { %v1339_v18 = vadd.f32 %v1315_v56, %v1307_v59  ;;  %v2404_v16 = vadd.f32 %v1318_v11, %v1304_v49  ;;  %v1076_v56 = vadd.f32 %v2335_v40, %v2323_v31  ;;  %v1319_v59 = vperm.slane %v2359_v23, 4 }
 0x13b   : > { %v1340_v32 = vadd.f32 %v1316_v33, %v1308_v10  ;;  %v1077_v33 = vadd.f32 %v2337_v50, %v2325_v17  ;;  %v1320_v10 = vperm.slane %v2359_v23, 5  ;;  %v1358_v23 = vadd.s32 1, %v1350_v5 }
 0x13c   : > { %1386 = vmatpush.msrb.mxu2 %v1339_v18  ;;  %v1359_v5 = vadd.s32 1, %v1351_v39 }
 0x13d   : > { %1409 = vmatpush.msrb.mxu3 %v1340_v32  ;;  %vm1360_vm5 = vcmp.eq.s32.totalorder %v2363_v4, %v1358_v23 }
 0x13e   : > { %v1214_v41 = vpop.f32.mrf.mxu2  ;;  %1387 = vmatpush.msrb.mxu2 %v1333_v12  ;;  %v1896_v6 = vsel %vm1360_vm5, 1.0, %v2038_v24  ;;  %vm1361_vm6 = vcmp.eq.s32.totalorder %v2363_v4, %v1359_v5 }
 0x13f   : > { %v1240_v42 = vpop.f32.mrf.mxu3  ;;  %1410 = vmatpush.msrb.mxu3 %v1334_v14  ;;  %v1309_v19 = vadd.f32 %v1214_v41, %v1080_v57  ;;  %v1260_v22 = vpop.f32.mrf.mxu0  ;;  %v1897_v15 = vsel %vm1361_vm6, 1.0, %v2038_v24 }
 0x140   : > { %v1310_v51 = vadd.f32 %v1240_v42, %v1081_v58  ;;  %v1286_v52 = vpop.f32.mrf.mxu1  ;;  %1388 = vmatpush.msrb.mxu2 %v1327_v54  ;;  %v1299_v27 = vadd.f32 %v1260_v22, %v1070_v9 }
 0x141   : > { %1411 = vmatpush.msrb.mxu3 %v1328_v1  ;;  %v2394_v26 = vadd.f32 %v1317_v0, %v1309_v19  ;;  %1898 = vmatmul.msk.f32.vlgmr.msrb.gmra.mxu2 %vm1366_vm3, %v2389_v53  ;;  %v1300_v35 = vadd.f32 %v1286_v52, %v1071_v48 }
 0x142   : > { %v2396_v60 = vadd.f32 %v1318_v11, %v1310_v51  ;;  %1900 = vmatmul.msk.f32.vlgmr.msrb.gmra.mxu3 %vm1366_vm3, %v2389_v53  ;;  %v1331_v45 = vadd.f32 %v1319_v59, %v1299_v27 }
 0x143   : > { %1432 = vmatpush.msra.mxu2 %v2394_v26  ;;  %v1332_v46 = vadd.f32 %v1320_v10, %v1300_v35 }
 0x144   : > { %1455 = vmatpush.msra.mxu3 %v2396_v60 }
 0x145   : > { %1433 = vmatpush.msra.mxu2 %v2402_v20 }
 0x146   : > { %1456 = vmatpush.msra.mxu3 %v2404_v16 }
 0x147   : > { %1434 = vmatpush.msra.mxu2 %v1329_v62  ;;  %v1263_v21 = vpop.f32.mrf.mxu0 }
 0x148   : > { %1457 = vmatpush.msra.mxu3 %v2411_v63  ;;  %v1289_v55 = vpop.f32.mrf.mxu1  ;;  %v1305_v7 = vadd.f32 %v1263_v21, %v1076_v56 }
 0x149   : > { %1530 = vmatpush.msrb.mxu2 %v1339_v18  ;;  %v1306_v17 = vadd.f32 %v1289_v55, %v1077_v33 }
 0x14a   : > { %1553 = vmatpush.msrb.mxu3 %v1340_v32  ;;  %1899 = vmatmul.msk.f32.gmra.mxu2 %vm1366_vm3, %v2416_v61  ;;  %v1337_v43 = vadd.f32 %v1319_v59, %v1305_v7 }
 0x14b   : > { %1901 = vmatmul.msk.f32.gmra.mxu3 %vm1366_vm3, %v2416_v61  ;;  %1531 = vmatpush.msrb.mxu2 %v1333_v12  ;;  %v1338_v44 = vadd.f32 %v1320_v10, %v1306_v17 }
 0x14c   : > { %1554 = vmatpush.msrb.mxu3 %v1334_v14 }
 0x14d   : > { %1532 = vmatpush.msrb.mxu2 %v1327_v54 }
 0x14e   : > { %1555 = vmatpush.msrb.mxu3 %v1328_v1 }
 0x14f   : > { %v1266_v31 = vpop.f32.mrf.mxu0 }
 0x150   : > { %v1292_v40 = vpop.f32.mrf.mxu1  ;;  %v1311_v50 = vadd.f32 %v1266_v31, %v1082_v34 }
 0x151   : > { %v1312_v29 = vadd.f32 %v1292_v40, %v1083_v47 }
 0x152   : > { %1902 = vmatmul.msk.f32.vlgmr.msra.gmra.mxu2 %vm1366_vm3, %v2389_v53  ;;  %v1343_v36 = vadd.f32 %v1319_v59, %v1311_v50 }
 0x153   : > { %1904 = vmatmul.msk.f32.vlgmr.msra.gmra.mxu3 %vm1366_vm3, %v2389_v53  ;;  %v1344_v28 = vadd.f32 %v1320_v10, %v1312_v29 }
 0x154   : > { %1478 = vmatpush.msra.mxu0 %v1343_v36  ;;  %1622 = vmatpush.msra.mxu2 %v1343_v36 }
 0x155   : > { %1501 = vmatpush.msra.mxu1 %v1344_v28  ;;  %1645 = vmatpush.msra.mxu3 %v1344_v28 }
 0x156   : > { %1479 = vmatpush.msra.mxu0 %v1337_v43  ;;  %1623 = vmatpush.msra.mxu2 %v1337_v43 }
 0x157   : > { %1502 = vmatpush.msra.mxu1 %v1338_v44  ;;  %1646 = vmatpush.msra.mxu3 %v1338_v44 }
 0x158   : > { %1480 = vmatpush.msra.mxu0 %v1331_v45  ;;  %1624 = vmatpush.msra.mxu2 %v1331_v45 }
 0x159   : > { %1503 = vmatpush.msra.mxu1 %v1332_v46  ;;  %1647 = vmatpush.msra.mxu3 %v1332_v46 }
 0x15a   : > { %1903 = vmatmul.msk.f32.gmra.mxu2 %vm1366_vm3, %v2416_v61  ;;  %1908 = vmatmul.msk.f32.vlgmr.msra.gmra.mxu1 %vm1366_vm3, %v2389_v53 }
 0x15b   : > { %1905 = vmatmul.msk.f32.gmra.mxu3 %vm1366_vm3, %v2416_v61  ;;  %1576 = vmatpush.msrb.mxu0 %v2394_v26 }
 0x15c   : > { %1599 = vmatpush.msrb.mxu1 %v2396_v60  ;;  %1906 = vmatmul.msk.f32.vlgmr.msra.gmra.mxu0 %vm1366_vm3, %v2389_v53 }
 0x15d   : > { %1577 = vmatpush.msrb.mxu0 %v2402_v20 }
 0x15e   : > { %1600 = vmatpush.msrb.mxu1 %v2404_v16 }
 0x15f   : > { %1578 = vmatpush.msrb.mxu0 %v1329_v62 }
 0x160   : > { %1601 = vmatpush.msrb.mxu1 %v2411_v63 }
 0x162   : > { %1910 = vmatmul.msk.f32.vlgmr.msrb.gmra.mxu2 %vm1366_vm3, %v1896_v6  ;;  %1909 = vmatmul.msk.f32.gmra.mxu1 %vm1366_vm3, %v2416_v61 }
 0x163   : > { %1912 = vmatmul.msk.f32.vlgmr.msrb.gmra.mxu3 %vm1366_vm3, %v1896_v6 }
 0x164   : > { %1907 = vmatmul.msk.f32.gmra.mxu0 %vm1366_vm3, %v2416_v61 }
 0x16a   : > { %1911 = vmatmul.msk.f32.gmra.mxu2 %vm1366_vm3, %v1897_v15  ;;  %1916 = vmatmul.msk.f32.vlgmr.msrb.gmra.mxu1 %vm1366_vm3, %v1896_v6 }
 0x16b   : > { %1913 = vmatmul.msk.f32.gmra.mxu3 %vm1366_vm3, %v1897_v15 }
 0x16c   : > { %1914 = vmatmul.msk.f32.vlgmr.msrb.gmra.mxu0 %vm1366_vm3, %v1896_v6 }
 0x172   : > { %1918 = vmatmul.msk.f32.vlgmr.msra.gmra.mxu2 %vm1366_vm3, %v1896_v6  ;;  %1917 = vmatmul.msk.f32.gmra.mxu1 %vm1366_vm3, %v1897_v15 }
 0x173   : > { %1920 = vmatmul.msk.f32.vlgmr.msra.gmra.mxu3 %vm1366_vm3, %v1896_v6 }
 0x174   : > { %1915 = vmatmul.msk.f32.gmra.mxu0 %vm1366_vm3, %v1897_v15 }
 0x17a   : > { %1919 = vmatmul.msk.f32.gmra.mxu2 %vm1366_vm3, %v1897_v15 }
 0x17b   : > { %1921 = vmatmul.msk.f32.gmra.mxu3 %vm1366_vm3, %v1897_v15 }
 0x1c4   : > { %v1390_v4 = vpop.f32.mrf.mxu2 }
 0x1c5   : > { %v1413_v8 = vpop.f32.mrf.mxu3 }
 0x1cd   : > { %v1393_v18 = vpop.f32.mrf.mxu2 }
 0x1ce   : > { %v1416_v32 = vpop.f32.mrf.mxu3 }
 0x1d5   : > { %v1436_v37 = vpop.f32.mrf.mxu2 }
 0x1d6   : > { %v1459_v38 = vpop.f32.mrf.mxu3 }
 0x1d7   : > { %v1505_v0 = vpop.f32.mrf.mxu1 }
 0x1d9   : > { %v1482_v3 = vpop.f32.mrf.mxu0 }
 0x1dd   : > { %v1439_v11 = vpop.f32.mrf.mxu2 }
 0x1de   : > { %v1462_v12 = vpop.f32.mrf.mxu3 }
 0x1df   : > { %v1508_v14 = vpop.f32.mrf.mxu1 }
 0x1e1   : > { %v1485_v58 = vpop.f32.mrf.mxu0 }
 0x1e5   : > { %v1534_v13 = vpop.f32.mrf.mxu2 }
 0x1e6   : > { %v1557_v57 = vpop.f32.mrf.mxu3  ;;  %v1655_v53 = vmax.f32 %v1390_v4, %v1534_v13 }
 0x1e7   : > { %v1603_v24 = vpop.f32.mrf.mxu1  ;;  %v1656_v26 = vmax.f32 %v1413_v8, %v1557_v57 }
 0x1e8   : > { %v1658_v54 = vmax.f32 %v1459_v38, %v1603_v24 }
 0x1e9   : > { %v1580_v49 = vpop.f32.mrf.mxu0 }
 0x1ea   : > { %v1667_v1 = vmax.f32 %v1655_v53, %v1658_v54  ;;  %v1657_v60 = vmax.f32 %v1436_v37, %v1580_v49 }
 0x1ec   : > { %v1673_v41 = vmax.f32 %v1667_v1, 0.0 }
 0x1ed   : > { %v1537_v42 = vpop.f32.mrf.mxu2 }
 0x1ee   : > { %v1560_v39 = vpop.f32.mrf.mxu3  ;;  %1679 = vst [vmem:[%s2482_s7] sm:$0xff] %v1673_v41  ;;  %v1661_v19 = vmax.f32 %v1393_v18, %v1537_v42 }
 0x1ef   : > { %v1606_v2 = vpop.f32.mrf.mxu1  ;;  %v1662_v34 = vmax.f32 %v1416_v32, %v1560_v39 }
 0x1f0   : > { %v1664_v51 = vmax.f32 %v1462_v12, %v1606_v2 }
 0x1f1   : > { %v1583_v55 = vpop.f32.mrf.mxu0 }
 0x1f2   : > { %v1670_v22 = vmax.f32 %v1661_v19, %v1664_v51  ;;  %v1663_v47 = vmax.f32 %v1439_v11, %v1583_v55 }
 0x1f4   : > { %v1676_v52 = vmax.f32 %v1670_v22, 0.0 }
 0x1f5   : > { %v1626_v30 = vpop.f32.mrf.mxu2 }
 0x1f6   : > { %v1649_v25 = vpop.f32.mrf.mxu3  ;;  %v1659_v20 = vmax.f32 %v1482_v3, %v1626_v30  ;;  %1682 = vst [vmem:[%s2482_s7 + $0x18] sm:$0xf] %v1676_v52 }
 0x1f7   : > { %v1660_v16 = vmax.f32 %v1505_v0, %v1649_v25 }
 0x1f8   : > { %v1668_v62 = vmax.f32 %v1656_v26, %v1659_v20 }
 0x1f9   : > { %v1669_v63 = vmax.f32 %v1657_v60, %v1660_v16 }
 0x1fa   : > { %v1674_v61 = vmax.f32 %v1668_v62, 0.0 }
 0x1fb   : > { %v1675_v21 = vmax.f32 %v1669_v63, 0.0 }
 0x1fc   : > { %1680 = vst [vmem:[%s2482_s7 + $0x8] sm:$0xff] %v1674_v61 }
 0x1fd   : > { %1681 = vst [vmem:[%s2482_s7 + $0x10] sm:$0xff] %v1675_v21  ;;  %v1629_v56 = vpop.f32.mrf.mxu2 }
 0x1fe   : > { %v1652_v33 = vpop.f32.mrf.mxu3  ;;  %v1665_v9 = vmax.f32 %v1485_v58, %v1629_v56 }
 0x1ff   : > { %v1666_v48 = vmax.f32 %v1508_v14, %v1652_v33 }
 0x200   : > { %v1671_v59 = vmax.f32 %v1662_v34, %v1665_v9 }
 0x201   : > { %v1672_v10 = vmax.f32 %v1663_v47, %v1666_v48 }
 0x202   : > { %v1677_v31 = vmax.f32 %v1671_v59, 0.0 }
 0x203   : > { %v1678_v40 = vmax.f32 %v1672_v10, 0.0 }
 0x204   : > { %1683 = vst [vmem:[%s2482_s7 + $0x20] sm:$0xf] %v1677_v31 }
 0x205   : > { %1684 = vst [vmem:[%s2482_s7 + $0x28] sm:$0xf] %v1678_v40 }
 0x206 PF: > { %s15_s12 = sadd.s32 1, %s2032_s12  }
 0x207   : > { %p12_p7 = scmp.ge.s32.totalorder %s15_s12, 4  }
 0x209   :  { %14 = sbr.rel (!%p12_p7) target bundleno = 2 (0x2), region = 75 }
 0x20e   :  { %1706 = vsyncpa [#allocation3], 1 }
 0x20f   :  { %1708 = vsyncpa [#allocation3 + $0x1], 1 }
 0x210   :  { %1709 = vsyncpa [#allocation5], 1 }

// kernel: net_forward.4
= control target key start
LH: loop header
LB: loop body
LE: loop exit
PB: predicated region body
PF: predicated region fallthrough
CT: control target
= control target key end

     0   :  { %8 = vsyncpa [#allocation3], 0  ;;  %s3168_s0 = inlined_call_operand.vmem [shape: f32[2,12,384], index: 0, kind: input, shape index: {}]   ;;  %s3169_s1 = inlined_call_operand.hbm [shape: f32[5,384,512], index: 1, kind: input, shape index: {}]   ;;  %s3170_s2 = inlined_call_operand.hbm [shape: f32[1,512], index: 2, kind: input, shape index: {}]   ;;  %s3171_s3 = inlined_call_operand.vmem [shape: f32[2,4,256], index: 3, kind: output, shape index: {}]  }
   0x1   :  { %9 = vsyncpa [#allocation5], 0  ;;  %s2925_s12 = smov 0  }
   0x2 LB: > { %s125_s15 = sshll.u32 %s3169_s1, 4  ;;  %s2934_s16 = sadd.s32 4294967295, %s2898_s12   ;;  %s2898_s12 = sphi %s2925_s12, %s15_s12   ;;  %s126_s15 = int_to_ptr.hbm [resolvable:$true] %s125_s15 }
   0x3   : > { %p2768_p0 = scmp.ge.s32.totalorder %s2898_s12, 1  ;;  %p114_p1 = scmp.lt.s32.totalorder %s2898_s12, 3 }
   0x4   : > { %p2807_p2 = scmp.eq.s32.totalorder %s2934_s16, 0  ;;  %s2900_s18 = smov [#allocation2]  }
   0x5   : > { %p2939_p3 = pnand %p2768_p0, %p114_p1  ;;  %s127_s19 = sshll.u32 %s2900_s18, 4  ;;  %s128_s19 = int_to_ptr.vmem [resolvable:$true] %s127_s19 }
   0x6   : > { %s140_s22 = sshll.u32 %s3170_s2, 4  ;;  %s2901_s23 = smov [#allocation4]   ;;  %s141_s22 = int_to_ptr.hbm [resolvable:$true] %s140_s22 }
   0x7   : > { %p2800_p4 = pneg %p2939_p3  ;;  %s142_s24 = sshll.u32 %s2901_s23, 4  ;;  %s143_s24 = int_to_ptr.vmem [resolvable:$true] %s142_s24 }
   0x8   : > { %s2902_s25 = smov 512   ;;  %s2903_s26 = smov 32  }
   0x9   : > { %p2801_p5 = pnand %p2807_p2, %p2800_p4  ;;  %163 = sbr.rel (%p2939_p3) target bundleno = 827 (0x33b), region = 32 }
   0xb   : > { %2803 = dma.hbm_to_vmem [thread:$0]  (!%p2801_p5), %s126_s15, 122880, %s128_s19, [#allocation3], %s2902_s25, %s2902_s25, %s2903_s26  }
   0xc   : > { %2806 = dma.hbm_to_vmem [thread:$0]  (!%p2801_p5), %s141_s22, 64, %s143_s24, [#allocation5]  }
   0xe   : > { %2889 = dma.done.wait (%p2807_p2), [#allocation3], 122880  }
   0xf   : > { %2891 = vsyncadd (%p2807_p2), [#allocation3], 4294844416 }
  0x10   : > { %2893 = dma.done.wait (%p2807_p2), [#allocation5], 64  }
  0x11   : > { %2895 = vsyncadd (%p2807_p2), [#allocation5], 4294967232  ;;  %v465_v0 = vld [vmem:[#allocation2 + $0x7e0] sm:$0xff]  ;;  %v466_v3 = vld [vmem:[#allocation2 + $0x7e8] sm:$0xff]  ;;  %p193_p6 = scmp.lt.s32.totalorder %s2934_s16, 1  ;;  %vm603_vm0 = vcmask 1046528  }
  0x12   : > { %v529_v1 = vld [vmem:[#allocation2 + $0x9e0] sm:$0xff]  ;;  %616 = vmatpush.msra.mxu0 %v465_v0  ;;  %676 = vmatpush.msra.mxu3 %v466_v3  ;;  %v462_v7 = vld [vmem:[#allocation2 + $0x7c8] sm:$0xff]  ;;  %v531_v3 = vld [vmem:[#allocation2 + $0x9f0] sm:$0xff]  ;;  %vm1301_vm1 = vcmask 1045504   ;;  %vm1763_vm2 = vcmask 1044480   ;;  %vm2225_vm3 = vcmask 1043456  }
  0x13   : > { %v593_v2 = vld [vmem:[#allocation2 + $0xbe0] sm:$0xff]  ;;  %636 = vmatpush.msra.mxu1 %v529_v1  ;;  %v458_v11 = vld [vmem:[#allocation2 + $0x7a8] sm:$0xff]  ;;  %s3174_s16 = smov (!%p193_p6, %s2934_s16), 1  ;;  %vm2508_vm5 = vcmask 64512  }
  0x14   : > { %v461_v4 = vld [vmem:[#allocation2 + $0x7c0] sm:$0xff]  ;;  %656 = vmatpush.msra.mxu2 %v593_v2  ;;  %677 = vmatpush.msra.mxu3 %v462_v7  ;;  %v454_v15 = vld [vmem:[#allocation2 + $0x788] sm:$0xff]  ;;  %v467_v2 = vld [vmem:[#allocation2 + $0x7f0] sm:$0xff]  ;;  %s2791_s27 = smul.u32 48, %s3174_s16  ;;  %s2790_s4 = sshll.u32 %s3174_s16, 3 }
  0x15   : > { %v525_v5 = vld [vmem:[#allocation2 + $0x9c0] sm:$0xff]  ;;  %617 = vmatpush.msra.mxu0 %v461_v4  ;;  %v450_v19 = vld [vmem:[#allocation2 + $0x768] sm:$0xff]  ;;  %v527_v7 = vld [vmem:[#allocation2 + $0x9d0] sm:$0xff]  ;;  %s202_s7 = scalar_lea.vmem %s3171_s3, %s2790_s4 }
  0x16   : > { %v589_v6 = vld [vmem:[#allocation2 + $0xbc0] sm:$0xff]  ;;  %637 = vmatpush.msra.mxu1 %v525_v5  ;;  %678 = vmatpush.msra.mxu3 %v458_v11  ;;  %v446_v23 = vld [vmem:[#allocation2 + $0x748] sm:$0xff]  ;;  %v523_v11 = vld [vmem:[#allocation2 + $0x9b0] sm:$0xff]  ;;  %s2970_s30 = scalar_lea.vmem %s3168_s0, %s2791_s27 }
  0x17   : > { %v457_v8 = vld [vmem:[#allocation2 + $0x7a0] sm:$0xff]  ;;  %657 = vmatpush.msra.mxu2 %v589_v6  ;;  %v442_v27 = vld [vmem:[#allocation2 + $0x728] sm:$0xff]  ;;  %v463_v6 = vld [vmem:[#allocation2 + $0x7d0] sm:$0xff] }
  0x18   : > { %v521_v9 = vld [vmem:[#allocation2 + $0x9a0] sm:$0xff]  ;;  %618 = vmatpush.msra.mxu0 %v457_v8  ;;  %679 = vmatpush.msra.mxu3 %v454_v15  ;;  %v438_v31 = vld [vmem:[#allocation2 + $0x708] sm:$0xff]  ;;  %v519_v15 = vld [vmem:[#allocation2 + $0x990] sm:$0xff] }
  0x19   : > { %v585_v10 = vld [vmem:[#allocation2 + $0xba0] sm:$0xff]  ;;  %638 = vmatpush.msra.mxu1 %v521_v9  ;;  %v434_v35 = vld [vmem:[#allocation2 + $0x6e8] sm:$0xff] }
  0x1a   : > { %v453_v12 = vld [vmem:[#allocation2 + $0x780] sm:$0xff]  ;;  %658 = vmatpush.msra.mxu2 %v585_v10  ;;  %680 = vmatpush.msra.mxu3 %v450_v19  ;;  %v430_v39 = vld [vmem:[#allocation2 + $0x6c8] sm:$0xff]  ;;  %v459_v10 = vld [vmem:[#allocation2 + $0x7b0] sm:$0xff] }
  0x1b   : > { %v517_v13 = vld [vmem:[#allocation2 + $0x980] sm:$0xff]  ;;  %619 = vmatpush.msra.mxu0 %v453_v12  ;;  %v426_v43 = vld [vmem:[#allocation2 + $0x6a8] sm:$0xff]  ;;  %v515_v19 = vld [vmem:[#allocation2 + $0x970] sm:$0xff] }
  0x1c   : > { %v581_v14 = vld [vmem:[#allocation2 + $0xb80] sm:$0xff]  ;;  %639 = vmatpush.msra.mxu1 %v517_v13  ;;  %681 = vmatpush.msra.mxu3 %v446_v23  ;;  %v422_v47 = vld [vmem:[#allocation2 + $0x688] sm:$0xff]  ;;  %v511_v23 = vld [vmem:[#allocation2 + $0x950] sm:$0xff] }
  0x1d   : > { %v449_v16 = vld [vmem:[#allocation2 + $0x760] sm:$0xff]  ;;  %659 = vmatpush.msra.mxu2 %v581_v14  ;;  %v418_v51 = vld [vmem:[#allocation2 + $0x668] sm:$0xff]  ;;  %v455_v14 = vld [vmem:[#allocation2 + $0x790] sm:$0xff] }
  0x1e   : > { %v513_v17 = vld [vmem:[#allocation2 + $0x960] sm:$0xff]  ;;  %620 = vmatpush.msra.mxu0 %v449_v16  ;;  %682 = vmatpush.msra.mxu3 %v442_v27  ;;  %v414_v55 = vld [vmem:[#allocation2 + $0x648] sm:$0xff]  ;;  %v507_v27 = vld [vmem:[#allocation2 + $0x930] sm:$0xff] }
  0x1f   : > { %v577_v18 = vld [vmem:[#allocation2 + $0xb60] sm:$0xff]  ;;  %640 = vmatpush.msra.mxu1 %v513_v17  ;;  %v410_v59 = vld [vmem:[#allocation2 + $0x628] sm:$0xff] }
  0x20   : > { %v445_v20 = vld [vmem:[#allocation2 + $0x740] sm:$0xff]  ;;  %660 = vmatpush.msra.mxu2 %v577_v18  ;;  %683 = vmatpush.msra.mxu3 %v438_v31  ;;  %v406_v63 = vld [vmem:[#allocation2 + $0x608] sm:$0xff]  ;;  %v451_v18 = vld [vmem:[#allocation2 + $0x770] sm:$0xff] }
  0x21   : > { %v509_v21 = vld [vmem:[#allocation2 + $0x940] sm:$0xff]  ;;  %621 = vmatpush.msra.mxu0 %v445_v20  ;;  %v530_v0 = vld [vmem:[#allocation2 + $0x9e8] sm:$0xff]  ;;  %v503_v31 = vld [vmem:[#allocation2 + $0x910] sm:$0xff] }
  0x22   : > { %v573_v22 = vld [vmem:[#allocation2 + $0xb40] sm:$0xff]  ;;  %641 = vmatpush.msra.mxu1 %v509_v21  ;;  %684 = vmatpush.msra.mxu3 %v434_v35  ;;  %v594_v1 = vld [vmem:[#allocation2 + $0xbe8] sm:$0xff]  ;;  %v499_v35 = vld [vmem:[#allocation2 + $0x8f0] sm:$0xff] }
  0x23   : > { %v441_v24 = vld [vmem:[#allocation2 + $0x720] sm:$0xff]  ;;  %661 = vmatpush.msra.mxu2 %v573_v22  ;;  %v526_v4 = vld [vmem:[#allocation2 + $0x9c8] sm:$0xff]  ;;  %v447_v22 = vld [vmem:[#allocation2 + $0x750] sm:$0xff] }
  0x24   : > { %v505_v25 = vld [vmem:[#allocation2 + $0x920] sm:$0xff]  ;;  %622 = vmatpush.msra.mxu0 %v441_v24  ;;  %685 = vmatpush.msra.mxu3 %v430_v39  ;;  %v590_v5 = vld [vmem:[#allocation2 + $0xbc8] sm:$0xff]  ;;  %v495_v39 = vld [vmem:[#allocation2 + $0x8d0] sm:$0xff] }
  0x25   : > { %v569_v26 = vld [vmem:[#allocation2 + $0xb20] sm:$0xff]  ;;  %642 = vmatpush.msra.mxu1 %v505_v25  ;;  %v522_v8 = vld [vmem:[#allocation2 + $0x9a8] sm:$0xff] }
  0x26   : > { %v437_v28 = vld [vmem:[#allocation2 + $0x700] sm:$0xff]  ;;  %662 = vmatpush.msra.mxu2 %v569_v26  ;;  %686 = vmatpush.msra.mxu3 %v426_v43  ;;  %v586_v9 = vld [vmem:[#allocation2 + $0xba8] sm:$0xff]  ;;  %v443_v26 = vld [vmem:[#allocation2 + $0x730] sm:$0xff] }
  0x27   : > { %v501_v29 = vld [vmem:[#allocation2 + $0x900] sm:$0xff]  ;;  %623 = vmatpush.msra.mxu0 %v437_v28  ;;  %v518_v12 = vld [vmem:[#allocation2 + $0x988] sm:$0xff]  ;;  %v491_v43 = vld [vmem:[#allocation2 + $0x8b0] sm:$0xff] }
  0x28   : > { %v565_v30 = vld [vmem:[#allocation2 + $0xb00] sm:$0xff]  ;;  %643 = vmatpush.msra.mxu1 %v501_v29  ;;  %687 = vmatpush.msra.mxu3 %v422_v47  ;;  %v582_v13 = vld [vmem:[#allocation2 + $0xb88] sm:$0xff]  ;;  %v487_v47 = vld [vmem:[#allocation2 + $0x890] sm:$0xff] }
  0x29   : > { %v433_v32 = vld [vmem:[#allocation2 + $0x6e0] sm:$0xff]  ;;  %663 = vmatpush.msra.mxu2 %v565_v30  ;;  %v514_v16 = vld [vmem:[#allocation2 + $0x968] sm:$0xff]  ;;  %v439_v30 = vld [vmem:[#allocation2 + $0x710] sm:$0xff] }
  0x2a   : > { %v497_v33 = vld [vmem:[#allocation2 + $0x8e0] sm:$0xff]  ;;  %624 = vmatpush.msra.mxu0 %v433_v32  ;;  %688 = vmatpush.msra.mxu3 %v418_v51  ;;  %v578_v17 = vld [vmem:[#allocation2 + $0xb68] sm:$0xff]  ;;  %v483_v51 = vld [vmem:[#allocation2 + $0x870] sm:$0xff] }
  0x2b   : > { %v561_v34 = vld [vmem:[#allocation2 + $0xae0] sm:$0xff]  ;;  %644 = vmatpush.msra.mxu1 %v497_v33  ;;  %v510_v20 = vld [vmem:[#allocation2 + $0x948] sm:$0xff] }
  0x2c   : > { %v429_v36 = vld [vmem:[#allocation2 + $0x6c0] sm:$0xff]  ;;  %664 = vmatpush.msra.mxu2 %v561_v34  ;;  %689 = vmatpush.msra.mxu3 %v414_v55  ;;  %v574_v21 = vld [vmem:[#allocation2 + $0xb48] sm:$0xff]  ;;  %v435_v34 = vld [vmem:[#allocation2 + $0x6f0] sm:$0xff] }
  0x2d   : > { %v493_v37 = vld [vmem:[#allocation2 + $0x8c0] sm:$0xff]  ;;  %625 = vmatpush.msra.mxu0 %v429_v36  ;;  %v506_v24 = vld [vmem:[#allocation2 + $0x928] sm:$0xff] }
  0x2e   : > { %v557_v38 = vld [vmem:[#allocation2 + $0xac0] sm:$0xff]  ;;  %645 = vmatpush.msra.mxu1 %v493_v37  ;;  %690 = vmatpush.msra.mxu3 %v410_v59  ;;  %v570_v25 = vld [vmem:[#allocation2 + $0xb28] sm:$0xff] }
  0x2f   : > { %v425_v40 = vld [vmem:[#allocation2 + $0x6a0] sm:$0xff]  ;;  %665 = vmatpush.msra.mxu2 %v557_v38  ;;  %v502_v28 = vld [vmem:[#allocation2 + $0x908] sm:$0xff]  ;;  %v431_v38 = vld [vmem:[#allocation2 + $0x6d0] sm:$0xff] }
  0x30   : > { %v489_v41 = vld [vmem:[#allocation2 + $0x8a0] sm:$0xff]  ;;  %626 = vmatpush.msra.mxu0 %v425_v40  ;;  %691 = vmatpush.msra.mxu3 %v406_v63  ;;  %v566_v29 = vld [vmem:[#allocation2 + $0xb08] sm:$0xff] }
  0x31   : > { %v553_v42 = vld [vmem:[#allocation2 + $0xaa0] sm:$0xff]  ;;  %646 = vmatpush.msra.mxu1 %v489_v41  ;;  %v498_v32 = vld [vmem:[#allocation2 + $0x8e8] sm:$0xff] }
  0x32   : > { %v421_v44 = vld [vmem:[#allocation2 + $0x680] sm:$0xff]  ;;  %666 = vmatpush.msra.mxu2 %v553_v42  ;;  %756 = vmatpush.msrb.mxu3 %v531_v3  ;;  %v562_v33 = vld [vmem:[#allocation2 + $0xae8] sm:$0xff]  ;;  %v427_v42 = vld [vmem:[#allocation2 + $0x6b0] sm:$0xff] }
  0x33   : > { %v485_v45 = vld [vmem:[#allocation2 + $0x880] sm:$0xff]  ;;  %627 = vmatpush.msra.mxu0 %v421_v44  ;;  %v494_v36 = vld [vmem:[#allocation2 + $0x8c8] sm:$0xff] }
  0x34   : > { %v549_v46 = vld [vmem:[#allocation2 + $0xa80] sm:$0xff]  ;;  %647 = vmatpush.msra.mxu1 %v485_v45  ;;  %757 = vmatpush.msrb.mxu3 %v527_v7  ;;  %v558_v37 = vld [vmem:[#allocation2 + $0xac8] sm:$0xff] }
  0x35   : > { %v417_v48 = vld [vmem:[#allocation2 + $0x660] sm:$0xff]  ;;  %667 = vmatpush.msra.mxu2 %v549_v46  ;;  %v490_v40 = vld [vmem:[#allocation2 + $0x8a8] sm:$0xff]  ;;  %v423_v46 = vld [vmem:[#allocation2 + $0x690] sm:$0xff] }
  0x36   : > { %v481_v49 = vld [vmem:[#allocation2 + $0x860] sm:$0xff]  ;;  %628 = vmatpush.msra.mxu0 %v417_v48  ;;  %758 = vmatpush.msrb.mxu3 %v523_v11  ;;  %v554_v41 = vld [vmem:[#allocation2 + $0xaa8] sm:$0xff]  ;;  %v471_v11 = vld [vmem:[#allocation2 + $0x810] sm:$0xff] }
  0x37   : > { %v545_v50 = vld [vmem:[#allocation2 + $0xa60] sm:$0xff]  ;;  %648 = vmatpush.msra.mxu1 %v481_v49  ;;  %v486_v44 = vld [vmem:[#allocation2 + $0x888] sm:$0xff] }
  0x38   : > { %v413_v52 = vld [vmem:[#allocation2 + $0x640] sm:$0xff]  ;;  %668 = vmatpush.msra.mxu2 %v545_v50  ;;  %759 = vmatpush.msrb.mxu3 %v519_v15  ;;  %v550_v45 = vld [vmem:[#allocation2 + $0xa88] sm:$0xff]  ;;  %v419_v50 = vld [vmem:[#allocation2 + $0x670] sm:$0xff] }
  0x39   : > { %v477_v53 = vld [vmem:[#allocation2 + $0x840] sm:$0xff]  ;;  %629 = vmatpush.msra.mxu0 %v413_v52  ;;  %v482_v48 = vld [vmem:[#allocation2 + $0x868] sm:$0xff]  ;;  %v595_v15 = vld [vmem:[#allocation2 + $0xbf0] sm:$0xff] }
  0x3a   : > { %v541_v54 = vld [vmem:[#allocation2 + $0xa40] sm:$0xff]  ;;  %649 = vmatpush.msra.mxu1 %v477_v53  ;;  %760 = vmatpush.msrb.mxu3 %v515_v19  ;;  %v546_v49 = vld [vmem:[#allocation2 + $0xa68] sm:$0xff]  ;;  %v591_v19 = vld [vmem:[#allocation2 + $0xbd0] sm:$0xff] }
  0x3b   : > { %v409_v56 = vld [vmem:[#allocation2 + $0x620] sm:$0xff]  ;;  %669 = vmatpush.msra.mxu2 %v541_v54  ;;  %v478_v52 = vld [vmem:[#allocation2 + $0x848] sm:$0xff]  ;;  %v401_v54 = vld [vmem:[%s2970_s30 + $0x18] sm:$0x1] }
  0x3c   : > { %v473_v57 = vld [vmem:[#allocation2 + $0x820] sm:$0xff]  ;;  %630 = vmatpush.msra.mxu0 %v409_v56  ;;  %761 = vmatpush.msrb.mxu3 %v511_v23  ;;  %v399_v55 = vld [vmem:[%s2970_s30 + $0x8] sm:$0xfe]  ;;  %v403_v59 = vld [vmem:[%s2970_s30 + $0x28] sm:$0x1] }
  0x3d   : > { %v537_v58 = vld [vmem:[#allocation2 + $0xa20] sm:$0xff]  ;;  %650 = vmatpush.msra.mxu1 %v473_v57  ;;  %v542_v57 = vld [vmem:[#allocation2 + $0xa48] sm:$0xff]  ;;  %v611_v7 = vrot.slane %v403_v59, 1  ;;  %v587_v23 = vld [vmem:[#allocation2 + $0xbb0] sm:$0xff] }
  0x3e   : > { %v405_v60 = vld [vmem:[#allocation2 + $0x600] sm:$0xff]  ;;  %670 = vmatpush.msra.mxu2 %v537_v58  ;;  %762 = vmatpush.msrb.mxu3 %v507_v27  ;;  %v400_v58 = vld [vmem:[%s2970_s30 + $0x10] sm:$0xfe]  ;;  %v538_v63 = vld [vmem:[#allocation2 + $0xa28] sm:$0xff] }
  0x3f   : > { %v469_v61 = vld [vmem:[#allocation2 + $0x800] sm:$0xff]  ;;  %631 = vmatpush.msra.mxu0 %v405_v60  ;;  %v415_v60 = vld [vmem:[#allocation2 + $0x650] sm:$0xff] }
  0x40   : > { %v533_v62 = vld [vmem:[#allocation2 + $0xa00] sm:$0xff]  ;;  %651 = vmatpush.msra.mxu1 %v469_v61  ;;  %763 = vmatpush.msrb.mxu3 %v503_v31  ;;  %v479_v61 = vld [vmem:[#allocation2 + $0x850] sm:$0xff]  ;;  %v452_v31 = vld [vmem:[#allocation2 + $0x778] sm:$0xff] }
  0x41   : > { %671 = vmatpush.msra.mxu2 %v533_v62  ;;  %696 = vmatpush.msrb.mxu0 %v530_v0  ;;  %v398_v53 = vld [vmem:[%s2970_s30] sm:$0xfe]  ;;  %v402_v56 = vld [vmem:[%s2970_s30 + $0x20] sm:$0x1]  ;;  %v474_v62 = vld [vmem:[#allocation2 + $0x828] sm:$0xff] }
  0x42   : > { %716 = vmatpush.msrb.mxu1 %v594_v1  ;;  %764 = vmatpush.msrb.mxu3 %v499_v35  ;;  %v604_v0 = vrot.slane %v398_v53, 1  ;;  %v605_v1 = vrot.slane %v401_v54, 1  ;;  %v608_v3 = vrot.slane %v402_v56, 1  ;;  %v583_v27 = vld [vmem:[#allocation2 + $0xb90] sm:$0xff]  ;;  %v496_v53 = vld [vmem:[#allocation2 + $0x8d8] sm:$0xff] }
  0x43   : > { %736 = vmatpush.msrb.mxu2 %v467_v2  ;;  %697 = vmatpush.msrb.mxu0 %v526_v4  ;;  %v607_v2 = vrot.slane %v399_v55, 1  ;;  %v411_v4 = vld [vmem:[#allocation2 + $0x630] sm:$0xff]  ;;  %v560_v54 = vld [vmem:[#allocation2 + $0xad8] sm:$0xff] }
  0x44   : > { %717 = vmatpush.msrb.mxu1 %v590_v5  ;;  %765 = vmatpush.msrb.mxu3 %v495_v39  ;;  %v475_v5 = vld [vmem:[#allocation2 + $0x830] sm:$0xff]  ;;  %v428_v56 = vld [vmem:[#allocation2 + $0x6b8] sm:$0xff] }
  0x45   : > { %737 = vmatpush.msrb.mxu2 %v463_v6  ;;  %698 = vmatpush.msrb.mxu0 %v522_v8  ;;  %v610_v6 = vrot.slane %v400_v58, 1  ;;  %v470_v8 = vld [vmem:[#allocation2 + $0x808] sm:$0xff]  ;;  %v575_v35 = vld [vmem:[#allocation2 + $0xb50] sm:$0xff]  ;;  %v556_v58 = vld [vmem:[#allocation2 + $0xab8] sm:$0xff] }
  0x46   : > { %718 = vmatpush.msrb.mxu1 %v586_v9  ;;  %766 = vmatpush.msrb.mxu3 %v491_v43  ;;  %v534_v9 = vld [vmem:[#allocation2 + $0xa08] sm:$0xff]  ;;  %v571_v39 = vld [vmem:[#allocation2 + $0xb30] sm:$0xff] }
  0x47   : > { %738 = vmatpush.msrb.mxu2 %v459_v10  ;;  %699 = vmatpush.msrb.mxu0 %v518_v12  ;;  %v407_v10 = vld [vmem:[#allocation2 + $0x610] sm:$0xff]  ;;  %v2979_v12 = vsel %vm603_vm0, %v604_v0, %v605_v1  ;;  %v420_v0 = vld [vmem:[#allocation2 + $0x678] sm:$0xff] }
  0x48   : > { %719 = vmatpush.msrb.mxu1 %v582_v13  ;;  %767 = vmatpush.msrb.mxu3 %v487_v47  ;;  %v2982_v13 = vsel %vm603_vm0, %v607_v2, %v608_v3  ;;  %v567_v43 = vld [vmem:[#allocation2 + $0xb10] sm:$0xff]  ;;  %v484_v1 = vld [vmem:[#allocation2 + $0x878] sm:$0xff] }
  0x49   : > { %739 = vmatpush.msrb.mxu2 %v455_v14  ;;  %700 = vmatpush.msrb.mxu0 %v514_v16  ;;  %v2985_v14 = vsel %vm603_vm0, %v610_v6, %v611_v7  ;;  %v468_v16 = vld [vmem:[#allocation2 + $0x7f8] sm:$0xff]  ;;  %v563_v47 = vld [vmem:[#allocation2 + $0xaf0] sm:$0xff] }
  0x4a   : > { %720 = vmatpush.msrb.mxu1 %v578_v17  ;;  %768 = vmatpush.msrb.mxu3 %v483_v51  ;;  %v532_v17 = vld [vmem:[#allocation2 + $0x9f8] sm:$0xff]  ;;  %v559_v51 = vld [vmem:[#allocation2 + $0xad0] sm:$0xff] }
  0x4b   : > { %740 = vmatpush.msrb.mxu2 %v451_v18  ;;  %701 = vmatpush.msrb.mxu0 %v510_v20  ;;  %v596_v18 = vld [vmem:[#allocation2 + $0xbf8] sm:$0xff]  ;;  %v555_v55 = vld [vmem:[#allocation2 + $0xab0] sm:$0xff] }
  0x4c   : > { %721 = vmatpush.msrb.mxu1 %v574_v21  ;;  %769 = vmatpush.msrb.mxu3 %v479_v61  ;;  %v464_v20 = vld [vmem:[#allocation2 + $0x7d8] sm:$0xff]  ;;  %v551_v59 = vld [vmem:[#allocation2 + $0xa90] sm:$0xff] }
  0x4d   : > { %741 = vmatpush.msrb.mxu2 %v447_v22  ;;  %702 = vmatpush.msrb.mxu0 %v506_v24  ;;  %v528_v21 = vld [vmem:[#allocation2 + $0x9d8] sm:$0xff]  ;;  %v543_v3 = vld [vmem:[#allocation2 + $0xa50] sm:$0xff] }
  0x4e   : > { %722 = vmatpush.msrb.mxu1 %v570_v25  ;;  %770 = vmatpush.msrb.mxu3 %v475_v5  ;;  %v592_v22 = vld [vmem:[#allocation2 + $0xbd8] sm:$0xff]  ;;  %v539_v7 = vld [vmem:[#allocation2 + $0xa30] sm:$0xff] }
  0x4f   : > { %742 = vmatpush.msrb.mxu2 %v443_v26  ;;  %703 = vmatpush.msrb.mxu0 %v502_v28  ;;  %v460_v24 = vld [vmem:[#allocation2 + $0x7b8] sm:$0xff] }
  0x50   : > { %723 = vmatpush.msrb.mxu1 %v566_v29  ;;  %771 = vmatpush.msrb.mxu3 %v471_v11  ;;  %v524_v25 = vld [vmem:[#allocation2 + $0x9b8] sm:$0xff]  ;;  %v535_v11 = vld [vmem:[#allocation2 + $0xa10] sm:$0xff] }
  0x51   : > { %743 = vmatpush.msrb.mxu2 %v439_v30  ;;  %704 = vmatpush.msrb.mxu0 %v498_v32  ;;  %v588_v26 = vld [vmem:[#allocation2 + $0xbb8] sm:$0xff]  ;;  %v579_v32 = vld [vmem:[#allocation2 + $0xb70] sm:$0xff] }
  0x52   : > { %724 = vmatpush.msrb.mxu1 %v562_v33  ;;  %632 = vmatmul.f32.vlgmr.msra.gmra.mxu0 %v2979_v12  ;;  %v456_v28 = vld [vmem:[#allocation2 + $0x798] sm:$0xff] }
  0x53   : > { %744 = vmatpush.msrb.mxu2 %v435_v34  ;;  %705 = vmatpush.msrb.mxu0 %v494_v36  ;;  %v520_v29 = vld [vmem:[#allocation2 + $0x998] sm:$0xff] }
  0x54   : > { %725 = vmatpush.msrb.mxu1 %v558_v37  ;;  %672 = vmatmul.f32.vlgmr.msra.gmra.mxu2 %v2985_v14  ;;  %v584_v30 = vld [vmem:[#allocation2 + $0xb98] sm:$0xff] }
  0x55   : > { %745 = vmatpush.msrb.mxu2 %v431_v38  ;;  %706 = vmatpush.msrb.mxu0 %v490_v40  ;;  %v516_v33 = vld [vmem:[#allocation2 + $0x978] sm:$0xff] }
  0x56   : > { %726 = vmatpush.msrb.mxu1 %v554_v41  ;;  %692 = vmatmul.f32.vlgmr.msra.gmra.mxu3 %v2979_v12  ;;  %v580_v34 = vld [vmem:[#allocation2 + $0xb78] sm:$0xff] }
  0x57   : > { %746 = vmatpush.msrb.mxu2 %v427_v42  ;;  %707 = vmatpush.msrb.mxu0 %v486_v44  ;;  %v448_v36 = vld [vmem:[#allocation2 + $0x758] sm:$0xff] }
  0x58   : > { %727 = vmatpush.msrb.mxu1 %v550_v45  ;;  %836 = vmatpush.msra.mxu3 %v596_v18  ;;  %v512_v37 = vld [vmem:[#allocation2 + $0x958] sm:$0xff]  ;;  %v266_v18 = vld [vmem:[#allocation2 + $0x1e0] sm:$0xff] }
  0x59   : > { %747 = vmatpush.msrb.mxu2 %v423_v46  ;;  %708 = vmatpush.msrb.mxu0 %v482_v48  ;;  %v576_v38 = vld [vmem:[#allocation2 + $0xb58] sm:$0xff] }
  0x5a   : > { %728 = vmatpush.msrb.mxu1 %v546_v49  ;;  %837 = vmatpush.msra.mxu3 %v592_v22  ;;  %v444_v40 = vld [vmem:[#allocation2 + $0x738] sm:$0xff]  ;;  %v262_v22 = vld [vmem:[#allocation2 + $0x1c0] sm:$0xff] }
  0x5b   : > { %748 = vmatpush.msrb.mxu2 %v419_v50  ;;  %709 = vmatpush.msrb.mxu0 %v478_v52  ;;  %v508_v41 = vld [vmem:[#allocation2 + $0x938] sm:$0xff] }
  0x5c   : > { %729 = vmatpush.msrb.mxu1 %v542_v57  ;;  %838 = vmatpush.msra.mxu3 %v588_v26  ;;  %v572_v42 = vld [vmem:[#allocation2 + $0xb38] sm:$0xff]  ;;  %v258_v26 = vld [vmem:[#allocation2 + $0x1a0] sm:$0xff] }
  0x5d   : > { %749 = vmatpush.msrb.mxu2 %v415_v60  ;;  %710 = vmatpush.msrb.mxu0 %v474_v62  ;;  %v440_v44 = vld [vmem:[#allocation2 + $0x718] sm:$0xff] }
  0x5e   : > { %730 = vmatpush.msrb.mxu1 %v538_v63  ;;  %839 = vmatpush.msra.mxu3 %v584_v30  ;;  %v504_v45 = vld [vmem:[#allocation2 + $0x918] sm:$0xff]  ;;  %v547_v63 = vld [vmem:[#allocation2 + $0xa70] sm:$0xff]  ;;  %v254_v30 = vld [vmem:[#allocation2 + $0x180] sm:$0xff] }
  0x5f   : > { %750 = vmatpush.msrb.mxu2 %v411_v4  ;;  %711 = vmatpush.msrb.mxu0 %v470_v8  ;;  %v568_v46 = vld [vmem:[#allocation2 + $0xb18] sm:$0xff] }
  0x60   : > { %731 = vmatpush.msrb.mxu1 %v534_v9  ;;  %712 = vmatmul.f32.vlgmr.msrb.gmra.mxu0 %v2982_v13  ;;  %v436_v48 = vld [vmem:[#allocation2 + $0x6f8] sm:$0xff] }
  0x61   : > { %751 = vmatpush.msrb.mxu2 %v407_v10  ;;  %652 = vmatmul.f32.vlgmr.msra.gmra.mxu1 %v2982_v13  ;;  %v500_v49 = vld [vmem:[#allocation2 + $0x8f8] sm:$0xff] }
  0x62   : > { %776 = vmatpush.msra.mxu0 %v595_v15  ;;  %796 = vmatpush.msra.mxu1 %v468_v16  ;;  %v564_v50 = vld [vmem:[#allocation2 + $0xaf8] sm:$0xff] }
  0x63   : > { %816 = vmatpush.msra.mxu2 %v532_v17  ;;  %840 = vmatpush.msra.mxu3 %v580_v34  ;;  %v432_v52 = vld [vmem:[#allocation2 + $0x6d8] sm:$0xff]  ;;  %v314_v34 = vld [vmem:[#allocation2 + $0x360] sm:$0xff] }
  0x64   : > { %777 = vmatpush.msra.mxu0 %v591_v19  ;;  %797 = vmatpush.msra.mxu1 %v464_v20  ;;  %v492_v57 = vld [vmem:[#allocation2 + $0x8b8] sm:$0xff]  ;;  %v330_v19 = vld [vmem:[#allocation2 + $0x3e0] sm:$0xff] }
  0x65   : > { %817 = vmatpush.msra.mxu2 %v528_v21  ;;  %841 = vmatpush.msra.mxu3 %v576_v38  ;;  %v424_v60 = vld [vmem:[#allocation2 + $0x698] sm:$0xff]  ;;  %v394_v20 = vld [vmem:[#allocation2 + $0x5e0] sm:$0xff]  ;;  %v267_v21 = vld [vmem:[#allocation2 + $0x1e8] sm:$0xff] }
  0x66   : > { %778 = vmatpush.msra.mxu0 %v587_v23  ;;  %798 = vmatpush.msra.mxu1 %v460_v24  ;;  %v488_v61 = vld [vmem:[#allocation2 + $0x898] sm:$0xff]  ;;  %v326_v23 = vld [vmem:[#allocation2 + $0x3c0] sm:$0xff] }
  0x67   : > { %818 = vmatpush.msra.mxu2 %v524_v25  ;;  %842 = vmatpush.msra.mxu3 %v572_v42  ;;  %v552_v62 = vld [vmem:[#allocation2 + $0xa98] sm:$0xff]  ;;  %v390_v24 = vld [vmem:[#allocation2 + $0x5c0] sm:$0xff]  ;;  %v263_v25 = vld [vmem:[#allocation2 + $0x1c8] sm:$0xff] }
  0x68   : > { %779 = vmatpush.msra.mxu0 %v583_v27  ;;  %799 = vmatpush.msra.mxu1 %v456_v28  ;;  %v548_v2 = vld [vmem:[#allocation2 + $0xa78] sm:$0xff]  ;;  %v322_v27 = vld [vmem:[#allocation2 + $0x3a0] sm:$0xff] }
  0x69   : > { %819 = vmatpush.msra.mxu2 %v520_v29  ;;  %732 = vmatmul.f32.vlgmr.msrb.gmra.mxu1 %v2985_v14  ;;  %v416_v4 = vld [vmem:[#allocation2 + $0x658] sm:$0xff]  ;;  %v386_v28 = vld [vmem:[#allocation2 + $0x5a0] sm:$0xff]  ;;  %v259_v29 = vld [vmem:[#allocation2 + $0x1a8] sm:$0xff] }
  0x6a   : > { %800 = vmatpush.msra.mxu1 %v452_v31  ;;  %780 = vmatpush.msra.mxu0 %v579_v32  ;;  %v480_v5 = vld [vmem:[#allocation2 + $0x858] sm:$0xff]  ;;  %v318_v31 = vld [vmem:[#allocation2 + $0x380] sm:$0xff] }
  0x6b   : > { %820 = vmatpush.msra.mxu2 %v516_v33  ;;  %843 = vmatpush.msra.mxu3 %v568_v46  ;;  %v544_v6 = vld [vmem:[#allocation2 + $0xa58] sm:$0xff]  ;;  %v382_v32 = vld [vmem:[#allocation2 + $0x580] sm:$0xff]  ;;  %v255_v33 = vld [vmem:[#allocation2 + $0x188] sm:$0xff] }
  0x6c   : > { %781 = vmatpush.msra.mxu0 %v575_v35  ;;  %801 = vmatpush.msra.mxu1 %v448_v36  ;;  %v412_v8 = vld [vmem:[#allocation2 + $0x638] sm:$0xff]  ;;  %v250_v35 = vld [vmem:[#allocation2 + $0x160] sm:$0xff] }
  0x6d   : > { %821 = vmatpush.msra.mxu2 %v512_v37  ;;  %844 = vmatpush.msra.mxu3 %v564_v50  ;;  %v476_v9 = vld [vmem:[#allocation2 + $0x838] sm:$0xff]  ;;  %v378_v36 = vld [vmem:[#allocation2 + $0x560] sm:$0xff]  ;;  %v251_v37 = vld [vmem:[#allocation2 + $0x168] sm:$0xff] }
  0x6e   : > { %782 = vmatpush.msra.mxu0 %v571_v39  ;;  %802 = vmatpush.msra.mxu1 %v444_v40  ;;  %v540_v10 = vld [vmem:[#allocation2 + $0xa38] sm:$0xff]  ;;  %v310_v38 = vld [vmem:[#allocation2 + $0x340] sm:$0xff] }
  0x6f   : > { %822 = vmatpush.msra.mxu2 %v508_v41  ;;  %845 = vmatpush.msra.mxu3 %v560_v54  ;;  %v408_v15 = vld [vmem:[#allocation2 + $0x618] sm:$0xff]  ;;  %v246_v39 = vld [vmem:[#allocation2 + $0x140] sm:$0xff]  ;;  %v247_v41 = vld [vmem:[#allocation2 + $0x148] sm:$0xff] }
  0x70   : > { %783 = vmatpush.msra.mxu0 %v567_v43  ;;  %803 = vmatpush.msra.mxu1 %v440_v44  ;;  %v472_v16 = vld [vmem:[#allocation2 + $0x818] sm:$0xff]  ;;  %v374_v40 = vld [vmem:[#allocation2 + $0x540] sm:$0xff] }
  0x71   : > { %823 = vmatpush.msra.mxu2 %v504_v45  ;;  %846 = vmatpush.msra.mxu3 %v556_v58  ;;  %v536_v17 = vld [vmem:[#allocation2 + $0xa18] sm:$0xff]  ;;  %v306_v42 = vld [vmem:[#allocation2 + $0x320] sm:$0xff]  ;;  %v243_v45 = vld [vmem:[#allocation2 + $0x128] sm:$0xff] }
  0x72   : > { %784 = vmatpush.msra.mxu0 %v563_v47  ;;  %804 = vmatpush.msra.mxu1 %v436_v48  ;;  %v242_v43 = vld [vmem:[#allocation2 + $0x120] sm:$0xff] }
  0x73   : > { %824 = vmatpush.msra.mxu2 %v500_v49  ;;  %847 = vmatpush.msra.mxu3 %v552_v62  ;;  %v370_v44 = vld [vmem:[#allocation2 + $0x520] sm:$0xff]  ;;  %v239_v49 = vld [vmem:[#allocation2 + $0x108] sm:$0xff] }
  0x74   : > { %785 = vmatpush.msra.mxu0 %v559_v51  ;;  %805 = vmatpush.msra.mxu1 %v432_v52  ;;  %v302_v46 = vld [vmem:[#allocation2 + $0x300] sm:$0xff] }
  0x75   : > { %825 = vmatpush.msra.mxu2 %v496_v53  ;;  %848 = vmatpush.msra.mxu3 %v548_v2  ;;  %v238_v47 = vld [vmem:[#allocation2 + $0x100] sm:$0xff]  ;;  %v235_v53 = vld [vmem:[#allocation2 + $0xe8] sm:$0xff] }
  0x76   : > { %786 = vmatpush.msra.mxu0 %v555_v55  ;;  %806 = vmatpush.msra.mxu1 %v428_v56  ;;  %v366_v48 = vld [vmem:[#allocation2 + $0x500] sm:$0xff] }
  0x77   : > { %826 = vmatpush.msra.mxu2 %v492_v57  ;;  %849 = vmatpush.msra.mxu3 %v544_v6  ;;  %v298_v50 = vld [vmem:[#allocation2 + $0x2e0] sm:$0xff]  ;;  %v231_v57 = vld [vmem:[#allocation2 + $0xc8] sm:$0xff] }
  0x78   : > { %787 = vmatpush.msra.mxu0 %v551_v59  ;;  %807 = vmatpush.msra.mxu1 %v424_v60  ;;  %v234_v51 = vld [vmem:[#allocation2 + $0xe0] sm:$0xff] }
  0x79   : > { %827 = vmatpush.msra.mxu2 %v488_v61  ;;  %850 = vmatpush.msra.mxu3 %v540_v10  ;;  %v362_v52 = vld [vmem:[#allocation2 + $0x4e0] sm:$0xff]  ;;  %v227_v61 = vld [vmem:[#allocation2 + $0xa8] sm:$0xff] }
  0x7a   : > { %788 = vmatpush.msra.mxu0 %v547_v63  ;;  %808 = vmatpush.msra.mxu1 %v420_v0  ;;  %v294_v54 = vld [vmem:[#allocation2 + $0x2c0] sm:$0xff] }
  0x7b   : > { %828 = vmatpush.msra.mxu2 %v484_v1  ;;  %851 = vmatpush.msra.mxu3 %v536_v17  ;;  %v230_v55 = vld [vmem:[#allocation2 + $0xc0] sm:$0xff]  ;;  %v223_v1 = vld [vmem:[#allocation2 + $0x88] sm:$0xff] }
  0x7c   : > { %789 = vmatpush.msra.mxu0 %v543_v3  ;;  %809 = vmatpush.msra.mxu1 %v416_v4  ;;  %v358_v56 = vld [vmem:[#allocation2 + $0x4c0] sm:$0xff] }
  0x7d   : > { %829 = vmatpush.msra.mxu2 %v480_v5  ;;  %772 = vmatmul.f32.vlgmr.msrb.gmra.mxu3 %v2982_v13  ;;  %v290_v58 = vld [vmem:[#allocation2 + $0x2a0] sm:$0xff]  ;;  %v219_v5 = vld [vmem:[#allocation2 + $0x68] sm:$0xff] }
  0x7e   : > { %790 = vmatpush.msra.mxu0 %v539_v7  ;;  %810 = vmatpush.msra.mxu1 %v412_v8  ;;  %v226_v59 = vld [vmem:[#allocation2 + $0xa0] sm:$0xff] }
  0x7f   : > { %830 = vmatpush.msra.mxu2 %v476_v9  ;;  %916 = vmatpush.msrb.mxu3 %v267_v21  ;;  %v354_v60 = vld [vmem:[#allocation2 + $0x4a0] sm:$0xff]  ;;  %v215_v9 = vld [vmem:[#allocation2 + $0x48] sm:$0xff] }
  0x80   : > { %791 = vmatpush.msra.mxu0 %v535_v11  ;;  %811 = vmatpush.msra.mxu1 %v408_v15  ;;  %v286_v62 = vld [vmem:[#allocation2 + $0x280] sm:$0xff]  ;;  %v211_v15 = vld [vmem:[#allocation2 + $0x28] sm:$0xff] }
  0x81   : > { %831 = vmatpush.msra.mxu2 %v472_v16  ;;  %917 = vmatpush.msrb.mxu3 %v263_v25  ;;  %v222_v63 = vld [vmem:[#allocation2 + $0x80] sm:$0xff]  ;;  %v395_v21 = vld [vmem:[#allocation2 + $0x5e8] sm:$0xff] }
  0x82   : > { %752 = vmatmul.f32.vlgmr.msrb.gmra.mxu2 %v2979_v12  ;;  %856 = vmatpush.msrb.mxu0 %v266_v18  ;;  %v350_v0 = vld [vmem:[#allocation2 + $0x480] sm:$0xff]  ;;  %v207_v18 = vld [vmem:[#allocation2 + $0x8] sm:$0xff] }
  0x83   : > { %876 = vmatpush.msrb.mxu1 %v330_v19  ;;  %896 = vmatpush.msrb.mxu2 %v394_v20  ;;  %v218_v2 = vld [vmem:[#allocation2 + $0x60] sm:$0xff]  ;;  %v3003_v19 = vld [vmem:[%s2970_s30 + $0x10] sm:$0xff]  ;;  %v331_v20 = vld [vmem:[#allocation2 + $0x3e8] sm:$0xff] }
  0x84   : > { %857 = vmatpush.msrb.mxu0 %v262_v22  ;;  %918 = vmatpush.msrb.mxu3 %v259_v29  ;;  %v282_v3 = vld [vmem:[#allocation2 + $0x260] sm:$0xff]  ;;  %v268_v22 = vld [vmem:[#allocation2 + $0x1f0] sm:$0xff]  ;;  %v391_v25 = vld [vmem:[#allocation2 + $0x5c8] sm:$0xff] }
  0x85   : > { %877 = vmatpush.msrb.mxu1 %v326_v23  ;;  %897 = vmatpush.msrb.mxu2 %v390_v24  ;;  %v346_v4 = vld [vmem:[#allocation2 + $0x460] sm:$0xff]  ;;  %v3008_v23 = vld [vmem:[%s2970_s30 + $0x8] sm:$0xff] }
  0x86   : > { %858 = vmatpush.msrb.mxu0 %v258_v26  ;;  %919 = vmatpush.msrb.mxu3 %v255_v33  ;;  %v214_v6 = vld [vmem:[#allocation2 + $0x40] sm:$0xff]  ;;  %v327_v24 = vld [vmem:[#allocation2 + $0x3c8] sm:$0xff]  ;;  %v264_v26 = vld [vmem:[#allocation2 + $0x1d0] sm:$0xff] }
  0x87   : > { %878 = vmatpush.msrb.mxu1 %v322_v27  ;;  %898 = vmatpush.msrb.mxu2 %v386_v28  ;;  %v278_v7 = vld [vmem:[#allocation2 + $0x240] sm:$0xff]  ;;  %v332_v27 = vld [vmem:[#allocation2 + $0x3f0] sm:$0xff]  ;;  %v323_v28 = vld [vmem:[#allocation2 + $0x3a8] sm:$0xff] }
  0x88   : > { %859 = vmatpush.msrb.mxu0 %v254_v30  ;;  %920 = vmatpush.msrb.mxu3 %v251_v37  ;;  %v342_v8 = vld [vmem:[#allocation2 + $0x440] sm:$0xff]  ;;  %v387_v29 = vld [vmem:[#allocation2 + $0x5a8] sm:$0xff]  ;;  %v260_v30 = vld [vmem:[#allocation2 + $0x1b0] sm:$0xff] }
  0x89   : > { %879 = vmatpush.msrb.mxu1 %v318_v31  ;;  %899 = vmatpush.msrb.mxu2 %v382_v32  ;;  %v210_v10 = vld [vmem:[#allocation2 + $0x20] sm:$0xff]  ;;  %v328_v31 = vld [vmem:[#allocation2 + $0x3d0] sm:$0xff]  ;;  %v319_v32 = vld [vmem:[#allocation2 + $0x388] sm:$0xff] }
  0x8a   : > { %792 = vmatmul.f32.vlgmr.msra.gmra.mxu0 %v2985_v14  ;;  %921 = vmatpush.msrb.mxu3 %v247_v41  ;;  %v274_v11 = vld [vmem:[#allocation2 + $0x220] sm:$0xff]  ;;  %v383_v33 = vld [vmem:[#allocation2 + $0x588] sm:$0xff] }
  0x8b   : > { %880 = vmatpush.msrb.mxu1 %v314_v34  ;;  %860 = vmatpush.msrb.mxu0 %v250_v35  ;;  %v270_v16 = vld [vmem:[#allocation2 + $0x200] sm:$0xff]  ;;  %v256_v34 = vld [vmem:[#allocation2 + $0x190] sm:$0xff]  ;;  %v379_v37 = vld [vmem:[#allocation2 + $0x568] sm:$0xff] }
  0x8c   : > { %900 = vmatpush.msrb.mxu2 %v378_v36  ;;  %922 = vmatpush.msrb.mxu3 %v243_v45  ;;  %v334_v17 = vld [vmem:[#allocation2 + $0x400] sm:$0xff]  ;;  %v324_v35 = vld [vmem:[#allocation2 + $0x3b0] sm:$0xff]  ;;  %v315_v36 = vld [vmem:[#allocation2 + $0x368] sm:$0xff] }
  0x8d   : > { %881 = vmatpush.msrb.mxu1 %v310_v38  ;;  %861 = vmatpush.msrb.mxu0 %v246_v39  ;;  %v252_v38 = vld [vmem:[#allocation2 + $0x170] sm:$0xff]  ;;  %v375_v41 = vld [vmem:[#allocation2 + $0x548] sm:$0xff] }
  0x8e   : > { %901 = vmatpush.msrb.mxu2 %v374_v40  ;;  %923 = vmatpush.msrb.mxu3 %v239_v49  ;;  %v320_v39 = vld [vmem:[#allocation2 + $0x390] sm:$0xff]  ;;  %v311_v40 = vld [vmem:[#allocation2 + $0x348] sm:$0xff] }
  0x8f   : > { %882 = vmatpush.msrb.mxu1 %v306_v42  ;;  %862 = vmatpush.msrb.mxu0 %v242_v43  ;;  %v248_v42 = vld [vmem:[#allocation2 + $0x150] sm:$0xff]  ;;  %v371_v45 = vld [vmem:[#allocation2 + $0x528] sm:$0xff] }
  0x90   : > { %902 = vmatpush.msrb.mxu2 %v370_v44  ;;  %924 = vmatpush.msrb.mxu3 %v235_v53  ;;  %v316_v43 = vld [vmem:[#allocation2 + $0x370] sm:$0xff]  ;;  %v307_v44 = vld [vmem:[#allocation2 + $0x328] sm:$0xff] }
  0x91   : > { %883 = vmatpush.msrb.mxu1 %v302_v46  ;;  %863 = vmatpush.msrb.mxu0 %v238_v47  ;;  %v244_v46 = vld [vmem:[#allocation2 + $0x130] sm:$0xff]  ;;  %v367_v49 = vld [vmem:[#allocation2 + $0x508] sm:$0xff] }
  0x92   : > { %903 = vmatpush.msrb.mxu2 %v366_v48  ;;  %925 = vmatpush.msrb.mxu3 %v231_v57  ;;  %v312_v47 = vld [vmem:[#allocation2 + $0x350] sm:$0xff]  ;;  %v303_v48 = vld [vmem:[#allocation2 + $0x308] sm:$0xff] }
  0x93   : > { %884 = vmatpush.msrb.mxu1 %v298_v50  ;;  %864 = vmatpush.msrb.mxu0 %v234_v51  ;;  %v240_v50 = vld [vmem:[#allocation2 + $0x110] sm:$0xff]  ;;  %v363_v53 = vld [vmem:[#allocation2 + $0x4e8] sm:$0xff] }
  0x94   : > { %904 = vmatpush.msrb.mxu2 %v362_v52  ;;  %926 = vmatpush.msrb.mxu3 %v227_v61  ;;  %v308_v51 = vld [vmem:[#allocation2 + $0x330] sm:$0xff]  ;;  %v299_v52 = vld [vmem:[#allocation2 + $0x2e8] sm:$0xff] }
  0x95   : > { %885 = vmatpush.msrb.mxu1 %v294_v54  ;;  %865 = vmatpush.msrb.mxu0 %v230_v55  ;;  %v236_v54 = vld [vmem:[#allocation2 + $0xf0] sm:$0xff]  ;;  %v359_v57 = vld [vmem:[#allocation2 + $0x4c8] sm:$0xff] }
  0x96   : > { %905 = vmatpush.msrb.mxu2 %v358_v56  ;;  %927 = vmatpush.msrb.mxu3 %v223_v1  ;;  %v304_v55 = vld [vmem:[#allocation2 + $0x310] sm:$0xff]  ;;  %v295_v56 = vld [vmem:[#allocation2 + $0x2c8] sm:$0xff] }
  0x97   : > { %886 = vmatpush.msrb.mxu1 %v290_v58  ;;  %866 = vmatpush.msrb.mxu0 %v226_v59  ;;  %v232_v58 = vld [vmem:[#allocation2 + $0xd0] sm:$0xff]  ;;  %v355_v61 = vld [vmem:[#allocation2 + $0x4a8] sm:$0xff] }
  0x98   : > { %906 = vmatpush.msrb.mxu2 %v354_v60  ;;  %852 = vmatmul.f32.vlgmr.msra.gmra.mxu3 %v2985_v14  ;;  %v206_v14 = vld [vmem:[#allocation2] sm:$0xff]  ;;  %v300_v59 = vld [vmem:[#allocation2 + $0x2f0] sm:$0xff]  ;;  %v291_v60 = vld [vmem:[#allocation2 + $0x2a8] sm:$0xff] }
  0x99   : > { %887 = vmatpush.msrb.mxu1 %v286_v62  ;;  %867 = vmatpush.msrb.mxu0 %v222_v63  ;;  %v228_v62 = vld [vmem:[#allocation2 + $0xb0] sm:$0xff]  ;;  %v351_v1 = vld [vmem:[#allocation2 + $0x488] sm:$0xff] }
  0x9a   : > { %907 = vmatpush.msrb.mxu2 %v350_v0  ;;  %928 = vmatpush.msrb.mxu3 %v219_v5  ;;  %v296_v63 = vld [vmem:[#allocation2 + $0x2d0] sm:$0xff]  ;;  %v287_v0 = vld [vmem:[#allocation2 + $0x288] sm:$0xff] }
  0x9b   : > { %832 = vmatmul.f32.vlgmr.msra.gmra.mxu2 %v2982_v13  ;;  %868 = vmatpush.msrb.mxu0 %v218_v2  ;;  %v338_v13 = vld [vmem:[#allocation2 + $0x420] sm:$0xff]  ;;  %v224_v2 = vld [vmem:[#allocation2 + $0x90] sm:$0xff]  ;;  %v347_v5 = vld [vmem:[#allocation2 + $0x468] sm:$0xff] }
  0x9c   : > { %888 = vmatpush.msrb.mxu1 %v282_v3  ;;  %908 = vmatpush.msrb.mxu2 %v346_v4  ;;  %v292_v3 = vld [vmem:[#allocation2 + $0x2b0] sm:$0xff]  ;;  %v283_v4 = vld [vmem:[#allocation2 + $0x268] sm:$0xff] }
  0x9d   : > { %812 = vmatmul.f32.vlgmr.msra.gmra.mxu1 %v2979_v12  ;;  %869 = vmatpush.msrb.mxu0 %v214_v6  ;;  %v3000_v12 = vld [vmem:[%s2970_s30] sm:$0xff]  ;;  %v220_v6 = vld [vmem:[#allocation2 + $0x70] sm:$0xff] }
  0x9e   : > { %889 = vmatpush.msrb.mxu1 %v278_v7  ;;  %909 = vmatpush.msrb.mxu2 %v342_v8  ;;  %v288_v7 = vld [vmem:[#allocation2 + $0x290] sm:$0xff]  ;;  %v279_v8 = vld [vmem:[#allocation2 + $0x248] sm:$0xff] }
  0x9f   : > { %929 = vmatpush.msrb.mxu3 %v215_v9  ;;  %870 = vmatpush.msrb.mxu0 %v210_v10  ;;  %v343_v9 = vld [vmem:[#allocation2 + $0x448] sm:$0xff]  ;;  %v216_v10 = vld [vmem:[#allocation2 + $0x50] sm:$0xff] }
  0xa0   : > { %890 = vmatpush.msrb.mxu1 %v274_v11  ;;  %910 = vmatpush.msrb.mxu2 %v338_v13  ;;  %v284_v11 = vld [vmem:[#allocation2 + $0x270] sm:$0xff]  ;;  %v275_v13 = vld [vmem:[#allocation2 + $0x228] sm:$0xff] }
  0xa1   : > { %930 = vmatpush.msrb.mxu3 %v211_v15  ;;  %871 = vmatpush.msrb.mxu0 %v206_v14  ;;  %v339_v15 = vld [vmem:[#allocation2 + $0x428] sm:$0xff]  ;;  %v212_v14 = vld [vmem:[#allocation2 + $0x30] sm:$0xff] }
  0xa2   : > { %891 = vmatpush.msrb.mxu1 %v270_v16  ;;  %911 = vmatpush.msrb.mxu2 %v334_v17  ;;  %v280_v16 = vld [vmem:[#allocation2 + $0x250] sm:$0xff]  ;;  %v271_v17 = vld [vmem:[#allocation2 + $0x208] sm:$0xff] }
  0xa3   : > { %931 = vmatpush.msrb.mxu3 %v207_v18  ;;  %872 = vmatmul.f32.vlgmr.msrb.gmra.mxu0 %v3000_v12  ;;  %v335_v18 = vld [vmem:[#allocation2 + $0x408] sm:$0xff] }
  0xa4   : > { %912 = vmatmul.f32.vlgmr.msrb.gmra.mxu2 %v3003_v19  ;;  %932 = vmatmul.f32.vlgmr.msrb.gmra.mxu3 %v3000_v12 }
  0xa5   : > { %936 = vmatpush.msra.mxu0 %v331_v20  ;;  %956 = vmatpush.msra.mxu1 %v395_v21  ;;  %v208_v20 = vld [vmem:[#allocation2 + $0x10] sm:$0xff] }
  0xa6   : > { %976 = vmatpush.msra.mxu2 %v268_v22  ;;  %892 = vmatmul.f32.vlgmr.msrb.gmra.mxu1 %v3008_v23  ;;  %v276_v21 = vld [vmem:[#allocation2 + $0x230] sm:$0xff] }
  0xa7   : > { %937 = vmatpush.msra.mxu0 %v327_v24  ;;  %957 = vmatpush.msra.mxu1 %v391_v25  ;;  %v396_v22 = vld [vmem:[#allocation2 + $0x5f0] sm:$0xff]  ;;  %v269_v24 = vld [vmem:[#allocation2 + $0x1f8] sm:$0xff] }
  0xa8   : > { %977 = vmatpush.msra.mxu2 %v264_v26  ;;  %996 = vmatpush.msra.mxu3 %v332_v27  ;;  %v333_v25 = vld [vmem:[#allocation2 + $0x3f8] sm:$0xff]  ;;  %v272_v26 = vld [vmem:[#allocation2 + $0x210] sm:$0xff] }
  0xa9   : > { %938 = vmatpush.msra.mxu0 %v323_v28  ;;  %958 = vmatpush.msra.mxu1 %v387_v29  ;;  %v392_v27 = vld [vmem:[#allocation2 + $0x5d0] sm:$0xff]  ;;  %v265_v28 = vld [vmem:[#allocation2 + $0x1d8] sm:$0xff] }
  0xaa   : > { %978 = vmatpush.msra.mxu2 %v260_v30  ;;  %997 = vmatpush.msra.mxu3 %v328_v31  ;;  %v329_v29 = vld [vmem:[#allocation2 + $0x3d8] sm:$0xff]  ;;  %v388_v31 = vld [vmem:[#allocation2 + $0x5b0] sm:$0xff] }
  0xab   : > { %939 = vmatpush.msra.mxu0 %v319_v32  ;;  %959 = vmatpush.msra.mxu1 %v383_v33  ;;  %v397_v30 = vld [vmem:[#allocation2 + $0x5f8] sm:$0xff] }
  0xac   : > { %979 = vmatpush.msra.mxu2 %v256_v34  ;;  %998 = vmatpush.msra.mxu3 %v324_v35  ;;  %v261_v32 = vld [vmem:[#allocation2 + $0x1b8] sm:$0xff]  ;;  %v384_v35 = vld [vmem:[#allocation2 + $0x590] sm:$0xff] }
  0xad   : > { %940 = vmatpush.msra.mxu0 %v315_v36  ;;  %960 = vmatpush.msra.mxu1 %v379_v37  ;;  %v325_v33 = vld [vmem:[#allocation2 + $0x3b8] sm:$0xff] }
  0xae   : > { %980 = vmatpush.msra.mxu2 %v252_v38  ;;  %999 = vmatpush.msra.mxu3 %v320_v39  ;;  %v393_v34 = vld [vmem:[#allocation2 + $0x5d8] sm:$0xff]  ;;  %v380_v39 = vld [vmem:[#allocation2 + $0x570] sm:$0xff] }
  0xaf   : > { %941 = vmatpush.msra.mxu0 %v311_v40  ;;  %961 = vmatpush.msra.mxu1 %v375_v41  ;;  %v257_v36 = vld [vmem:[#allocation2 + $0x198] sm:$0xff] }
  0xb0   : > { %981 = vmatpush.msra.mxu2 %v248_v42  ;;  %1000 = vmatpush.msra.mxu3 %v316_v43  ;;  %v321_v37 = vld [vmem:[#allocation2 + $0x398] sm:$0xff]  ;;  %v376_v43 = vld [vmem:[#allocation2 + $0x550] sm:$0xff] }
  0xb1   : > { %942 = vmatpush.msra.mxu0 %v307_v44  ;;  %962 = vmatpush.msra.mxu1 %v371_v45  ;;  %v389_v38 = vld [vmem:[#allocation2 + $0x5b8] sm:$0xff] }
  0xb2   : > { %982 = vmatpush.msra.mxu2 %v244_v46  ;;  %1001 = vmatpush.msra.mxu3 %v312_v47  ;;  %v253_v40 = vld [vmem:[#allocation2 + $0x178] sm:$0xff]  ;;  %v372_v47 = vld [vmem:[#allocation2 + $0x530] sm:$0xff] }
  0xb3   : > { %943 = vmatpush.msra.mxu0 %v303_v48  ;;  %963 = vmatpush.msra.mxu1 %v367_v49  ;;  %v317_v41 = vld [vmem:[#allocation2 + $0x378] sm:$0xff] }
  0xb4   : > { %983 = vmatpush.msra.mxu2 %v240_v50  ;;  %1002 = vmatpush.msra.mxu3 %v308_v51  ;;  %v385_v42 = vld [vmem:[#allocation2 + $0x598] sm:$0xff]  ;;  %v368_v51 = vld [vmem:[#allocation2 + $0x510] sm:$0xff] }
  0xb5   : > { %944 = vmatpush.msra.mxu0 %v299_v52  ;;  %964 = vmatpush.msra.mxu1 %v363_v53  ;;  %v249_v44 = vld [vmem:[#allocation2 + $0x158] sm:$0xff] }
  0xb6   : > { %984 = vmatpush.msra.mxu2 %v236_v54  ;;  %1003 = vmatpush.msra.mxu3 %v304_v55  ;;  %v313_v45 = vld [vmem:[#allocation2 + $0x358] sm:$0xff]  ;;  %v364_v55 = vld [vmem:[#allocation2 + $0x4f0] sm:$0xff] }
  0xb7   : > { %945 = vmatpush.msra.mxu0 %v295_v56  ;;  %965 = vmatpush.msra.mxu1 %v359_v57  ;;  %v381_v46 = vld [vmem:[#allocation2 + $0x578] sm:$0xff] }
  0xb8   : > { %985 = vmatpush.msra.mxu2 %v232_v58  ;;  %1004 = vmatpush.msra.mxu3 %v300_v59  ;;  %v245_v48 = vld [vmem:[#allocation2 + $0x138] sm:$0xff]  ;;  %v360_v59 = vld [vmem:[#allocation2 + $0x4d0] sm:$0xff] }
  0xb9   : > { %946 = vmatpush.msra.mxu0 %v291_v60  ;;  %966 = vmatpush.msra.mxu1 %v355_v61  ;;  %v309_v49 = vld [vmem:[#allocation2 + $0x338] sm:$0xff] }
  0xba   : > { %986 = vmatpush.msra.mxu2 %v228_v62  ;;  %1005 = vmatpush.msra.mxu3 %v296_v63  ;;  %v377_v50 = vld [vmem:[#allocation2 + $0x558] sm:$0xff]  ;;  %v356_v63 = vld [vmem:[#allocation2 + $0x4b0] sm:$0xff] }
  0xbb   : > { %947 = vmatpush.msra.mxu0 %v287_v0  ;;  %967 = vmatpush.msra.mxu1 %v351_v1  ;;  %v241_v52 = vld [vmem:[#allocation2 + $0x118] sm:$0xff] }
  0xbc   : > { %987 = vmatpush.msra.mxu2 %v224_v2  ;;  %1006 = vmatpush.msra.mxu3 %v292_v3  ;;  %v305_v53 = vld [vmem:[#allocation2 + $0x318] sm:$0xff]  ;;  %v352_v3 = vld [vmem:[#allocation2 + $0x490] sm:$0xff] }
  0xbd   : > { %948 = vmatpush.msra.mxu0 %v283_v4  ;;  %968 = vmatpush.msra.mxu1 %v347_v5  ;;  %v373_v54 = vld [vmem:[#allocation2 + $0x538] sm:$0xff] }
  0xbe   : > { %988 = vmatpush.msra.mxu2 %v220_v6  ;;  %1007 = vmatpush.msra.mxu3 %v288_v7  ;;  %v237_v56 = vld [vmem:[#allocation2 + $0xf8] sm:$0xff] }
  0xbf   : > { %949 = vmatpush.msra.mxu0 %v279_v8  ;;  %969 = vmatpush.msra.mxu1 %v343_v9  ;;  %v301_v57 = vld [vmem:[#allocation2 + $0x2f8] sm:$0xff]  ;;  %v348_v9 = vld [vmem:[#allocation2 + $0x470] sm:$0xff] }
  0xc0   : > { %989 = vmatpush.msra.mxu2 %v216_v10  ;;  %1008 = vmatpush.msra.mxu3 %v284_v11  ;;  %v369_v58 = vld [vmem:[#allocation2 + $0x518] sm:$0xff] }
  0xc1   : > { %950 = vmatpush.msra.mxu0 %v275_v13  ;;  %970 = vmatpush.msra.mxu1 %v339_v15  ;;  %v233_v60 = vld [vmem:[#allocation2 + $0xd8] sm:$0xff] }
  0xc2   : > { %990 = vmatpush.msra.mxu2 %v212_v14  ;;  %1009 = vmatpush.msra.mxu3 %v280_v16  ;;  %v297_v61 = vld [vmem:[#allocation2 + $0x2d8] sm:$0xff]  ;;  %v344_v14 = vld [vmem:[#allocation2 + $0x450] sm:$0xff] }
  0xc3   : > { %951 = vmatpush.msra.mxu0 %v271_v17  ;;  %971 = vmatpush.msra.mxu1 %v335_v18  ;;  %v365_v62 = vld [vmem:[#allocation2 + $0x4f8] sm:$0xff] }
  0xc4   : > { %991 = vmatpush.msra.mxu2 %v208_v20  ;;  %1010 = vmatpush.msra.mxu3 %v276_v21  ;;  %v229_v0 = vld [vmem:[#allocation2 + $0xb8] sm:$0xff]  ;;  %v340_v20 = vld [vmem:[#allocation2 + $0x430] sm:$0xff] }
  0xc5   : > { %952 = vmatmul.f32.vlgmr.msra.gmra.mxu0 %v3008_v23  ;;  %992 = vmatmul.f32.vlgmr.msra.gmra.mxu2 %v3000_v12  ;;  %v293_v1 = vld [vmem:[#allocation2 + $0x2b8] sm:$0xff] }
  0xc6   : > { %1016 = vmatpush.msrb.mxu0 %v396_v22  ;;  %1036 = vmatpush.msrb.mxu1 %v269_v24  ;;  %v361_v2 = vld [vmem:[#allocation2 + $0x4d8] sm:$0xff] }
  0xc7   : > { %1056 = vmatpush.msrb.mxu2 %v333_v25  ;;  %1011 = vmatpush.msra.mxu3 %v272_v26  ;;  %v225_v4 = vld [vmem:[#allocation2 + $0x98] sm:$0xff]  ;;  %v336_v25 = vld [vmem:[#allocation2 + $0x410] sm:$0xff] }
  0xc8   : > { %972 = vmatmul.f32.vlgmr.msra.gmra.mxu1 %v3003_v19  ;;  %1012 = vmatmul.f32.vlgmr.msra.gmra.mxu3 %v3008_v23  ;;  %v289_v5 = vld [vmem:[#allocation2 + $0x298] sm:$0xff] }
  0xc9   : > { %1017 = vmatpush.msrb.mxu0 %v392_v27  ;;  %1037 = vmatpush.msrb.mxu1 %v265_v28  ;;  %v357_v8 = vld [vmem:[#allocation2 + $0x4b8] sm:$0xff] }
  0xca   : > { %1057 = vmatpush.msrb.mxu2 %v329_v29  ;;  %1076 = vmatpush.msrb.mxu3 %v397_v30  ;;  %v221_v11 = vld [vmem:[#allocation2 + $0x78] sm:$0xff] }
  0xcb   : > { %1018 = vmatpush.msrb.mxu0 %v388_v31  ;;  %1038 = vmatpush.msrb.mxu1 %v261_v32  ;;  %v285_v13 = vld [vmem:[#allocation2 + $0x278] sm:$0xff] }
  0xcc   : > { %1058 = vmatpush.msrb.mxu2 %v325_v33  ;;  %1077 = vmatpush.msrb.mxu3 %v393_v34  ;;  %v353_v15 = vld [vmem:[#allocation2 + $0x498] sm:$0xff]  ;;  %v1163_v33 = vld [vmem:[#allocation2 + $0xde0] sm:$0xff] }
  0xcd   : > { %1019 = vmatpush.msrb.mxu0 %v384_v35  ;;  %1039 = vmatpush.msrb.mxu1 %v257_v36  ;;  %v217_v16 = vld [vmem:[#allocation2 + $0x58] sm:$0xff]  ;;  %v1291_v34 = vld [vmem:[#allocation2 + $0x11e0] sm:$0xff] }
  0xce   : > { %1059 = vmatpush.msrb.mxu2 %v321_v37  ;;  %1078 = vmatpush.msrb.mxu3 %v389_v38  ;;  %v281_v17 = vld [vmem:[#allocation2 + $0x258] sm:$0xff]  ;;  %v1227_v37 = vld [vmem:[#allocation2 + $0xfe0] sm:$0xff] }
  0xcf   : > { %1020 = vmatpush.msrb.mxu0 %v380_v39  ;;  %1040 = vmatpush.msrb.mxu1 %v253_v40  ;;  %v633_v6 = vpop.f32.mrf.mxu0  ;;  %v349_v18 = vld [vmem:[#allocation2 + $0x478] sm:$0xff]  ;;  %v1159_v39 = vld [vmem:[#allocation2 + $0xdc0] sm:$0xff] }
  0xd0   : > { %1060 = vmatpush.msrb.mxu2 %v317_v41  ;;  %1079 = vmatpush.msrb.mxu3 %v385_v42  ;;  %v213_v21 = vld [vmem:[#allocation2 + $0x38] sm:$0xff]  ;;  %v1287_v41 = vld [vmem:[#allocation2 + $0x11c0] sm:$0xff]  ;;  %v1164_v42 = vld [vmem:[#allocation2 + $0xde8] sm:$0xff] }
  0xd1   : > { %1021 = vmatpush.msrb.mxu0 %v376_v43  ;;  %1041 = vmatpush.msrb.mxu1 %v249_v44  ;;  %v277_v22 = vld [vmem:[#allocation2 + $0x238] sm:$0xff]  ;;  %v1155_v43 = vld [vmem:[#allocation2 + $0xda0] sm:$0xff] }
  0xd2   : > { %1061 = vmatpush.msrb.mxu2 %v313_v45  ;;  %1080 = vmatpush.msrb.mxu3 %v381_v46  ;;  %v345_v24 = vld [vmem:[#allocation2 + $0x458] sm:$0xff]  ;;  %v1223_v44 = vld [vmem:[#allocation2 + $0xfc0] sm:$0xff]  ;;  %v1160_v46 = vld [vmem:[#allocation2 + $0xdc8] sm:$0xff] }
  0xd3   : > { %1022 = vmatpush.msrb.mxu0 %v372_v47  ;;  %1042 = vmatpush.msrb.mxu1 %v245_v48  ;;  %v209_v27 = vld [vmem:[#allocation2 + $0x18] sm:$0xff]  ;;  %v1283_v45 = vld [vmem:[#allocation2 + $0x11a0] sm:$0xff]  ;;  %v1156_v48 = vld [vmem:[#allocation2 + $0xda8] sm:$0xff] }
  0xd4   : > { %1062 = vmatpush.msrb.mxu2 %v309_v49  ;;  %1081 = vmatpush.msrb.mxu3 %v377_v50  ;;  %v273_v28 = vld [vmem:[#allocation2 + $0x218] sm:$0xff]  ;;  %v1279_v47 = vld [vmem:[#allocation2 + $0x1180] sm:$0xff] }
  0xd5   : > { %1023 = vmatpush.msrb.mxu0 %v368_v51  ;;  %1043 = vmatpush.msrb.mxu1 %v241_v52  ;;  %v341_v31 = vld [vmem:[#allocation2 + $0x438] sm:$0xff]  ;;  %v1147_v49 = vld [vmem:[#allocation2 + $0xd60] sm:$0xff]  ;;  %v1152_v52 = vld [vmem:[#allocation2 + $0xd88] sm:$0xff] }
  0xd6   : > { %1063 = vmatpush.msrb.mxu2 %v305_v53  ;;  %1082 = vmatpush.msrb.mxu3 %v373_v54  ;;  %v337_v36 = vld [vmem:[#allocation2 + $0x418] sm:$0xff]  ;;  %v1215_v50 = vld [vmem:[#allocation2 + $0xf80] sm:$0xff] }
  0xd7   : > { %1024 = vmatpush.msrb.mxu0 %v364_v55  ;;  %1044 = vmatpush.msrb.mxu1 %v237_v56  ;;  %v673_v26 = vpop.f32.mrf.mxu2  ;;  %v1275_v51 = vld [vmem:[#allocation2 + $0x1160] sm:$0xff]  ;;  %v1148_v55 = vld [vmem:[#allocation2 + $0xd68] sm:$0xff] }
  0xd8   : > { %1064 = vmatpush.msrb.mxu2 %v301_v57  ;;  %1083 = vmatpush.msrb.mxu3 %v369_v58  ;;  %v1211_v53 = vld [vmem:[#allocation2 + $0xf60] sm:$0xff] }
  0xd9   : > { %1025 = vmatpush.msrb.mxu0 %v360_v59  ;;  %1045 = vmatpush.msrb.mxu1 %v233_v60  ;;  %v693_v30 = vpop.f32.mrf.mxu3  ;;  %v1271_v54 = vld [vmem:[#allocation2 + $0x1140] sm:$0xff]  ;;  %v1144_v59 = vld [vmem:[#allocation2 + $0xd48] sm:$0xff] }
  0xda   : > { %1065 = vmatpush.msrb.mxu2 %v297_v61  ;;  %1084 = vmatpush.msrb.mxu3 %v365_v62  ;;  %v1139_v56 = vld [vmem:[#allocation2 + $0xd20] sm:$0xff] }
  0xdb   : > { %1026 = vmatpush.msrb.mxu0 %v356_v63  ;;  %1046 = vmatpush.msrb.mxu1 %v229_v0  ;;  %v1207_v57 = vld [vmem:[#allocation2 + $0xf40] sm:$0xff]  ;;  %v1140_v63 = vld [vmem:[#allocation2 + $0xd28] sm:$0xff] }
  0xdc   : > { %1066 = vmatpush.msrb.mxu2 %v293_v1  ;;  %1085 = vmatpush.msrb.mxu3 %v361_v2  ;;  %v1267_v58 = vld [vmem:[#allocation2 + $0x1120] sm:$0xff] }
  0xdd   : > { %1027 = vmatpush.msrb.mxu0 %v352_v3  ;;  %1047 = vmatpush.msrb.mxu1 %v225_v4  ;;  %v713_v32 = vpop.f32.mrf.mxu0  ;;  %v1135_v60 = vld [vmem:[#allocation2 + $0xd00] sm:$0xff]  ;;  %v1136_v3 = vld [vmem:[#allocation2 + $0xd08] sm:$0xff] }
  0xde   : > { %v653_v7 = vpop.f32.mrf.mxu1  ;;  %1067 = vmatpush.msrb.mxu2 %v289_v5  ;;  %1086 = vmatpush.msrb.mxu3 %v357_v8  ;;  %v714_v35 = vadd.f32 %v713_v32, %v693_v30  ;;  %v1203_v61 = vld [vmem:[#allocation2 + $0xf20] sm:$0xff] }
  0xdf   : > { %v654_v10 = vadd.f32 %v653_v7, %v633_v6  ;;  %1028 = vmatpush.msrb.mxu0 %v348_v9  ;;  %1048 = vmatpush.msrb.mxu1 %v221_v11  ;;  %v1263_v62 = vld [vmem:[#allocation2 + $0x1100] sm:$0xff]  ;;  %v1132_v7 = vld [vmem:[#allocation2 + $0xce8] sm:$0xff] }
  0xe0   : > { %1068 = vmatpush.msrb.mxu2 %v285_v13  ;;  %1087 = vmatpush.msrb.mxu3 %v353_v15  ;;  %v1131_v0 = vld [vmem:[#allocation2 + $0xce0] sm:$0xff]  ;;  %v1128_v11 = vld [vmem:[#allocation2 + $0xcc8] sm:$0xff] }
  0xe1   : > { %1029 = vmatpush.msrb.mxu0 %v344_v14  ;;  %1049 = vmatpush.msrb.mxu1 %v217_v16  ;;  %v3016_v29 = vadd.f32 %v673_v26, %v654_v10  ;;  %v1199_v1 = vld [vmem:[#allocation2 + $0xf00] sm:$0xff]  ;;  %v1124_v16 = vld [vmem:[#allocation2 + $0xca8] sm:$0xff] }
  0xe2   : > { %1069 = vmatpush.msrb.mxu2 %v281_v17  ;;  %1088 = vmatpush.msrb.mxu3 %v349_v18  ;;  %v1259_v2 = vld [vmem:[#allocation2 + $0x10e0] sm:$0xff] }
  0xe3   : > { %1030 = vmatpush.msrb.mxu0 %v340_v20  ;;  %1050 = vmatpush.msrb.mxu1 %v213_v21  ;;  %v1127_v4 = vld [vmem:[#allocation2 + $0xcc0] sm:$0xff]  ;;  %v1120_v21 = vld [vmem:[#allocation2 + $0xc88] sm:$0xff] }
  0xe4   : > { %1070 = vmatpush.msrb.mxu2 %v277_v22  ;;  %1089 = vmatpush.msrb.mxu3 %v345_v24  ;;  %v1195_v5 = vld [vmem:[#allocation2 + $0xee0] sm:$0xff]  ;;  %v1098_v22 = vld [vmem:[%s2970_s30 + $0x10] sm:$0xfc]  ;;  %v1101_v24 = vld [vmem:[%s2970_s30 + $0x28] sm:$0x3] }
  0xe5   : > { %1031 = vmatpush.msrb.mxu0 %v336_v25  ;;  %1051 = vmatpush.msrb.mxu1 %v209_v27  ;;  %v1255_v6 = vld [vmem:[#allocation2 + $0x10c0] sm:$0xff] }
  0xe6   : > { %1071 = vmatpush.msrb.mxu2 %v273_v28  ;;  %1090 = vmatpush.msrb.mxu3 %v341_v31  ;;  %v733_v38 = vpop.f32.mrf.mxu1  ;;  %v1123_v8 = vld [vmem:[#allocation2 + $0xca0] sm:$0xff]  ;;  %v1116_v28 = vld [vmem:[#allocation2 + $0xc68] sm:$0xff] }
  0xe7   : > { %1032 = vmatmul.f32.vlgmr.msrb.gmra.mxu0 %v3003_v19  ;;  %1052 = vmatmul.f32.vlgmr.msrb.gmra.mxu1 %v3000_v12  ;;  %v3021_v40 = vadd.f32 %v733_v38, %v714_v35  ;;  %v1151_v12 = vld [vmem:[#allocation2 + $0xd80] sm:$0xff]  ;;  %v1309_v35 = vrot.slane %v1101_v24, 2  ;;  %v1099_v38 = vld [vmem:[%s2970_s30 + $0x18] sm:$0x3]  ;;  %v1205_v24 = vld [vmem:[#allocation2 + $0xf30] sm:$0xff] }
  0xe8   : > { %1072 = vmatmul.f32.vlgmr.msrb.gmra.mxu2 %v3008_v23  ;;  %1314 = vmatpush.msra.mxu0 %v1163_v33  ;;  %v1219_v23 = vld [vmem:[#allocation2 + $0xfa0] sm:$0xff]  ;;  %v1112_v33 = vld [vmem:[#allocation2 + $0xc48] sm:$0xff] }
  0xe9   : > { %1354 = vmatpush.msra.mxu2 %v1291_v34  ;;  %1091 = vmatpush.msrb.mxu3 %v337_v36  ;;  %v1191_v9 = vld [vmem:[#allocation2 + $0xec0] sm:$0xff]  ;;  %v1308_v34 = vrot.slane %v1098_v22, 2  ;;  %v1137_v22 = vld [vmem:[#allocation2 + $0xd10] sm:$0xff] }
  0xea   : > { %1334 = vmatpush.msra.mxu1 %v1227_v37  ;;  %1092 = vmatmul.f32.vlgmr.msrb.gmra.mxu3 %v3003_v19  ;;  %v1143_v19 = vld [vmem:[#allocation2 + $0xd40] sm:$0xff] }
  0xeb   : > { %1315 = vmatpush.msra.mxu0 %v1159_v39  ;;  %1355 = vmatpush.msra.mxu2 %v1287_v41  ;;  %v1251_v10 = vld [vmem:[#allocation2 + $0x10a0] sm:$0xff]  ;;  %v1097_v41 = vld [vmem:[%s2970_s30 + $0x8] sm:$0xfc] }
  0xec   : > { %1374 = vmatpush.msra.mxu3 %v1164_v42  ;;  %1335 = vmatpush.msra.mxu1 %v1223_v44  ;;  %v1119_v13 = vld [vmem:[#allocation2 + $0xc80] sm:$0xff] }
  0xed   : > { %1316 = vmatpush.msra.mxu0 %v1155_v43  ;;  %1356 = vmatpush.msra.mxu2 %v1283_v45  ;;  %v1187_v15 = vld [vmem:[#allocation2 + $0xea0] sm:$0xff] }
  0xee   : > { %1375 = vmatpush.msra.mxu3 %v1160_v46  ;;  %1336 = vmatpush.msra.mxu1 %v1219_v23  ;;  %v1247_v14 = vld [vmem:[#allocation2 + $0x1080] sm:$0xff]  ;;  %v1108_v46 = vld [vmem:[#allocation2 + $0xc28] sm:$0xff]  ;;  %v3031_v23 = vsel %vm1301_vm1, %v1308_v34, %v1309_v35  ;;  %v1197_v34 = vld [vmem:[#allocation2 + $0xef0] sm:$0xff] }
  0xef   : > { %1317 = vmatpush.msra.mxu0 %v1151_v12  ;;  %1357 = vmatpush.msra.mxu2 %v1279_v47  ;;  %v1115_v17 = vld [vmem:[#allocation2 + $0xc60] sm:$0xff]  ;;  %v1228_v47 = vld [vmem:[#allocation2 + $0xfe8] sm:$0xff] }
  0xf0   : > { %1376 = vmatpush.msra.mxu3 %v1156_v48  ;;  %1337 = vmatpush.msra.mxu1 %v1215_v50  ;;  %v1183_v18 = vld [vmem:[#allocation2 + $0xe80] sm:$0xff]  ;;  %v1165_v50 = vld [vmem:[#allocation2 + $0xdf0] sm:$0xff]  ;;  %v1188_v35 = vld [vmem:[#allocation2 + $0xea8] sm:$0xff] }
  0xf1   : > { %1318 = vmatpush.msra.mxu0 %v1147_v49  ;;  %1358 = vmatpush.msra.mxu2 %v1275_v51  ;;  %v1243_v20 = vld [vmem:[#allocation2 + $0x1060] sm:$0xff]  ;;  %v1303_v49 = vrot.slane %v1099_v38, 2  ;;  %v1193_v38 = vld [vmem:[#allocation2 + $0xed0] sm:$0xff] }
  0xf2   : > { %1377 = vmatpush.msra.mxu3 %v1152_v52  ;;  %1338 = vmatpush.msra.mxu1 %v1211_v53  ;;  %v1111_v25 = vld [vmem:[#allocation2 + $0xc40] sm:$0xff]  ;;  %v1305_v52 = vrot.slane %v1097_v41, 2 }
  0xf3   : > { %1319 = vmatpush.msra.mxu0 %v1143_v19  ;;  %1359 = vmatpush.msra.mxu2 %v1271_v54  ;;  %v1179_v26 = vld [vmem:[#allocation2 + $0xe60] sm:$0xff]  ;;  %v1104_v54 = vld [vmem:[#allocation2 + $0xc08] sm:$0xff] }
  0xf4   : > { %1378 = vmatpush.msra.mxu3 %v1148_v55  ;;  %1339 = vmatpush.msra.mxu1 %v1207_v57  ;;  %v1239_v27 = vld [vmem:[#allocation2 + $0x1040] sm:$0xff]  ;;  %v1224_v55 = vld [vmem:[#allocation2 + $0xfc8] sm:$0xff] }
  0xf5   : > { %1320 = vmatpush.msra.mxu0 %v1139_v56  ;;  %1360 = vmatpush.msra.mxu2 %v1267_v58  ;;  %v1107_v30 = vld [vmem:[#allocation2 + $0xc20] sm:$0xff]  ;;  %v1292_v57 = vld [vmem:[#allocation2 + $0x11e8] sm:$0xff]  ;;  %v1161_v58 = vld [vmem:[#allocation2 + $0xdd0] sm:$0xff] }
  0xf6   : > { %1379 = vmatpush.msra.mxu3 %v1144_v59  ;;  %1340 = vmatpush.msra.mxu1 %v1203_v61  ;;  %v1175_v31 = vld [vmem:[#allocation2 + $0xe40] sm:$0xff]  ;;  %v1229_v59 = vld [vmem:[#allocation2 + $0xff0] sm:$0xff] }
  0xf7   : > { %1321 = vmatpush.msra.mxu0 %v1135_v60  ;;  %1361 = vmatpush.msra.mxu2 %v1263_v62  ;;  %v1235_v32 = vld [vmem:[#allocation2 + $0x1020] sm:$0xff]  ;;  %v1220_v62 = vld [vmem:[#allocation2 + $0xfa8] sm:$0xff] }
  0xf8   : > { %1380 = vmatpush.msra.mxu3 %v1140_v63  ;;  %1341 = vmatpush.msra.mxu1 %v1199_v1  ;;  %v1103_v36 = vld [vmem:[#allocation2 + $0xc00] sm:$0xff]  ;;  %v1288_v63 = vld [vmem:[#allocation2 + $0x11c8] sm:$0xff]  ;;  %v1225_v1 = vld [vmem:[#allocation2 + $0xfd0] sm:$0xff] }
  0xf9   : > { %1322 = vmatpush.msra.mxu0 %v1131_v0  ;;  %1362 = vmatpush.msra.mxu2 %v1259_v2  ;;  %v1096_v37 = vld [vmem:[%s2970_s30] sm:$0xfc]  ;;  %v1100_v42 = vld [vmem:[%s2970_s30 + $0x20] sm:$0x3]  ;;  %v1157_v0 = vld [vmem:[#allocation2 + $0xdb0] sm:$0xff] }
  0xfa   : > { %1381 = vmatpush.msra.mxu3 %v1136_v3  ;;  %1342 = vmatpush.msra.mxu1 %v1195_v5  ;;  %v1171_v39 = vld [vmem:[#allocation2 + $0xe20] sm:$0xff]  ;;  %v1302_v48 = vrot.slane %v1096_v37, 2  ;;  %v1306_v19 = vrot.slane %v1100_v42, 2  ;;  %v1216_v2 = vld [vmem:[#allocation2 + $0xf88] sm:$0xff]  ;;  %v1221_v5 = vld [vmem:[#allocation2 + $0xfb0] sm:$0xff] }
  0xfb   : > { %1323 = vmatpush.msra.mxu0 %v1127_v4  ;;  %1363 = vmatpush.msra.mxu2 %v1255_v6  ;;  %v1231_v45 = vld [vmem:[#allocation2 + $0x1000] sm:$0xff]  ;;  %v1284_v3 = vld [vmem:[#allocation2 + $0x11a8] sm:$0xff]  ;;  %v1153_v4 = vld [vmem:[#allocation2 + $0xd90] sm:$0xff] }
  0xfc   : > { %1382 = vmatpush.msra.mxu3 %v1132_v7  ;;  %1343 = vmatpush.msra.mxu1 %v1191_v9  ;;  %v1167_v51 = vld [vmem:[#allocation2 + $0xe00] sm:$0xff]  ;;  %v3037_v60 = vsel %vm1301_vm1, %v1302_v48, %v1303_v49  ;;  %v3040_v61 = vsel %vm1301_vm1, %v1305_v52, %v1306_v19  ;;  %v1212_v6 = vld [vmem:[#allocation2 + $0xf68] sm:$0xff]  ;;  %v1217_v9 = vld [vmem:[#allocation2 + $0xf90] sm:$0xff] }
  0xfd   : > { %1324 = vmatpush.msra.mxu0 %v1123_v8  ;;  %1364 = vmatpush.msra.mxu2 %v1251_v10  ;;  %v1280_v7 = vld [vmem:[#allocation2 + $0x1188] sm:$0xff]  ;;  %v1149_v8 = vld [vmem:[#allocation2 + $0xd70] sm:$0xff] }
  0xfe   : > { %1383 = vmatpush.msra.mxu3 %v1128_v11  ;;  %1344 = vmatpush.msra.mxu1 %v1187_v15  ;;  %v1208_v10 = vld [vmem:[#allocation2 + $0xf48] sm:$0xff]  ;;  %v1213_v15 = vld [vmem:[#allocation2 + $0xf70] sm:$0xff] }
  0xff   : > { %1325 = vmatpush.msra.mxu0 %v1119_v13  ;;  %1365 = vmatpush.msra.mxu2 %v1247_v14  ;;  %v1276_v11 = vld [vmem:[#allocation2 + $0x1168] sm:$0xff]  ;;  %v1145_v13 = vld [vmem:[#allocation2 + $0xd50] sm:$0xff] }
 0x100   : > { %1384 = vmatpush.msra.mxu3 %v1124_v16  ;;  %1345 = vmatpush.msra.mxu1 %v1183_v18  ;;  %v773_v44 = vpop.f32.mrf.mxu3  ;;  %v1204_v14 = vld [vmem:[#allocation2 + $0xf28] sm:$0xff]  ;;  %v1209_v18 = vld [vmem:[#allocation2 + $0xf50] sm:$0xff] }
 0x101   : > { %1326 = vmatpush.msra.mxu0 %v1115_v17  ;;  %1366 = vmatpush.msra.mxu2 %v1243_v20  ;;  %v1272_v16 = vld [vmem:[#allocation2 + $0x1148] sm:$0xff]  ;;  %v1141_v17 = vld [vmem:[#allocation2 + $0xd30] sm:$0xff] }
 0x102   : > { %1385 = vmatpush.msra.mxu3 %v1120_v21  ;;  %1346 = vmatpush.msra.mxu1 %v1179_v26  ;;  %v1200_v20 = vld [vmem:[#allocation2 + $0xf08] sm:$0xff]  ;;  %v1125_v37 = vld [vmem:[#allocation2 + $0xcb0] sm:$0xff] }
 0x103   : > { %1327 = vmatpush.msra.mxu0 %v1111_v25  ;;  %1367 = vmatpush.msra.mxu2 %v1239_v27  ;;  %v1268_v21 = vld [vmem:[#allocation2 + $0x1128] sm:$0xff]  ;;  %v1133_v27 = vld [vmem:[#allocation2 + $0xcf0] sm:$0xff] }
 0x104   : > { %1386 = vmatpush.msra.mxu3 %v1116_v28  ;;  %1347 = vmatpush.msra.mxu1 %v1175_v31  ;;  %v1196_v25 = vld [vmem:[#allocation2 + $0xee8] sm:$0xff]  ;;  %v1201_v28 = vld [vmem:[#allocation2 + $0xf10] sm:$0xff] }
 0x105   : > { %v753_v43 = vpop.f32.mrf.mxu2  ;;  %1328 = vmatpush.msra.mxu0 %v1107_v30  ;;  %1368 = vmatpush.msra.mxu2 %v1235_v32  ;;  %v1264_v26 = vld [vmem:[#allocation2 + $0x1108] sm:$0xff]  ;;  %v1129_v32 = vld [vmem:[#allocation2 + $0xcd0] sm:$0xff] }
 0x106   : > { %v774_v12 = vadd.f32 %v773_v44, %v753_v43  ;;  %1387 = vmatpush.msra.mxu3 %v1112_v33  ;;  %1348 = vmatpush.msra.mxu1 %v1171_v39  ;;  %v1192_v30 = vld [vmem:[#allocation2 + $0xec8] sm:$0xff]  ;;  %v1121_v43 = vld [vmem:[#allocation2 + $0xc90] sm:$0xff] }
 0x107   : > { %1329 = vmatpush.msra.mxu0 %v1103_v36  ;;  %v793_v53 = vpop.f32.mrf.mxu0  ;;  %1369 = vmatpush.msra.mxu2 %v1231_v45  ;;  %v1260_v31 = vld [vmem:[#allocation2 + $0x10e8] sm:$0xff]  ;;  %v1117_v48 = vld [vmem:[#allocation2 + $0xc70] sm:$0xff] }
 0x108   : > { %1388 = vmatpush.msra.mxu3 %v1108_v46  ;;  %v3033_v56 = vadd.f32 %v793_v53, %v774_v12  ;;  %1370 = vmatmul.f32.vlgmr.msra.gmra.mxu2 %v3031_v23  ;;  %v1256_v36 = vld [vmem:[#allocation2 + $0x10c8] sm:$0xff]  ;;  %v1189_v46 = vld [vmem:[#allocation2 + $0xeb0] sm:$0xff] }
 0x109   : > { %1394 = vmatpush.msrb.mxu0 %v1228_v47  ;;  %1434 = vmatpush.msrb.mxu2 %v1165_v50  ;;  %v1184_v39 = vld [vmem:[#allocation2 + $0xe88] sm:$0xff]  ;;  %v1185_v50 = vld [vmem:[#allocation2 + $0xe90] sm:$0xff] }
 0x10a   : > { %1349 = vmatpush.msra.mxu1 %v1167_v51  ;;  %1389 = vmatpush.msra.mxu3 %v1104_v54  ;;  %v1252_v42 = vld [vmem:[#allocation2 + $0x10a8] sm:$0xff]  ;;  %v1113_v54 = vld [vmem:[#allocation2 + $0xc50] sm:$0xff] }
 0x10b   : > { %1395 = vmatpush.msrb.mxu0 %v1224_v55  ;;  %1435 = vmatpush.msrb.mxu2 %v1161_v58  ;;  %v1180_v12 = vld [vmem:[#allocation2 + $0xe68] sm:$0xff]  ;;  %v1181_v55 = vld [vmem:[#allocation2 + $0xe70] sm:$0xff] }
 0x10c   : > { %1414 = vmatpush.msrb.mxu1 %v1292_v57  ;;  %1454 = vmatpush.msrb.mxu3 %v1229_v59  ;;  %v1248_v47 = vld [vmem:[#allocation2 + $0x1088] sm:$0xff] }
 0x10d   : > { %1330 = vmatmul.f32.vlgmr.msra.gmra.mxu0 %v3037_v60  ;;  %1350 = vmatmul.f32.vlgmr.msra.gmra.mxu1 %v3040_v61  ;;  %v1176_v51 = vld [vmem:[#allocation2 + $0xe48] sm:$0xff] }
 0x10e   : > { %1396 = vmatpush.msrb.mxu0 %v1220_v62  ;;  %1415 = vmatpush.msrb.mxu1 %v1288_v63  ;;  %v1244_v19 = vld [vmem:[#allocation2 + $0x1068] sm:$0xff]  ;;  %v1109_v62 = vld [vmem:[#allocation2 + $0xc30] sm:$0xff] }
 0x10f   : > { %1436 = vmatpush.msrb.mxu2 %v1157_v0  ;;  %1455 = vmatpush.msrb.mxu3 %v1225_v1  ;;  %v1172_v57 = vld [vmem:[#allocation2 + $0xe28] sm:$0xff]  ;;  %v1177_v63 = vld [vmem:[#allocation2 + $0xe50] sm:$0xff] }
 0x110   : > { %1397 = vmatpush.msrb.mxu0 %v1216_v2  ;;  %1416 = vmatpush.msrb.mxu1 %v1284_v3  ;;  %v1240_v58 = vld [vmem:[#allocation2 + $0x1048] sm:$0xff]  ;;  %v1173_v3 = vld [vmem:[#allocation2 + $0xe30] sm:$0xff] }
 0x111   : > { %1437 = vmatpush.msrb.mxu2 %v1153_v4  ;;  %1456 = vmatpush.msrb.mxu3 %v1221_v5  ;;  %v1168_v1 = vld [vmem:[#allocation2 + $0xe08] sm:$0xff]  ;;  %v1230_v5 = vld [vmem:[#allocation2 + $0xff8] sm:$0xff] }
 0x112   : > { %1398 = vmatpush.msrb.mxu0 %v1212_v6  ;;  %1417 = vmatpush.msrb.mxu1 %v1280_v7  ;;  %v1236_v2 = vld [vmem:[#allocation2 + $0x1028] sm:$0xff] }
 0x113   : > { %1438 = vmatpush.msrb.mxu2 %v1149_v8  ;;  %1457 = vmatpush.msrb.mxu3 %v1217_v9  ;;  %v1293_v8 = vld [vmem:[#allocation2 + $0x11f0] sm:$0xff]  ;;  %v1232_v9 = vld [vmem:[#allocation2 + $0x1008] sm:$0xff] }
 0x114   : > { %1399 = vmatpush.msrb.mxu0 %v1208_v10  ;;  %1418 = vmatpush.msrb.mxu1 %v1276_v11  ;;  %v1169_v11 = vld [vmem:[#allocation2 + $0xe10] sm:$0xff] }
 0x115   : > { %1439 = vmatpush.msrb.mxu2 %v1145_v13  ;;  %1458 = vmatpush.msrb.mxu3 %v1213_v15  ;;  %v1289_v13 = vld [vmem:[#allocation2 + $0x11d0] sm:$0xff]  ;;  %v1166_v15 = vld [vmem:[#allocation2 + $0xdf8] sm:$0xff] }
 0x116   : > { %1400 = vmatpush.msrb.mxu0 %v1204_v14  ;;  %1419 = vmatpush.msrb.mxu1 %v1272_v16  ;;  %v1226_v14 = vld [vmem:[#allocation2 + $0xfd8] sm:$0xff] }
 0x117   : > { %1440 = vmatpush.msrb.mxu2 %v1141_v17  ;;  %1459 = vmatpush.msrb.mxu3 %v1209_v18  ;;  %v1294_v16 = vld [vmem:[#allocation2 + $0x11f8] sm:$0xff]  ;;  %v1285_v17 = vld [vmem:[#allocation2 + $0x11b0] sm:$0xff] }
 0x118   : > { %1401 = vmatpush.msrb.mxu0 %v1200_v20  ;;  %1420 = vmatpush.msrb.mxu1 %v1268_v21  ;;  %v1162_v18 = vld [vmem:[#allocation2 + $0xdd8] sm:$0xff]  ;;  %v1281_v21 = vld [vmem:[#allocation2 + $0x1190] sm:$0xff] }
 0x119   : > { %1441 = vmatpush.msrb.mxu2 %v1137_v22  ;;  %1460 = vmatpush.msrb.mxu3 %v1205_v24  ;;  %v1290_v20 = vld [vmem:[#allocation2 + $0x11d8] sm:$0xff] }
 0x11a   : > { %1402 = vmatpush.msrb.mxu0 %v1196_v25  ;;  %v813_v33 = vpop.f32.mrf.mxu1  ;;  %1421 = vmatpush.msrb.mxu1 %v1264_v26  ;;  %v1158_v22 = vld [vmem:[#allocation2 + $0xdb8] sm:$0xff]  ;;  %v1277_v26 = vld [vmem:[#allocation2 + $0x1170] sm:$0xff] }
 0x11b   : > { %1442 = vmatpush.msrb.mxu2 %v1133_v27  ;;  %1461 = vmatpush.msrb.mxu3 %v1201_v28  ;;  %v853_v45 = vpop.f32.mrf.mxu3  ;;  %v1218_v24 = vld [vmem:[#allocation2 + $0xf98] sm:$0xff] }
 0x11c   : > { %1403 = vmatpush.msrb.mxu0 %v1192_v30  ;;  %1422 = vmatpush.msrb.mxu1 %v1260_v31  ;;  %v1286_v25 = vld [vmem:[#allocation2 + $0x11b8] sm:$0xff]  ;;  %v1273_v31 = vld [vmem:[#allocation2 + $0x1150] sm:$0xff] }
 0x11d   : > { %1443 = vmatpush.msrb.mxu2 %v1129_v32  ;;  %1462 = vmatpush.msrb.mxu3 %v1197_v34  ;;  %v1154_v27 = vld [vmem:[#allocation2 + $0xd98] sm:$0xff] }
 0x11e   : > { %v833_v41 = vpop.f32.mrf.mxu2  ;;  %1404 = vmatpush.msrb.mxu0 %v1188_v35  ;;  %1423 = vmatpush.msrb.mxu1 %v1256_v36  ;;  %v1214_v28 = vld [vmem:[#allocation2 + $0xf78] sm:$0xff]  ;;  %v1269_v35 = vld [vmem:[#allocation2 + $0x1130] sm:$0xff] }
 0x11f   : > { %v834_v44 = vadd.f32 %v833_v41, %v813_v33  ;;  %1444 = vmatpush.msrb.mxu2 %v1125_v37  ;;  %1463 = vmatpush.msrb.mxu3 %v1193_v38  ;;  %v1282_v30 = vld [vmem:[#allocation2 + $0x1198] sm:$0xff] }
 0x120   : > { %1405 = vmatpush.msrb.mxu0 %v1184_v39  ;;  %1424 = vmatpush.msrb.mxu1 %v1252_v42  ;;  %v873_v52 = vpop.f32.mrf.mxu0  ;;  %v1150_v32 = vld [vmem:[#allocation2 + $0xd78] sm:$0xff]  ;;  %v1265_v39 = vld [vmem:[#allocation2 + $0x1110] sm:$0xff] }
 0x121   : > { %v3044_v49 = vadd.f32 %v853_v45, %v834_v44  ;;  %1445 = vmatpush.msrb.mxu2 %v1121_v43  ;;  %1464 = vmatpush.msrb.mxu3 %v1189_v46  ;;  %v874_v53 = vadd.f32 %v873_v52, %v3016_v29  ;;  %v1105_v29 = vld [vmem:[#allocation2 + $0xc10] sm:$0xff]  ;;  %v1210_v33 = vld [vmem:[#allocation2 + $0xf58] sm:$0xff] }
 0x122   : > { %1406 = vmatpush.msrb.mxu0 %v1180_v12  ;;  %1425 = vmatpush.msrb.mxu1 %v1248_v47  ;;  %v1278_v34 = vld [vmem:[#allocation2 + $0x1178] sm:$0xff]  ;;  %v1261_v44 = vld [vmem:[#allocation2 + $0x10f0] sm:$0xff] }
 0x123   : > { %1446 = vmatpush.msrb.mxu2 %v1117_v48  ;;  %1465 = vmatpush.msrb.mxu3 %v1185_v50  ;;  %v893_v59 = vpop.f32.mrf.mxu1  ;;  %v1146_v36 = vld [vmem:[#allocation2 + $0xd58] sm:$0xff]  ;;  %v1257_v47 = vld [vmem:[#allocation2 + $0x10d0] sm:$0xff] }
 0x124   : > { %1407 = vmatpush.msrb.mxu0 %v1176_v51  ;;  %1390 = vmatmul.f32.vlgmr.msra.gmra.mxu3 %v3037_v60  ;;  %v894_v0 = vadd.f32 %v893_v59, %v874_v53  ;;  %v1206_v37 = vld [vmem:[#allocation2 + $0xf38] sm:$0xff]  ;;  %v1253_v52 = vld [vmem:[#allocation2 + $0x10b0] sm:$0xff] }
 0x125   : > { %1426 = vmatpush.msrb.mxu1 %v1244_v19  ;;  %1447 = vmatpush.msrb.mxu2 %v1113_v54  ;;  %v1274_v38 = vld [vmem:[#allocation2 + $0x1158] sm:$0xff] }
 0x126   : > { %1466 = vmatpush.msrb.mxu3 %v1181_v55  ;;  %1408 = vmatpush.msrb.mxu0 %v1172_v57  ;;  %v1142_v41 = vld [vmem:[#allocation2 + $0xd38] sm:$0xff]  ;;  %v1249_v55 = vld [vmem:[#allocation2 + $0x1090] sm:$0xff] }
 0x127   : > { %1427 = vmatpush.msrb.mxu1 %v1240_v58  ;;  %v913_v4 = vpop.f32.mrf.mxu2  ;;  %1448 = vmatpush.msrb.mxu2 %v1109_v62  ;;  %v933_v7 = vpop.f32.mrf.mxu3  ;;  %v1202_v42 = vld [vmem:[#allocation2 + $0xf18] sm:$0xff]  ;;  %v1245_v62 = vld [vmem:[#allocation2 + $0x1070] sm:$0xff] }
 0x128   : > { %1467 = vmatpush.msrb.mxu3 %v1177_v63  ;;  %v3048_v6 = vadd.f32 %v913_v4, %v894_v0  ;;  %1409 = vmatpush.msrb.mxu0 %v1168_v1  ;;  %v3051_v10 = vadd.f32 %v933_v7, %v3021_v40  ;;  %v1222_v40 = vld [vmem:[#allocation2 + $0xfb8] sm:$0xff] }
 0x129   : > { %1428 = vmatpush.msrb.mxu1 %v1236_v2  ;;  %1449 = vmatpush.msrb.mxu2 %v1105_v29  ;;  %v1270_v43 = vld [vmem:[#allocation2 + $0x1138] sm:$0xff] }
 0x12a   : > { %1468 = vmatpush.msrb.mxu3 %v1173_v3  ;;  %1410 = vmatmul.f32.vlgmr.msrb.gmra.mxu0 %v3040_v61  ;;  %v1138_v45 = vld [vmem:[#allocation2 + $0xd18] sm:$0xff]  ;;  %v1241_v3 = vld [vmem:[#allocation2 + $0x1050] sm:$0xff] }
 0x12b   : > { %1514 = vmatpush.msra.mxu2 %v1230_v5  ;;  %1474 = vmatpush.msra.mxu0 %v1293_v8  ;;  %v1198_v46 = vld [vmem:[#allocation2 + $0xef8] sm:$0xff] }
 0x12c   : > { %1429 = vmatpush.msrb.mxu1 %v1232_v9  ;;  %1469 = vmatpush.msrb.mxu3 %v1169_v11  ;;  %v1266_v12 = vld [vmem:[#allocation2 + $0x1118] sm:$0xff]  ;;  %v1237_v9 = vld [vmem:[#allocation2 + $0x1030] sm:$0xff] }
 0x12d   : > { %1430 = vmatmul.f32.vlgmr.msrb.gmra.mxu1 %v3031_v23  ;;  %1475 = vmatpush.msra.mxu0 %v1289_v13  ;;  %v1134_v48 = vld [vmem:[#allocation2 + $0xcf8] sm:$0xff] }
 0x12e   : > { %1494 = vmatpush.msra.mxu1 %v1166_v15  ;;  %1515 = vmatpush.msra.mxu2 %v1226_v14  ;;  %v1194_v50 = vld [vmem:[#allocation2 + $0xed8] sm:$0xff]  ;;  %v1233_v14 = vld [vmem:[#allocation2 + $0x1010] sm:$0xff] }
 0x12f   : > { %1534 = vmatpush.msra.mxu3 %v1294_v16  ;;  %1476 = vmatpush.msra.mxu0 %v1285_v17  ;;  %v1262_v51 = vld [vmem:[#allocation2 + $0x10f8] sm:$0xff] }
 0x130   : > { %1495 = vmatpush.msra.mxu1 %v1162_v18  ;;  %1516 = vmatpush.msra.mxu2 %v1222_v40  ;;  %v1130_v19 = vld [vmem:[#allocation2 + $0xcd8] sm:$0xff] }
 0x131   : > { %1535 = vmatpush.msra.mxu3 %v1290_v20  ;;  %1477 = vmatpush.msra.mxu0 %v1281_v21  ;;  %v1190_v53 = vld [vmem:[#allocation2 + $0xeb8] sm:$0xff]  ;;  %v1625_v21 = vld [vmem:[#allocation2 + $0x13e0] sm:$0xff] }
 0x132   : > { %1496 = vmatpush.msra.mxu1 %v1158_v22  ;;  %1517 = vmatpush.msra.mxu2 %v1218_v24  ;;  %v1258_v54 = vld [vmem:[#allocation2 + $0x10d8] sm:$0xff]  ;;  %v1753_v22 = vld [vmem:[#allocation2 + $0x17e0] sm:$0xff] }
 0x133   : > { %1536 = vmatpush.msra.mxu3 %v1286_v25  ;;  %1478 = vmatpush.msra.mxu0 %v1277_v26  ;;  %v1126_v57 = vld [vmem:[#allocation2 + $0xcb8] sm:$0xff] }
 0x134   : > { %1497 = vmatpush.msra.mxu1 %v1154_v27  ;;  %1518 = vmatpush.msra.mxu2 %v1214_v28  ;;  %v1186_v58 = vld [vmem:[#allocation2 + $0xe98] sm:$0xff]  ;;  %v1621_v27 = vld [vmem:[#allocation2 + $0x13c0] sm:$0xff] }
 0x135   : > { %1537 = vmatpush.msra.mxu3 %v1282_v30  ;;  %1479 = vmatpush.msra.mxu0 %v1273_v31  ;;  %v1254_v59 = vld [vmem:[#allocation2 + $0x10b8] sm:$0xff]  ;;  %v1689_v30 = vld [vmem:[#allocation2 + $0x15e0] sm:$0xff]  ;;  %v1626_v31 = vld [vmem:[#allocation2 + $0x13e8] sm:$0xff] }
 0x136   : > { %1498 = vmatpush.msra.mxu1 %v1150_v32  ;;  %1519 = vmatpush.msra.mxu2 %v1210_v33  ;;  %v1122_v63 = vld [vmem:[#allocation2 + $0xc98] sm:$0xff]  ;;  %v1617_v32 = vld [vmem:[#allocation2 + $0x13a0] sm:$0xff] }
 0x137   : > { %1538 = vmatpush.msra.mxu3 %v1278_v34  ;;  %1480 = vmatpush.msra.mxu0 %v1269_v35  ;;  %v1182_v1 = vld [vmem:[#allocation2 + $0xe78] sm:$0xff]  ;;  %v1685_v33 = vld [vmem:[#allocation2 + $0x15c0] sm:$0xff]  ;;  %v1622_v35 = vld [vmem:[#allocation2 + $0x13c8] sm:$0xff] }
 0x138   : > { %1499 = vmatpush.msra.mxu1 %v1146_v36  ;;  %1520 = vmatpush.msra.mxu2 %v1206_v37  ;;  %v1250_v2 = vld [vmem:[#allocation2 + $0x1098] sm:$0xff]  ;;  %v1745_v34 = vld [vmem:[#allocation2 + $0x17a0] sm:$0xff] }
 0x139   : > { %1539 = vmatpush.msra.mxu3 %v1274_v38  ;;  %1481 = vmatpush.msra.mxu0 %v1265_v39  ;;  %v1118_v4 = vld [vmem:[#allocation2 + $0xc78] sm:$0xff]  ;;  %v1681_v36 = vld [vmem:[#allocation2 + $0x15a0] sm:$0xff]  ;;  %v1618_v38 = vld [vmem:[#allocation2 + $0x13a8] sm:$0xff] }
 0x13a   : > { %1500 = vmatpush.msra.mxu1 %v1142_v41  ;;  %1521 = vmatpush.msra.mxu2 %v1202_v42  ;;  %v1178_v5 = vld [vmem:[#allocation2 + $0xe58] sm:$0xff]  ;;  %v1741_v37 = vld [vmem:[#allocation2 + $0x1780] sm:$0xff]  ;;  %v1614_v42 = vld [vmem:[#allocation2 + $0x1388] sm:$0xff] }
 0x13b   : > { %1540 = vmatpush.msra.mxu3 %v1270_v43  ;;  %1482 = vmatpush.msra.mxu0 %v1261_v44  ;;  %v1246_v7 = vld [vmem:[#allocation2 + $0x1078] sm:$0xff]  ;;  %v1609_v39 = vld [vmem:[#allocation2 + $0x1360] sm:$0xff] }
 0x13c   : > { %1501 = vmatpush.msra.mxu1 %v1138_v45  ;;  %1522 = vmatpush.msra.mxu2 %v1198_v46  ;;  %v1114_v11 = vld [vmem:[#allocation2 + $0xc58] sm:$0xff]  ;;  %v1677_v41 = vld [vmem:[#allocation2 + $0x1580] sm:$0xff]  ;;  %v1610_v46 = vld [vmem:[#allocation2 + $0x1368] sm:$0xff] }
 0x13d   : > { %1541 = vmatpush.msra.mxu3 %v1266_v12  ;;  %1483 = vmatpush.msra.mxu0 %v1257_v47  ;;  %v1242_v15 = vld [vmem:[#allocation2 + $0x1058] sm:$0xff]  ;;  %v1605_v43 = vld [vmem:[#allocation2 + $0x1340] sm:$0xff] }
 0x13e   : > { %1502 = vmatpush.msra.mxu1 %v1134_v48  ;;  %1523 = vmatpush.msra.mxu2 %v1194_v50  ;;  %v1110_v16 = vld [vmem:[#allocation2 + $0xc38] sm:$0xff]  ;;  %v1673_v44 = vld [vmem:[#allocation2 + $0x1560] sm:$0xff]  ;;  %v1606_v48 = vld [vmem:[#allocation2 + $0x1348] sm:$0xff] }
 0x13f   : > { %1542 = vmatpush.msra.mxu3 %v1262_v51  ;;  %1484 = vmatpush.msra.mxu0 %v1253_v52  ;;  %v1170_v17 = vld [vmem:[#allocation2 + $0xe18] sm:$0xff]  ;;  %v1733_v45 = vld [vmem:[#allocation2 + $0x1740] sm:$0xff] }
 0x140   : > { %1503 = vmatpush.msra.mxu1 %v1130_v19  ;;  %1524 = vmatpush.msra.mxu2 %v1190_v53  ;;  %v1238_v18 = vld [vmem:[#allocation2 + $0x1038] sm:$0xff]  ;;  %v1601_v12 = vld [vmem:[#allocation2 + $0x1320] sm:$0xff]  ;;  %v1602_v19 = vld [vmem:[#allocation2 + $0x1328] sm:$0xff] }
 0x141   : > { %1543 = vmatpush.msra.mxu3 %v1258_v54  ;;  %1485 = vmatpush.msra.mxu0 %v1249_v55  ;;  %v1106_v24 = vld [vmem:[#allocation2 + $0xc18] sm:$0xff]  ;;  %v1669_v47 = vld [vmem:[#allocation2 + $0x1540] sm:$0xff] }
 0x142   : > { %1504 = vmatpush.msra.mxu1 %v1126_v57  ;;  %v953_v0 = vpop.f32.mrf.mxu0  ;;  %1525 = vmatpush.msra.mxu2 %v1186_v58  ;;  %v1234_v25 = vld [vmem:[#allocation2 + $0x1018] sm:$0xff]  ;;  %v1597_v50 = vld [vmem:[#allocation2 + $0x1300] sm:$0xff]  ;;  %v1598_v57 = vld [vmem:[#allocation2 + $0x1308] sm:$0xff] }
 0x143   : > { %1544 = vmatpush.msra.mxu3 %v1254_v59  ;;  %v954_v29 = vadd.f32 %v953_v0, %v3051_v10  ;;  %1450 = vmatmul.f32.vlgmr.msrb.gmra.mxu2 %v3037_v60  ;;  %v1174_v10 = vld [vmem:[#allocation2 + $0xe38] sm:$0xff]  ;;  %v1665_v51 = vld [vmem:[#allocation2 + $0x1520] sm:$0xff] }
 0x144   : > { %1470 = vmatmul.f32.vlgmr.msrb.gmra.mxu3 %v3040_v61  ;;  %1486 = vmatpush.msra.mxu0 %v1245_v62  ;;  %v1725_v52 = vld [vmem:[#allocation2 + $0x1700] sm:$0xff] }
 0x145   : > { %1505 = vmatpush.msra.mxu1 %v1122_v63  ;;  %v973_v8 = vpop.f32.mrf.mxu1  ;;  %1526 = vmatpush.msra.mxu2 %v1182_v1  ;;  %v1593_v53 = vld [vmem:[#allocation2 + $0x12e0] sm:$0xff]  ;;  %v1594_v63 = vld [vmem:[#allocation2 + $0x12e8] sm:$0xff] }
 0x146   : > { %1545 = vmatpush.msra.mxu3 %v1250_v2  ;;  %v3058_v13 = vadd.f32 %v973_v8, %v954_v29  ;;  %1487 = vmatpush.msra.mxu0 %v1241_v3  ;;  %v1661_v54 = vld [vmem:[#allocation2 + $0x1500] sm:$0xff]  ;;  %v1590_v29 = vld [vmem:[#allocation2 + $0x12c8] sm:$0xff] }
 0x147   : > { %1506 = vmatpush.msra.mxu1 %v1118_v4  ;;  %1527 = vmatpush.msra.mxu2 %v1178_v5  ;;  %v1721_v55 = vld [vmem:[#allocation2 + $0x16e0] sm:$0xff] }
 0x148   : > { %1546 = vmatpush.msra.mxu3 %v1246_v7  ;;  %1488 = vmatpush.msra.mxu0 %v1237_v9  ;;  %v993_v40 = vpop.f32.mrf.mxu2  ;;  %v1589_v58 = vld [vmem:[#allocation2 + $0x12c0] sm:$0xff]  ;;  %v1586_v7 = vld [vmem:[#allocation2 + $0x12a8] sm:$0xff] }
 0x149   : > { %1507 = vmatpush.msra.mxu1 %v1114_v11  ;;  %1528 = vmatpush.msra.mxu2 %v1174_v10  ;;  %v994_v20 = vadd.f32 %v993_v40, %v3033_v56  ;;  %v1749_v56 = vld [vmem:[#allocation2 + $0x17c0] sm:$0xff] }
 0x14a   : > { %1547 = vmatpush.msra.mxu3 %v1242_v15  ;;  %1489 = vmatpush.msra.mxu0 %v1233_v14  ;;  %v1657_v59 = vld [vmem:[#allocation2 + $0x14e0] sm:$0xff]  ;;  %v1582_v15 = vld [vmem:[#allocation2 + $0x1288] sm:$0xff]  ;;  %v1560_v14 = vld [vmem:[%s2970_s30 + $0x10] sm:$0xf8] }
 0x14b   : > { %1508 = vmatpush.msra.mxu1 %v1110_v16  ;;  %1529 = vmatpush.msra.mxu2 %v1170_v17  ;;  %v1013_v26 = vpop.f32.mrf.mxu3  ;;  %v1717_v62 = vld [vmem:[#allocation2 + $0x16c0] sm:$0xff]  ;;  %v1563_v16 = vld [vmem:[%s2970_s30 + $0x28] sm:$0x7] }
 0x14c   : > { %1548 = vmatpush.msra.mxu3 %v1238_v18  ;;  %1490 = vmatmul.f32.vlgmr.msra.gmra.mxu0 %v3031_v23  ;;  %v3063_v28 = vadd.f32 %v1013_v26, %v994_v20  ;;  %v1585_v0 = vld [vmem:[#allocation2 + $0x12a0] sm:$0xff] }
 0x14d   : > { %1530 = vmatmul.f32.vlgmr.msra.gmra.mxu2 %v3040_v61  ;;  %1776 = vmatpush.msrb.mxu0 %v1625_v21  ;;  %v1613_v61 = vld [vmem:[#allocation2 + $0x1380] sm:$0xff] }
 0x14e   : > { %1816 = vmatpush.msrb.mxu2 %v1753_v22  ;;  %1509 = vmatpush.msra.mxu1 %v1106_v24  ;;  %v1653_v1 = vld [vmem:[#allocation2 + $0x14c0] sm:$0xff]  ;;  %v1578_v24 = vld [vmem:[#allocation2 + $0x1268] sm:$0xff] }
 0x14f   : > { %1549 = vmatpush.msra.mxu3 %v1234_v25  ;;  %1777 = vmatpush.msrb.mxu0 %v1621_v27  ;;  %v1713_v2 = vld [vmem:[#allocation2 + $0x16a0] sm:$0xff] }
 0x150   : > { %1550 = vmatmul.f32.vlgmr.msra.gmra.mxu3 %v3031_v23  ;;  %1796 = vmatpush.msrb.mxu1 %v1689_v30  ;;  %v1737_v23 = vld [vmem:[#allocation2 + $0x1760] sm:$0xff]  ;;  %v1770_v30 = vrot.slane %v1560_v14, 3  ;;  %v1662_v14 = vld [vmem:[#allocation2 + $0x1508] sm:$0xff] }
 0x151   : > { %1817 = vmatpush.msrb.mxu2 %v1749_v56  ;;  %1836 = vmatpush.msrb.mxu3 %v1626_v31  ;;  %v1581_v3 = vld [vmem:[#allocation2 + $0x1280] sm:$0xff]  ;;  %v1771_v56 = vrot.slane %v1563_v16, 3  ;;  %v1730_v16 = vld [vmem:[#allocation2 + $0x1728] sm:$0xff] }
 0x152   : > { %1778 = vmatpush.msrb.mxu0 %v1617_v32  ;;  %1797 = vmatpush.msrb.mxu1 %v1685_v33  ;;  %v1649_v4 = vld [vmem:[#allocation2 + $0x14a0] sm:$0xff]  ;;  %v1561_v32 = vld [vmem:[%s2970_s30 + $0x18] sm:$0x7] }
 0x153   : > { %1818 = vmatpush.msrb.mxu2 %v1745_v34  ;;  %1837 = vmatpush.msrb.mxu3 %v1622_v35  ;;  %v1709_v5 = vld [vmem:[#allocation2 + $0x1680] sm:$0xff]  ;;  %v1559_v34 = vld [vmem:[%s2970_s30 + $0x8] sm:$0xf8] }
 0x154   : > { %1510 = vmatmul.f32.vlgmr.msra.gmra.mxu1 %v3037_v60  ;;  %1779 = vmatpush.msrb.mxu0 %v1613_v61  ;;  %v1729_v60 = vld [vmem:[#allocation2 + $0x1720] sm:$0xff] }
 0x155   : > { %1798 = vmatpush.msrb.mxu1 %v1681_v36  ;;  %1819 = vmatpush.msrb.mxu2 %v1741_v37  ;;  %v1577_v8 = vld [vmem:[#allocation2 + $0x1260] sm:$0xff]  ;;  %v1570_v36 = vld [vmem:[#allocation2 + $0x1228] sm:$0xff] }
 0x156   : > { %1838 = vmatpush.msrb.mxu3 %v1618_v38  ;;  %1780 = vmatpush.msrb.mxu0 %v1609_v39  ;;  %v1645_v9 = vld [vmem:[#allocation2 + $0x1480] sm:$0xff]  ;;  %v3078_v38 = vsel %vm1763_vm2, %v1770_v30, %v1771_v56  ;;  %v1690_v39 = vld [vmem:[#allocation2 + $0x15e8] sm:$0xff] }
 0x157   : > { %1799 = vmatpush.msrb.mxu1 %v1677_v41  ;;  %1820 = vmatpush.msrb.mxu2 %v1737_v23  ;;  %v1705_v11 = vld [vmem:[#allocation2 + $0x1660] sm:$0xff]  ;;  %v1765_v23 = vrot.slane %v1561_v32, 3  ;;  %v1650_v30 = vld [vmem:[#allocation2 + $0x14a8] sm:$0xff] }
 0x158   : > { %1839 = vmatpush.msrb.mxu3 %v1614_v42  ;;  %1781 = vmatpush.msrb.mxu0 %v1605_v43  ;;  %v1573_v40 = vld [vmem:[#allocation2 + $0x1240] sm:$0xff]  ;;  %v1627_v43 = vld [vmem:[#allocation2 + $0x13f0] sm:$0xff]  ;;  %v1718_v56 = vld [vmem:[#allocation2 + $0x16c8] sm:$0xff] }
 0x159   : > { %1800 = vmatpush.msrb.mxu1 %v1673_v44  ;;  %1821 = vmatpush.msrb.mxu2 %v1733_v45  ;;  %v1641_v20 = vld [vmem:[#allocation2 + $0x1460] sm:$0xff]  ;;  %v1767_v45 = vrot.slane %v1559_v34, 3  ;;  %v1646_v32 = vld [vmem:[#allocation2 + $0x1488] sm:$0xff]  ;;  %v1583_v34 = vld [vmem:[#allocation2 + $0x1290] sm:$0xff] }
 0x15a   : > { %1840 = vmatpush.msrb.mxu3 %v1610_v46  ;;  %1782 = vmatpush.msrb.mxu0 %v1601_v12  ;;  %v1701_v22 = vld [vmem:[#allocation2 + $0x1640] sm:$0xff]  ;;  %v1566_v12 = vld [vmem:[#allocation2 + $0x1208] sm:$0xff] }
 0x15b   : > { %1801 = vmatpush.msrb.mxu1 %v1669_v47  ;;  %1822 = vmatpush.msrb.mxu2 %v1729_v60  ;;  %v1569_v25 = vld [vmem:[#allocation2 + $0x1220] sm:$0xff]  ;;  %v1686_v47 = vld [vmem:[#allocation2 + $0x15c8] sm:$0xff] }
 0x15c   : > { %1841 = vmatpush.msrb.mxu3 %v1606_v48  ;;  %1783 = vmatpush.msrb.mxu0 %v1597_v50  ;;  %v1637_v26 = vld [vmem:[#allocation2 + $0x1440] sm:$0xff]  ;;  %v1754_v48 = vld [vmem:[#allocation2 + $0x17e8] sm:$0xff]  ;;  %v1623_v50 = vld [vmem:[#allocation2 + $0x13d0] sm:$0xff] }
 0x15d   : > { %1802 = vmatpush.msrb.mxu1 %v1665_v51  ;;  %1823 = vmatpush.msrb.mxu2 %v1725_v52  ;;  %v1697_v27 = vld [vmem:[#allocation2 + $0x1620] sm:$0xff]  ;;  %v1691_v52 = vld [vmem:[#allocation2 + $0x15f0] sm:$0xff] }
 0x15e   : > { %1842 = vmatpush.msrb.mxu3 %v1602_v19  ;;  %1784 = vmatpush.msrb.mxu0 %v1593_v53  ;;  %v1565_v31 = vld [vmem:[#allocation2 + $0x1200] sm:$0xff] }
 0x15f   : > { %1803 = vmatpush.msrb.mxu1 %v1661_v54  ;;  %1824 = vmatpush.msrb.mxu2 %v1721_v55  ;;  %v1633_v33 = vld [vmem:[#allocation2 + $0x1420] sm:$0xff]  ;;  %v1682_v54 = vld [vmem:[#allocation2 + $0x15a8] sm:$0xff] }
 0x160   : > { %1843 = vmatpush.msrb.mxu3 %v1598_v57  ;;  %1785 = vmatpush.msrb.mxu0 %v1589_v58  ;;  %v1562_v35 = vld [vmem:[%s2970_s30 + $0x20] sm:$0x7]  ;;  %v1750_v55 = vld [vmem:[#allocation2 + $0x17c8] sm:$0xff]  ;;  %v1619_v57 = vld [vmem:[#allocation2 + $0x13b0] sm:$0xff] }
 0x161   : > { %1804 = vmatpush.msrb.mxu1 %v1657_v59  ;;  %1825 = vmatpush.msrb.mxu2 %v1717_v62  ;;  %v1693_v61 = vld [vmem:[#allocation2 + $0x1600] sm:$0xff]  ;;  %v1768_v46 = vrot.slane %v1562_v35, 3  ;;  %v1687_v58 = vld [vmem:[#allocation2 + $0x15d0] sm:$0xff]  ;;  %v1678_v59 = vld [vmem:[#allocation2 + $0x1588] sm:$0xff] }
 0x162   : > { %1844 = vmatpush.msrb.mxu3 %v1594_v63  ;;  %1786 = vmatpush.msrb.mxu0 %v1585_v0  ;;  %v1629_v44 = vld [vmem:[#allocation2 + $0x1400] sm:$0xff]  ;;  %v1746_v62 = vld [vmem:[#allocation2 + $0x17a8] sm:$0xff]  ;;  %v1615_v63 = vld [vmem:[#allocation2 + $0x1390] sm:$0xff] }
 0x163   : > { %1805 = vmatpush.msrb.mxu1 %v1653_v1  ;;  %1826 = vmatpush.msrb.mxu2 %v1713_v2  ;;  %v3087_v53 = vsel %vm1763_vm2, %v1767_v45, %v1768_v46  ;;  %v1683_v0 = vld [vmem:[#allocation2 + $0x15b0] sm:$0xff]  ;;  %v1674_v1 = vld [vmem:[#allocation2 + $0x1568] sm:$0xff] }
 0x164   : > { %1845 = vmatpush.msrb.mxu3 %v1590_v29  ;;  %v1033_v10 = vpop.f32.mrf.mxu0  ;;  %1787 = vmatpush.msrb.mxu0 %v1581_v3  ;;  %v1053_v18 = vpop.f32.mrf.mxu1  ;;  %v1742_v2 = vld [vmem:[#allocation2 + $0x1788] sm:$0xff]  ;;  %v1611_v29 = vld [vmem:[#allocation2 + $0x1370] sm:$0xff] }
 0x165   : > { %1806 = vmatpush.msrb.mxu1 %v1649_v4  ;;  %v3070_v17 = vadd.f32 %v1033_v10, %v3063_v28  ;;  %1827 = vmatpush.msrb.mxu2 %v1709_v5  ;;  %v1054_v21 = vadd.f32 %v1053_v18, %v3044_v49  ;;  %v1574_v28 = vld [vmem:[#allocation2 + $0x1248] sm:$0xff]  ;;  %v1558_v49 = vld [vmem:[%s2970_s30] sm:$0xf8]  ;;  %v1679_v3 = vld [vmem:[#allocation2 + $0x1590] sm:$0xff] }
 0x166   : > { %1846 = vmatpush.msrb.mxu3 %v1586_v7  ;;  %1788 = vmatpush.msrb.mxu0 %v1577_v8  ;;  %v1764_v41 = vrot.slane %v1558_v49, 3  ;;  %v1670_v4 = vld [vmem:[#allocation2 + $0x1548] sm:$0xff]  ;;  %v1607_v7 = vld [vmem:[#allocation2 + $0x1350] sm:$0xff] }
 0x167   : > { %1807 = vmatpush.msrb.mxu1 %v1645_v9  ;;  %1828 = vmatpush.msrb.mxu2 %v1705_v11  ;;  %v1738_v5 = vld [vmem:[#allocation2 + $0x1768] sm:$0xff]  ;;  %v1675_v8 = vld [vmem:[#allocation2 + $0x1570] sm:$0xff] }
 0x168   : > { %1847 = vmatpush.msrb.mxu3 %v1582_v15  ;;  %1789 = vmatpush.msrb.mxu0 %v1573_v40  ;;  %v3084_v19 = vsel %vm1763_vm2, %v1764_v41, %v1765_v23  ;;  %v1666_v9 = vld [vmem:[#allocation2 + $0x1528] sm:$0xff]  ;;  %v1603_v10 = vld [vmem:[#allocation2 + $0x1330] sm:$0xff] }
 0x169   : > { %1808 = vmatpush.msrb.mxu1 %v1641_v20  ;;  %1829 = vmatpush.msrb.mxu2 %v1701_v22  ;;  %v1734_v11 = vld [vmem:[#allocation2 + $0x1748] sm:$0xff]  ;;  %v1671_v15 = vld [vmem:[#allocation2 + $0x1550] sm:$0xff] }
 0x16a   : > { %1848 = vmatpush.msrb.mxu3 %v1578_v24  ;;  %1790 = vmatpush.msrb.mxu0 %v1569_v25  ;;  %v1599_v18 = vld [vmem:[#allocation2 + $0x1310] sm:$0xff]  ;;  %v1658_v20 = vld [vmem:[#allocation2 + $0x14e8] sm:$0xff] }
 0x16b   : > { %1809 = vmatpush.msrb.mxu1 %v1637_v26  ;;  %v1073_v37 = vpop.f32.mrf.mxu2  ;;  %1830 = vmatpush.msrb.mxu2 %v1697_v27  ;;  %v1667_v40 = vld [vmem:[#allocation2 + $0x1530] sm:$0xff]  ;;  %v1654_v25 = vld [vmem:[#allocation2 + $0x14c8] sm:$0xff] }
 0x16c   : > { %1849 = vmatpush.msrb.mxu3 %v1574_v28  ;;  %v1074_v42 = vadd.f32 %v1073_v37, %v1054_v21  ;;  %1791 = vmatpush.msrb.mxu0 %v1565_v31  ;;  %v1726_v21 = vld [vmem:[#allocation2 + $0x1708] sm:$0xff]  ;;  %v1595_v22 = vld [vmem:[#allocation2 + $0x12f0] sm:$0xff] }
 0x16d   : > { %1810 = vmatpush.msrb.mxu1 %v1633_v33  ;;  %1831 = vmatpush.msrb.mxu2 %v1693_v61  ;;  %v1093_v60 = vpop.f32.mrf.mxu3  ;;  %v1663_v24 = vld [vmem:[#allocation2 + $0x1510] sm:$0xff]  ;;  %v1722_v26 = vld [vmem:[#allocation2 + $0x16e8] sm:$0xff] }
 0x16e   : > { %1850 = vmatpush.msrb.mxu3 %v1570_v36  ;;  %1832 = vmatmul.f32.vlgmr.msrb.gmra.mxu2 %v3078_v38  ;;  %v3081_v51 = vadd.f32 %v1093_v60, %v1074_v42  ;;  %v1591_v27 = vld [vmem:[#allocation2 + $0x12d0] sm:$0xff]  ;;  %v1714_v33 = vld [vmem:[#allocation2 + $0x16a8] sm:$0xff] }
 0x16f   : > { %1856 = vmatpush.msra.mxu0 %v1690_v39  ;;  %1896 = vmatpush.msra.mxu2 %v1627_v43  ;;  %v1659_v28 = vld [vmem:[#allocation2 + $0x14f0] sm:$0xff]  ;;  %v1642_v61 = vld [vmem:[#allocation2 + $0x1468] sm:$0xff] }
 0x170   : > { %1811 = vmatpush.msrb.mxu1 %v1629_v44  ;;  %1851 = vmatpush.msrb.mxu3 %v1566_v12  ;;  %v1587_v31 = vld [vmem:[#allocation2 + $0x12b0] sm:$0xff]  ;;  %v1710_v36 = vld [vmem:[#allocation2 + $0x1688] sm:$0xff] }
 0x171   : > { %1857 = vmatpush.msra.mxu0 %v1686_v47  ;;  %1897 = vmatpush.msra.mxu2 %v1623_v50  ;;  %v1655_v49 = vld [vmem:[#allocation2 + $0x14d0] sm:$0xff]  ;;  %v1638_v41 = vld [vmem:[#allocation2 + $0x1448] sm:$0xff] }
 0x172   : > { %1876 = vmatpush.msra.mxu1 %v1754_v48  ;;  %1916 = vmatpush.msra.mxu3 %v1691_v52  ;;  %v1651_v35 = vld [vmem:[#allocation2 + $0x14b0] sm:$0xff]  ;;  %v1706_v23 = vld [vmem:[#allocation2 + $0x1668] sm:$0xff]  ;;  %v1692_v52 = vld [vmem:[#allocation2 + $0x15f8] sm:$0xff] }
 0x173   : > { %1792 = vmatmul.f32.vlgmr.msrb.gmra.mxu0 %v3084_v19  ;;  %1812 = vmatmul.f32.vlgmr.msrb.gmra.mxu1 %v3087_v53  ;;  %v1579_v37 = vld [vmem:[#allocation2 + $0x1270] sm:$0xff]  ;;  %v1634_v44 = vld [vmem:[#allocation2 + $0x1428] sm:$0xff] }
 0x174   : > { %1858 = vmatpush.msra.mxu0 %v1682_v54  ;;  %1877 = vmatpush.msra.mxu1 %v1750_v55  ;;  %v1647_v39 = vld [vmem:[#allocation2 + $0x1490] sm:$0xff]  ;;  %v1702_v45 = vld [vmem:[#allocation2 + $0x1648] sm:$0xff] }
 0x175   : > { %1898 = vmatpush.msra.mxu2 %v1619_v57  ;;  %1917 = vmatpush.msra.mxu3 %v1687_v58  ;;  %v1575_v42 = vld [vmem:[#allocation2 + $0x1250] sm:$0xff]  ;;  %v1630_v47 = vld [vmem:[#allocation2 + $0x1408] sm:$0xff] }
 0x176   : > { %1859 = vmatpush.msra.mxu0 %v1678_v59  ;;  %1878 = vmatpush.msra.mxu1 %v1746_v62  ;;  %v1643_v43 = vld [vmem:[#allocation2 + $0x1470] sm:$0xff]  ;;  %v1698_v60 = vld [vmem:[#allocation2 + $0x1628] sm:$0xff]  ;;  %v1628_v59 = vld [vmem:[#allocation2 + $0x13f8] sm:$0xff] }
 0x177   : > { %1899 = vmatpush.msra.mxu2 %v1615_v63  ;;  %1918 = vmatpush.msra.mxu3 %v1683_v0  ;;  %v1571_v46 = vld [vmem:[#allocation2 + $0x1230] sm:$0xff]  ;;  %v1694_v55 = vld [vmem:[#allocation2 + $0x1608] sm:$0xff]  ;;  %v1688_v62 = vld [vmem:[#allocation2 + $0x15d8] sm:$0xff] }
 0x178   : > { %1860 = vmatpush.msra.mxu0 %v1674_v1  ;;  %1879 = vmatpush.msra.mxu1 %v1742_v2  ;;  %v1639_v12 = vld [vmem:[#allocation2 + $0x1450] sm:$0xff]  ;;  %v1756_v63 = vld [vmem:[#allocation2 + $0x17f8] sm:$0xff] }
 0x179   : > { %1900 = vmatpush.msra.mxu2 %v1611_v29  ;;  %1919 = vmatpush.msra.mxu3 %v1679_v3  ;;  %v1567_v48 = vld [vmem:[#allocation2 + $0x1210] sm:$0xff]  ;;  %v1624_v1 = vld [vmem:[#allocation2 + $0x13d8] sm:$0xff] }
 0x17a   : > { %1861 = vmatpush.msra.mxu0 %v1670_v4  ;;  %1880 = vmatpush.msra.mxu1 %v1738_v5  ;;  %v1635_v50 = vld [vmem:[#allocation2 + $0x1430] sm:$0xff]  ;;  %v1684_v2 = vld [vmem:[#allocation2 + $0x15b8] sm:$0xff] }
 0x17b   : > { %1901 = vmatpush.msra.mxu2 %v1607_v7  ;;  %1920 = vmatpush.msra.mxu3 %v1675_v8  ;;  %v1755_v54 = vld [vmem:[#allocation2 + $0x17f0] sm:$0xff]  ;;  %v1752_v29 = vld [vmem:[#allocation2 + $0x17d8] sm:$0xff] }
 0x17c   : > { %1862 = vmatpush.msra.mxu0 %v1666_v9  ;;  %1881 = vmatpush.msra.mxu1 %v1734_v11  ;;  %v1631_v57 = vld [vmem:[#allocation2 + $0x1410] sm:$0xff]  ;;  %v1620_v4 = vld [vmem:[#allocation2 + $0x13b8] sm:$0xff] }
 0x17d   : > { %1902 = vmatpush.msra.mxu2 %v1603_v10  ;;  %1921 = vmatpush.msra.mxu3 %v1671_v15  ;;  %v1751_v58 = vld [vmem:[#allocation2 + $0x17d0] sm:$0xff]  ;;  %v1680_v5 = vld [vmem:[#allocation2 + $0x1598] sm:$0xff] }
 0x17e   : > { %1863 = vmatpush.msra.mxu0 %v1662_v14  ;;  %1882 = vmatpush.msra.mxu1 %v1730_v16  ;;  %v1747_v0 = vld [vmem:[#allocation2 + $0x17b0] sm:$0xff]  ;;  %v1748_v7 = vld [vmem:[#allocation2 + $0x17b8] sm:$0xff] }
 0x17f   : > { %1903 = vmatpush.msra.mxu2 %v1599_v18  ;;  %1922 = vmatpush.msra.mxu3 %v1667_v40  ;;  %v1743_v3 = vld [vmem:[#allocation2 + $0x1790] sm:$0xff]  ;;  %v1616_v9 = vld [vmem:[#allocation2 + $0x1398] sm:$0xff] }
 0x180   : > { %1864 = vmatpush.msra.mxu0 %v1658_v20  ;;  %1883 = vmatpush.msra.mxu1 %v1726_v21  ;;  %v1739_v8 = vld [vmem:[#allocation2 + $0x1770] sm:$0xff]  ;;  %v1676_v11 = vld [vmem:[#allocation2 + $0x1578] sm:$0xff] }
 0x181   : > { %1904 = vmatpush.msra.mxu2 %v1595_v22  ;;  %1923 = vmatpush.msra.mxu3 %v1663_v24  ;;  %v1744_v10 = vld [vmem:[#allocation2 + $0x1798] sm:$0xff]  ;;  %v1735_v15 = vld [vmem:[#allocation2 + $0x1750] sm:$0xff] }
 0x182   : > { %1865 = vmatpush.msra.mxu0 %v1654_v25  ;;  %1884 = vmatpush.msra.mxu1 %v1722_v26  ;;  %v1612_v14 = vld [vmem:[#allocation2 + $0x1378] sm:$0xff]  ;;  %v1731_v40 = vld [vmem:[#allocation2 + $0x1730] sm:$0xff] }
 0x183   : > { %1905 = vmatpush.msra.mxu2 %v1591_v27  ;;  %1924 = vmatpush.msra.mxu3 %v1659_v28  ;;  %v1672_v16 = vld [vmem:[#allocation2 + $0x1558] sm:$0xff]  ;;  %v1727_v24 = vld [vmem:[#allocation2 + $0x1710] sm:$0xff] }
 0x184   : > { %1866 = vmatpush.msra.mxu0 %v1650_v30  ;;  %1885 = vmatpush.msra.mxu1 %v1718_v56  ;;  %v1740_v18 = vld [vmem:[#allocation2 + $0x1778] sm:$0xff]  ;;  %v1723_v28 = vld [vmem:[#allocation2 + $0x16f0] sm:$0xff] }
 0x185   : > { %1906 = vmatpush.msra.mxu2 %v1587_v31  ;;  %1925 = vmatpush.msra.mxu3 %v1655_v49  ;;  %v1608_v20 = vld [vmem:[#allocation2 + $0x1358] sm:$0xff] }
 0x186   : > { %1867 = vmatpush.msra.mxu0 %v1646_v32  ;;  %1886 = vmatpush.msra.mxu1 %v1714_v33  ;;  %v1668_v21 = vld [vmem:[#allocation2 + $0x1538] sm:$0xff]  ;;  %v1719_v32 = vld [vmem:[#allocation2 + $0x16d0] sm:$0xff] }
 0x187   : > { %1907 = vmatpush.msra.mxu2 %v1583_v34  ;;  %1926 = vmatpush.msra.mxu3 %v1651_v35  ;;  %v1736_v22 = vld [vmem:[#allocation2 + $0x1758] sm:$0xff] }
 0x188   : > { %1868 = vmatpush.msra.mxu0 %v1642_v61  ;;  %1887 = vmatpush.msra.mxu1 %v1710_v36  ;;  %v1604_v25 = vld [vmem:[#allocation2 + $0x1338] sm:$0xff]  ;;  %v1715_v36 = vld [vmem:[#allocation2 + $0x16b0] sm:$0xff] }
 0x189   : > { %1908 = vmatpush.msra.mxu2 %v1579_v37  ;;  %1927 = vmatpush.msra.mxu3 %v1647_v39  ;;  %v1664_v26 = vld [vmem:[#allocation2 + $0x1518] sm:$0xff] }
 0x18a   : > { %1869 = vmatpush.msra.mxu0 %v1638_v41  ;;  %1852 = vmatmul.f32.vlgmr.msrb.gmra.mxu3 %v3084_v19  ;;  %v1732_v27 = vld [vmem:[#allocation2 + $0x1738] sm:$0xff]  ;;  %v3094_v56 = vpop.f32.mrf.mxu0  ;;  %v3096_v34 = vpop.f32.mrf.mxu1 }
 0x18b   : > { %1888 = vmatpush.msra.mxu1 %v1706_v23  ;;  %1909 = vmatpush.msra.mxu2 %v1575_v42  ;;  %v1600_v30 = vld [vmem:[#allocation2 + $0x1318] sm:$0xff]  ;;  %v1711_v23 = vld [vmem:[#allocation2 + $0x1690] sm:$0xff] }
 0x18c   : > { %1928 = vmatpush.msra.mxu3 %v1643_v43  ;;  %1870 = vmatpush.msra.mxu0 %v1634_v44  ;;  %v1660_v31 = vld [vmem:[#allocation2 + $0x14f8] sm:$0xff] }
 0x18d   : > { %1889 = vmatpush.msra.mxu1 %v1702_v45  ;;  %1910 = vmatpush.msra.mxu2 %v1571_v46  ;;  %v1728_v49 = vld [vmem:[#allocation2 + $0x1718] sm:$0xff]  ;;  %v1707_v45 = vld [vmem:[#allocation2 + $0x1670] sm:$0xff] }
 0x18e   : > { %1929 = vmatpush.msra.mxu3 %v1639_v12  ;;  %1871 = vmatpush.msra.mxu0 %v1630_v47  ;;  %v1596_v33 = vld [vmem:[#allocation2 + $0x12f8] sm:$0xff] }
 0x18f   : > { %1890 = vmatpush.msra.mxu1 %v1698_v60  ;;  %1911 = vmatpush.msra.mxu2 %v1567_v48  ;;  %v1656_v35 = vld [vmem:[#allocation2 + $0x14d8] sm:$0xff] }
 0x190   : > { %1930 = vmatpush.msra.mxu3 %v1635_v50  ;;  %1872 = vmatmul.f32.vlgmr.msra.gmra.mxu0 %v3087_v53  ;;  %v1724_v61 = vld [vmem:[#allocation2 + $0x16f8] sm:$0xff] }
 0x191   : > { %1976 = vmatpush.msrb.mxu2 %v1692_v52  ;;  %1936 = vmatpush.msrb.mxu0 %v1755_v54  ;;  %v1592_v37 = vld [vmem:[#allocation2 + $0x12d8] sm:$0xff]  ;;  %v1703_v52 = vld [vmem:[#allocation2 + $0x1650] sm:$0xff] }
 0x192   : > { %1891 = vmatpush.msra.mxu1 %v1694_v55  ;;  %1931 = vmatpush.msra.mxu3 %v1631_v57  ;;  %v1652_v39 = vld [vmem:[#allocation2 + $0x14b8] sm:$0xff] }
 0x193   : > { %1892 = vmatmul.f32.vlgmr.msra.gmra.mxu1 %v3078_v38  ;;  %1937 = vmatpush.msrb.mxu0 %v1751_v58  ;;  %v1720_v41 = vld [vmem:[#allocation2 + $0x16d8] sm:$0xff] }
 0x194   : > { %1956 = vmatpush.msrb.mxu1 %v1628_v59  ;;  %1977 = vmatpush.msrb.mxu2 %v1688_v62  ;;  %v1588_v42 = vld [vmem:[#allocation2 + $0x12b8] sm:$0xff]  ;;  %v1699_v62 = vld [vmem:[#allocation2 + $0x1630] sm:$0xff] }
 0x195   : > { %1996 = vmatpush.msrb.mxu3 %v1756_v63  ;;  %1938 = vmatpush.msrb.mxu0 %v1747_v0  ;;  %v1648_v43 = vld [vmem:[#allocation2 + $0x1498] sm:$0xff] }
 0x196   : > { %1957 = vmatpush.msrb.mxu1 %v1624_v1  ;;  %1978 = vmatpush.msrb.mxu2 %v1684_v2  ;;  %v1716_v44 = vld [vmem:[#allocation2 + $0x16b8] sm:$0xff] }
 0x197   : > { %1997 = vmatpush.msrb.mxu3 %v1752_v29  ;;  %1939 = vmatpush.msrb.mxu0 %v1743_v3  ;;  %v1584_v46 = vld [vmem:[#allocation2 + $0x1298] sm:$0xff]  ;;  %v1695_v29 = vld [vmem:[#allocation2 + $0x1610] sm:$0xff] }
 0x198   : > { %1958 = vmatpush.msrb.mxu1 %v1620_v4  ;;  %1979 = vmatpush.msrb.mxu2 %v1680_v5  ;;  %v1644_v60 = vld [vmem:[#allocation2 + $0x1478] sm:$0xff] }
 0x199   : > { %1998 = vmatpush.msrb.mxu3 %v1748_v7  ;;  %1940 = vmatpush.msrb.mxu0 %v1739_v8  ;;  %v1712_v48 = vld [vmem:[#allocation2 + $0x1698] sm:$0xff]  ;;  %v2087_v7 = vld [vmem:[#allocation2 + $0x19e0] sm:$0xff] }
 0x19a   : > { %1959 = vmatpush.msrb.mxu1 %v1616_v9  ;;  %1980 = vmatpush.msrb.mxu2 %v1676_v11  ;;  %v1580_v54 = vld [vmem:[#allocation2 + $0x1278] sm:$0xff]  ;;  %v2215_v8 = vld [vmem:[#allocation2 + $0x1de0] sm:$0xff] }
 0x19b   : > { %1999 = vmatpush.msrb.mxu3 %v1744_v10  ;;  %1941 = vmatpush.msrb.mxu0 %v1735_v15  ;;  %v1640_v57 = vld [vmem:[#allocation2 + $0x1458] sm:$0xff]  ;;  %v2151_v10 = vld [vmem:[#allocation2 + $0x1be0] sm:$0xff] }
 0x19c   : > { %1960 = vmatpush.msrb.mxu1 %v1612_v14  ;;  %1981 = vmatpush.msrb.mxu2 %v1672_v16  ;;  %v1708_v58 = vld [vmem:[#allocation2 + $0x1678] sm:$0xff]  ;;  %v2211_v15 = vld [vmem:[#allocation2 + $0x1dc0] sm:$0xff]  ;;  %v2088_v14 = vld [vmem:[#allocation2 + $0x19e8] sm:$0xff] }
 0x19d   : > { %2000 = vmatpush.msrb.mxu3 %v1740_v18  ;;  %1942 = vmatpush.msrb.mxu0 %v1731_v40  ;;  %v1576_v63 = vld [vmem:[#allocation2 + $0x1258] sm:$0xff]  ;;  %v2079_v16 = vld [vmem:[#allocation2 + $0x19a0] sm:$0xff] }
 0x19e   : > { %1961 = vmatpush.msrb.mxu1 %v1608_v20  ;;  %1982 = vmatpush.msrb.mxu2 %v1668_v21  ;;  %v1636_v0 = vld [vmem:[#allocation2 + $0x1438] sm:$0xff]  ;;  %v2147_v18 = vld [vmem:[#allocation2 + $0x1bc0] sm:$0xff]  ;;  %v2084_v20 = vld [vmem:[#allocation2 + $0x19c8] sm:$0xff] }
 0x19f   : > { %2001 = vmatpush.msrb.mxu3 %v1736_v22  ;;  %1943 = vmatpush.msrb.mxu0 %v1727_v24  ;;  %v1704_v1 = vld [vmem:[#allocation2 + $0x1658] sm:$0xff]  ;;  %v2207_v40 = vld [vmem:[#allocation2 + $0x1da0] sm:$0xff]  ;;  %v2080_v24 = vld [vmem:[#allocation2 + $0x19a8] sm:$0xff] }
 0x1a0   : > { %1962 = vmatpush.msrb.mxu1 %v1604_v25  ;;  %1983 = vmatpush.msrb.mxu2 %v1664_v26  ;;  %v1572_v3 = vld [vmem:[#allocation2 + $0x1238] sm:$0xff]  ;;  %v2143_v21 = vld [vmem:[#allocation2 + $0x1ba0] sm:$0xff] }
 0x1a1   : > { %2002 = vmatpush.msrb.mxu3 %v1732_v27  ;;  %1944 = vmatpush.msrb.mxu0 %v1723_v28  ;;  %v1632_v4 = vld [vmem:[#allocation2 + $0x1418] sm:$0xff]  ;;  %v2203_v22 = vld [vmem:[#allocation2 + $0x1d80] sm:$0xff]  ;;  %v2076_v27 = vld [vmem:[#allocation2 + $0x1988] sm:$0xff] }
 0x1a2   : > { %1963 = vmatpush.msrb.mxu1 %v1600_v30  ;;  %1984 = vmatpush.msrb.mxu2 %v1660_v31  ;;  %v1700_v5 = vld [vmem:[#allocation2 + $0x1638] sm:$0xff]  ;;  %v2071_v25 = vld [vmem:[#allocation2 + $0x1960] sm:$0xff] }
 0x1a3   : > { %2003 = vmatpush.msrb.mxu3 %v1728_v49  ;;  %1945 = vmatpush.msrb.mxu0 %v1719_v32  ;;  %v1568_v9 = vld [vmem:[#allocation2 + $0x1218] sm:$0xff]  ;;  %v2139_v26 = vld [vmem:[#allocation2 + $0x1b80] sm:$0xff]  ;;  %v2072_v49 = vld [vmem:[#allocation2 + $0x1968] sm:$0xff] }
 0x1a4   : > { %1964 = vmatpush.msrb.mxu1 %v1596_v33  ;;  %1985 = vmatpush.msrb.mxu2 %v1656_v35  ;;  %v1696_v11 = vld [vmem:[#allocation2 + $0x1618] sm:$0xff]  ;;  %v2067_v28 = vld [vmem:[#allocation2 + $0x1940] sm:$0xff]  ;;  %v3107_v35 = vpop.f32.mrf.mxu2 }
 0x1a5   : > { %2004 = vmatpush.msrb.mxu3 %v1724_v61  ;;  %1946 = vmatpush.msrb.mxu0 %v1715_v36  ;;  %v2135_v30 = vld [vmem:[#allocation2 + $0x1b60] sm:$0xff]  ;;  %v2068_v61 = vld [vmem:[#allocation2 + $0x1948] sm:$0xff] }
 0x1a6   : > { %1965 = vmatpush.msrb.mxu1 %v1592_v37  ;;  %1986 = vmatpush.msrb.mxu2 %v1652_v39  ;;  %v2195_v31 = vld [vmem:[#allocation2 + $0x1d40] sm:$0xff] }
 0x1a7   : > { %2005 = vmatpush.msrb.mxu3 %v1720_v41  ;;  %1947 = vmatpush.msrb.mxu0 %v1711_v23  ;;  %v1391_v12 = vpop.f32.mrf.mxu3  ;;  %v1411_v47 = vpop.f32.mrf.mxu0  ;;  %v2063_v32 = vld [vmem:[#allocation2 + $0x1920] sm:$0xff]  ;;  %v2064_v41 = vld [vmem:[#allocation2 + $0x1928] sm:$0xff] }
 0x1a8   : > { %1966 = vmatpush.msrb.mxu1 %v1588_v42  ;;  %1987 = vmatpush.msrb.mxu2 %v1648_v43  ;;  %v1412_v50 = vadd.f32 %v1411_v47, %v1391_v12  ;;  %v2131_v33 = vld [vmem:[#allocation2 + $0x1b40] sm:$0xff]  ;;  %v2056_v47 = vld [vmem:[#allocation2 + $0x18e8] sm:$0xff] }
 0x1a9   : > { %2006 = vmatpush.msrb.mxu3 %v1716_v44  ;;  %1912 = vmatmul.f32.vlgmr.msra.gmra.mxu2 %v3084_v19  ;;  %v2059_v36 = vld [vmem:[#allocation2 + $0x1900] sm:$0xff]  ;;  %v2060_v44 = vld [vmem:[#allocation2 + $0x1908] sm:$0xff] }
 0x1aa   : > { %1932 = vmatmul.f32.vlgmr.msra.gmra.mxu3 %v3087_v53  ;;  %v1431_v55 = vpop.f32.mrf.mxu1  ;;  %1948 = vmatpush.msrb.mxu0 %v1707_v45  ;;  %v2127_v37 = vld [vmem:[#allocation2 + $0x1b20] sm:$0xff] }
 0x1ab   : > { %1967 = vmatpush.msrb.mxu1 %v1584_v46  ;;  %v1432_v59 = vadd.f32 %v1431_v55, %v1412_v50  ;;  %1988 = vmatpush.msrb.mxu2 %v1644_v60  ;;  %v2187_v39 = vld [vmem:[#allocation2 + $0x1d00] sm:$0xff] }
 0x1ac   : > { %2007 = vmatpush.msrb.mxu3 %v1712_v48  ;;  %1949 = vmatpush.msrb.mxu0 %v1703_v52  ;;  %v2055_v23 = vld [vmem:[#allocation2 + $0x18e0] sm:$0xff]  ;;  %v2052_v52 = vld [vmem:[#allocation2 + $0x18c8] sm:$0xff] }
 0x1ad   : > { %1968 = vmatpush.msrb.mxu1 %v1580_v54  ;;  %v3101_v2 = vadd.f32 %v1432_v59, %v3058_v13  ;;  %1989 = vmatpush.msrb.mxu2 %v1640_v57  ;;  %v2083_v13 = vld [vmem:[#allocation2 + $0x19c0] sm:$0xff] }
 0x1ae   : > { %2008 = vmatpush.msrb.mxu3 %v1708_v58  ;;  %1950 = vmatpush.msrb.mxu0 %v1699_v62  ;;  %v2123_v42 = vld [vmem:[#allocation2 + $0x1b00] sm:$0xff] }
 0x1af   : > { %1969 = vmatpush.msrb.mxu1 %v1576_v63  ;;  %1990 = vmatpush.msrb.mxu2 %v1636_v0  ;;  %v2183_v43 = vld [vmem:[#allocation2 + $0x1ce0] sm:$0xff]  ;;  %v2048_v63 = vld [vmem:[#allocation2 + $0x18a8] sm:$0xff] }
 0x1b0   : > { %2009 = vmatpush.msrb.mxu3 %v1704_v1  ;;  %1951 = vmatpush.msrb.mxu0 %v1695_v29  ;;  %v2051_v45 = vld [vmem:[#allocation2 + $0x18c0] sm:$0xff] }
 0x1b1   : > { %1970 = vmatpush.msrb.mxu1 %v1572_v3  ;;  %1991 = vmatpush.msrb.mxu2 %v1632_v4  ;;  %v2119_v46 = vld [vmem:[#allocation2 + $0x1ae0] sm:$0xff]  ;;  %v2044_v4 = vld [vmem:[#allocation2 + $0x1888] sm:$0xff] }
 0x1b2   : > { %2010 = vmatpush.msrb.mxu3 %v1700_v5  ;;  %1952 = vmatmul.f32.vlgmr.msrb.gmra.mxu0 %v3078_v38  ;;  %v2179_v12 = vld [vmem:[#allocation2 + $0x1cc0] sm:$0xff]  ;;  %v2022_v5 = vld [vmem:[%s2970_s30 + $0x10] sm:$0xf0] }
 0x1b3   : > { %1992 = vmatmul.f32.vlgmr.msrb.gmra.mxu2 %v3087_v53  ;;  %2238 = vmatpush.msra.mxu0 %v2087_v7  ;;  %v2075_v53 = vld [vmem:[#allocation2 + $0x1980] sm:$0xff]  ;;  %v2025_v7 = vld [vmem:[%s2970_s30 + $0x28] sm:$0xf] }
 0x1b4   : > { %2278 = vmatpush.msra.mxu2 %v2215_v8  ;;  %1971 = vmatpush.msrb.mxu1 %v1568_v9  ;;  %v2047_v60 = vld [vmem:[#allocation2 + $0x18a0] sm:$0xff] }
 0x1b5   : > { %2011 = vmatpush.msrb.mxu3 %v1696_v11  ;;  %2239 = vmatpush.msra.mxu0 %v2083_v13  ;;  %v2115_v48 = vld [vmem:[#allocation2 + $0x1ac0] sm:$0xff] }
 0x1b6   : > { %2012 = vmatmul.f32.vlgmr.msrb.gmra.mxu3 %v3078_v38  ;;  %2258 = vmatpush.msra.mxu1 %v2151_v10  ;;  %v2199_v38 = vld [vmem:[#allocation2 + $0x1d60] sm:$0xff]  ;;  %v2040_v10 = vld [vmem:[#allocation2 + $0x1868] sm:$0xff] }
 0x1b7   : > { %2279 = vmatpush.msra.mxu2 %v2211_v15  ;;  %2298 = vmatpush.msra.mxu3 %v2088_v14  ;;  %v2175_v50 = vld [vmem:[#allocation2 + $0x1ca0] sm:$0xff] }
 0x1b8   : > { %2240 = vmatpush.msra.mxu0 %v2079_v16  ;;  %2259 = vmatpush.msra.mxu1 %v2147_v18  ;;  %v2043_v57 = vld [vmem:[#allocation2 + $0x1880] sm:$0xff] }
 0x1b9   : > { %2280 = vmatpush.msra.mxu2 %v2207_v40  ;;  %2299 = vmatpush.msra.mxu3 %v2084_v20  ;;  %v2111_v58 = vld [vmem:[#allocation2 + $0x1aa0] sm:$0xff]  ;;  %v2036_v40 = vld [vmem:[#allocation2 + $0x1848] sm:$0xff]  ;;  %v2232_v20 = vrot.slane %v2022_v5, 4 }
 0x1ba   : > { %1972 = vmatmul.f32.vlgmr.msrb.gmra.mxu1 %v3084_v19  ;;  %2241 = vmatpush.msra.mxu0 %v2075_v53  ;;  %v2191_v19 = vld [vmem:[#allocation2 + $0x1d20] sm:$0xff]  ;;  %v2233_v53 = vrot.slane %v2025_v7, 4  ;;  %v2128_v5 = vld [vmem:[#allocation2 + $0x1b28] sm:$0xff] }
 0x1bb   : > { %2260 = vmatpush.msra.mxu1 %v2143_v21  ;;  %2281 = vmatpush.msra.mxu2 %v2203_v22  ;;  %v2171_v62 = vld [vmem:[#allocation2 + $0x1c80] sm:$0xff]  ;;  %v2196_v7 = vld [vmem:[#allocation2 + $0x1d48] sm:$0xff] }
 0x1bc   : > { %2300 = vmatpush.msra.mxu3 %v2080_v24  ;;  %2242 = vmatpush.msra.mxu0 %v2071_v25  ;;  %v2039_v0 = vld [vmem:[#allocation2 + $0x1860] sm:$0xff]  ;;  %v2023_v24 = vld [vmem:[%s2970_s30 + $0x18] sm:$0xf] }
 0x1bd   : > { %2261 = vmatpush.msra.mxu1 %v2139_v26  ;;  %2282 = vmatpush.msra.mxu2 %v2199_v38  ;;  %v2107_v1 = vld [vmem:[#allocation2 + $0x1a80] sm:$0xff] }
 0x1be   : > { %2301 = vmatpush.msra.mxu3 %v2076_v27  ;;  %2243 = vmatpush.msra.mxu0 %v2067_v28  ;;  %v2167_v29 = vld [vmem:[#allocation2 + $0x1c60] sm:$0xff]  ;;  %v2032_v28 = vld [vmem:[#allocation2 + $0x1828] sm:$0xff] }
 0x1bf   : > { %2262 = vmatpush.msra.mxu1 %v2135_v30  ;;  %2283 = vmatpush.msra.mxu2 %v2195_v31  ;;  %v2035_v9 = vld [vmem:[#allocation2 + $0x1840] sm:$0xff]  ;;  %v3119_v31 = vsel %vm2225_vm3, %v2232_v20, %v2233_v53  ;;  %v2125_v20 = vld [vmem:[#allocation2 + $0x1b10] sm:$0xff]  ;;  %v2116_v53 = vld [vmem:[#allocation2 + $0x1ac8] sm:$0xff] }
 0x1c0   : > { %2302 = vmatpush.msra.mxu3 %v2072_v49  ;;  %2244 = vmatpush.msra.mxu0 %v2063_v32  ;;  %v2103_v11 = vld [vmem:[#allocation2 + $0x1a60] sm:$0xff]  ;;  %v2152_v49 = vld [vmem:[#allocation2 + $0x1be8] sm:$0xff] }
 0x1c1   : > { %2263 = vmatpush.msra.mxu1 %v2131_v33  ;;  %2284 = vmatpush.msra.mxu2 %v2191_v19  ;;  %v2163_v13 = vld [vmem:[#allocation2 + $0x1c40] sm:$0xff]  ;;  %v2227_v33 = vrot.slane %v2023_v24, 4  ;;  %v2121_v24 = vld [vmem:[#allocation2 + $0x1af0] sm:$0xff] }
 0x1c2   : > { %2303 = vmatpush.msra.mxu3 %v2068_v61  ;;  %2245 = vmatpush.msra.mxu0 %v2059_v36  ;;  %v2031_v15 = vld [vmem:[#allocation2 + $0x1820] sm:$0xff]  ;;  %v2089_v61 = vld [vmem:[#allocation2 + $0x19f0] sm:$0xff] }
 0x1c3   : > { %2264 = vmatpush.msra.mxu1 %v2127_v37  ;;  %2285 = vmatpush.msra.mxu2 %v2187_v39  ;;  %v2099_v16 = vld [vmem:[#allocation2 + $0x1a40] sm:$0xff] }
 0x1c4   : > { %2304 = vmatpush.msra.mxu3 %v2064_v41  ;;  %2246 = vmatpush.msra.mxu0 %v2055_v23  ;;  %v2159_v18 = vld [vmem:[#allocation2 + $0x1c20] sm:$0xff]  ;;  %v2028_v23 = vld [vmem:[#allocation2 + $0x1808] sm:$0xff] }
 0x1c5   : > { %2265 = vmatpush.msra.mxu1 %v2123_v42  ;;  %2286 = vmatpush.msra.mxu2 %v2183_v43  ;;  %v2027_v21 = vld [vmem:[#allocation2 + $0x1800] sm:$0xff]  ;;  %v2148_v42 = vld [vmem:[#allocation2 + $0x1bc8] sm:$0xff] }
 0x1c6   : > { %2305 = vmatpush.msra.mxu3 %v2060_v44  ;;  %2247 = vmatpush.msra.mxu0 %v2051_v45  ;;  %v1451_v54 = vpop.f32.mrf.mxu2  ;;  %v2020_v22 = vld [vmem:[%s2970_s30] sm:$0xf0]  ;;  %v2024_v26 = vld [vmem:[%s2970_s30 + $0x20] sm:$0xf]  ;;  %v2216_v44 = vld [vmem:[#allocation2 + $0x1de8] sm:$0xff] }
 0x1c7   : > { %2266 = vmatpush.msra.mxu1 %v2119_v46  ;;  %v1471_v55 = vpop.f32.mrf.mxu3  ;;  %2287 = vmatpush.msra.mxu2 %v2179_v12  ;;  %v2095_v25 = vld [vmem:[#allocation2 + $0x1a20] sm:$0xff]  ;;  %v2226_v32 = vrot.slane %v2020_v22, 4  ;;  %v2230_v39 = vrot.slane %v2024_v26, 4  ;;  %v2085_v45 = vld [vmem:[#allocation2 + $0x19d0] sm:$0xff] }
 0x1c8   : > { %2306 = vmatpush.msra.mxu3 %v2056_v47  ;;  %v1472_v59 = vadd.f32 %v1471_v55, %v1451_v54  ;;  %2248 = vmatpush.msra.mxu0 %v2047_v60  ;;  %v2155_v27 = vld [vmem:[#allocation2 + $0x1c00] sm:$0xff]  ;;  %v2153_v46 = vld [vmem:[#allocation2 + $0x1bf0] sm:$0xff]  ;;  %v2140_v55 = vld [vmem:[#allocation2 + $0x1b88] sm:$0xff] }
 0x1c9   : > { %2267 = vmatpush.msra.mxu1 %v2115_v48  ;;  %2288 = vmatpush.msra.mxu2 %v2175_v50  ;;  %v1491_v3 = vpop.f32.mrf.mxu0  ;;  %v2091_v36 = vld [vmem:[#allocation2 + $0x1a00] sm:$0xff]  ;;  %v3123_v12 = vsel %vm2225_vm3, %v2226_v32, %v2227_v33  ;;  %v2144_v48 = vld [vmem:[#allocation2 + $0x1ba8] sm:$0xff]  ;;  %v2149_v54 = vld [vmem:[#allocation2 + $0x1bd0] sm:$0xff] }
 0x1ca   : > { %2307 = vmatpush.msra.mxu3 %v2052_v52  ;;  %2249 = vmatpush.msra.mxu0 %v2043_v57  ;;  %v1492_v8 = vadd.f32 %v1491_v3, %v1472_v59  ;;  %v2212_v50 = vld [vmem:[#allocation2 + $0x1dc8] sm:$0xff]  ;;  %v2081_v52 = vld [vmem:[#allocation2 + $0x19b0] sm:$0xff] }
 0x1cb   : > { %2268 = vmatpush.msra.mxu1 %v2111_v58  ;;  %2289 = vmatpush.msra.mxu2 %v2171_v62  ;;  %v2077_v57 = vld [vmem:[#allocation2 + $0x1990] sm:$0xff]  ;;  %v2136_v59 = vld [vmem:[#allocation2 + $0x1b68] sm:$0xff] }
 0x1cc   : > { %2308 = vmatpush.msra.mxu3 %v2048_v63  ;;  %2250 = vmatpush.msra.mxu0 %v2039_v0  ;;  %v3112_v14 = vadd.f32 %v1492_v8, %v3070_v17  ;;  %v2021_v17 = vld [vmem:[%s2970_s30 + $0x8] sm:$0xf0]  ;;  %v2145_v58 = vld [vmem:[#allocation2 + $0x1bb0] sm:$0xff] }
 0x1cd   : > { %2269 = vmatpush.msra.mxu1 %v2107_v1  ;;  %2290 = vmatpush.msra.mxu2 %v2167_v29  ;;  %v2229_v37 = vrot.slane %v2021_v17, 4  ;;  %v2204_v62 = vld [vmem:[#allocation2 + $0x1d88] sm:$0xff]  ;;  %v2073_v63 = vld [vmem:[#allocation2 + $0x1970] sm:$0xff] }
 0x1ce   : > { %2309 = vmatpush.msra.mxu3 %v2044_v4  ;;  %2251 = vmatpush.msra.mxu0 %v2035_v9  ;;  %v2141_v0 = vld [vmem:[#allocation2 + $0x1b90] sm:$0xff]  ;;  %v2132_v1 = vld [vmem:[#allocation2 + $0x1b48] sm:$0xff] }
 0x1cf   : > { %2270 = vmatpush.msra.mxu1 %v2103_v11  ;;  %2291 = vmatpush.msra.mxu2 %v2163_v13  ;;  %v3129_v60 = vsel %vm2225_vm3, %v2229_v37, %v2230_v39  ;;  %v2200_v29 = vld [vmem:[#allocation2 + $0x1d68] sm:$0xff]  ;;  %v2069_v3 = vld [vmem:[#allocation2 + $0x1950] sm:$0xff] }
 0x1d0   : > { %2310 = vmatpush.msra.mxu3 %v2040_v10  ;;  %v1531_v38 = vpop.f32.mrf.mxu2  ;;  %2252 = vmatpush.msra.mxu0 %v2031_v15  ;;  %v2137_v4 = vld [vmem:[#allocation2 + $0x1b70] sm:$0xff]  ;;  %v2124_v11 = vld [vmem:[#allocation2 + $0x1b08] sm:$0xff] }
 0x1d1   : > { %2271 = vmatpush.msra.mxu1 %v2099_v16  ;;  %v1511_v30 = vpop.f32.mrf.mxu1  ;;  %2292 = vmatpush.msra.mxu2 %v2159_v18  ;;  %v2065_v8 = vld [vmem:[#allocation2 + $0x1930] sm:$0xff]  ;;  %v2192_v13 = vld [vmem:[#allocation2 + $0x1d28] sm:$0xff] }
 0x1d2   : > { %2311 = vmatpush.msra.mxu3 %v2036_v40  ;;  %v1532_v19 = vadd.f32 %v1531_v38, %v1511_v30  ;;  %2253 = vmatpush.msra.mxu0 %v2027_v21  ;;  %v2133_v9 = vld [vmem:[#allocation2 + $0x1b50] sm:$0xff]  ;;  %v2120_v16 = vld [vmem:[#allocation2 + $0x1ae8] sm:$0xff] }
 0x1d3   : > { %2272 = vmatpush.msra.mxu1 %v2095_v25  ;;  %v1551_v41 = vpop.f32.mrf.mxu3  ;;  %2293 = vmatpush.msra.mxu2 %v2155_v27  ;;  %v2061_v10 = vld [vmem:[#allocation2 + $0x1910] sm:$0xff]  ;;  %v2188_v18 = vld [vmem:[#allocation2 + $0x1d08] sm:$0xff] }
 0x1d4   : > { %2312 = vmatpush.msra.mxu3 %v2032_v28  ;;  %v1552_v43 = vadd.f32 %v1551_v41, %v1532_v19  ;;  %2294 = vmatmul.f32.vlgmr.msra.gmra.mxu2 %v3119_v31  ;;  %v2129_v15 = vld [vmem:[#allocation2 + $0x1b30] sm:$0xff]  ;;  %v2184_v21 = vld [vmem:[#allocation2 + $0x1ce8] sm:$0xff] }
 0x1d5   : > { %2318 = vmatpush.msrb.mxu0 %v2152_v49  ;;  %2358 = vmatpush.msrb.mxu2 %v2089_v61  ;;  %v2057_v40 = vld [vmem:[#allocation2 + $0x18f0] sm:$0xff]  ;;  %v2112_v25 = vld [vmem:[#allocation2 + $0x1aa8] sm:$0xff] }
 0x1d6   : > { %2273 = vmatpush.msra.mxu1 %v2091_v36  ;;  %v3126_v47 = vadd.f32 %v1552_v43, %v3081_v51  ;;  %2313 = vmatpush.msra.mxu3 %v2028_v23  ;;  %v2208_v51 = vld [vmem:[#allocation2 + $0x1da8] sm:$0xff]  ;;  %v2053_v22 = vld [vmem:[#allocation2 + $0x18d0] sm:$0xff] }
 0x1d7   : > { %2319 = vmatpush.msrb.mxu0 %v2148_v42  ;;  %2359 = vmatpush.msrb.mxu2 %v2085_v45  ;;  %v2180_v17 = vld [vmem:[#allocation2 + $0x1cc8] sm:$0xff]  ;;  %v2049_v26 = vld [vmem:[#allocation2 + $0x18b0] sm:$0xff] }
 0x1d8   : > { %2338 = vmatpush.msrb.mxu1 %v2216_v44  ;;  %2378 = vmatpush.msrb.mxu3 %v2153_v46  ;;  %v2117_v38 = vld [vmem:[#allocation2 + $0x1ad0] sm:$0xff]  ;;  %v2108_v27 = vld [vmem:[#allocation2 + $0x1a88] sm:$0xff] }
 0x1d9   : > { %2254 = vmatmul.f32.vlgmr.msra.gmra.mxu0 %v3123_v12  ;;  %2274 = vmatmul.f32.vlgmr.msra.gmra.mxu1 %v3129_v60  ;;  %v2176_v28 = vld [vmem:[#allocation2 + $0x1ca8] sm:$0xff]  ;;  %v2045_v30 = vld [vmem:[#allocation2 + $0x1890] sm:$0xff] }
 0x1da   : > { %2320 = vmatpush.msrb.mxu0 %v2144_v48  ;;  %2339 = vmatpush.msrb.mxu1 %v2212_v50  ;;  %v2113_v49 = vld [vmem:[#allocation2 + $0x1ab0] sm:$0xff]  ;;  %v2104_v32 = vld [vmem:[#allocation2 + $0x1a68] sm:$0xff] }
 0x1db   : > { %2360 = vmatpush.msrb.mxu2 %v2081_v52  ;;  %2379 = vmatpush.msrb.mxu3 %v2149_v54  ;;  %v2172_v33 = vld [vmem:[#allocation2 + $0x1c88] sm:$0xff]  ;;  %v2041_v19 = vld [vmem:[#allocation2 + $0x1870] sm:$0xff]  ;;  %v2154_v52 = vld [vmem:[#allocation2 + $0x1bf8] sm:$0xff] }
 0x1dc   : > { %2321 = vmatpush.msrb.mxu0 %v2140_v55  ;;  %2340 = vmatpush.msrb.mxu1 %v2208_v51  ;;  %v2109_v61 = vld [vmem:[#allocation2 + $0x1a90] sm:$0xff]  ;;  %v2100_v36 = vld [vmem:[#allocation2 + $0x1a48] sm:$0xff] }
 0x1dd   : > { %2361 = vmatpush.msrb.mxu2 %v2077_v57  ;;  %2380 = vmatpush.msrb.mxu3 %v2145_v58  ;;  %v2168_v37 = vld [vmem:[#allocation2 + $0x1c68] sm:$0xff]  ;;  %v2037_v39 = vld [vmem:[#allocation2 + $0x1850] sm:$0xff]  ;;  %v2150_v58 = vld [vmem:[#allocation2 + $0x1bd8] sm:$0xff] }
 0x1de   : > { %2322 = vmatpush.msrb.mxu0 %v2136_v59  ;;  %2341 = vmatpush.msrb.mxu1 %v2204_v62  ;;  %v2105_v41 = vld [vmem:[#allocation2 + $0x1a70] sm:$0xff]  ;;  %v2096_v23 = vld [vmem:[#allocation2 + $0x1a28] sm:$0xff]  ;;  %v2218_v59 = vld [vmem:[#allocation2 + $0x1df8] sm:$0xff] }
 0x1df   : > { %2362 = vmatpush.msrb.mxu2 %v2073_v63  ;;  %2381 = vmatpush.msrb.mxu3 %v2141_v0  ;;  %v2164_v42 = vld [vmem:[#allocation2 + $0x1c48] sm:$0xff]  ;;  %v2033_v43 = vld [vmem:[#allocation2 + $0x1830] sm:$0xff]  ;;  %v2090_v62 = vld [vmem:[#allocation2 + $0x19f8] sm:$0xff] }
 0x1e0   : > { %2323 = vmatpush.msrb.mxu0 %v2132_v1  ;;  %2342 = vmatpush.msrb.mxu1 %v2200_v29  ;;  %v2101_v44 = vld [vmem:[#allocation2 + $0x1a50] sm:$0xff]  ;;  %v2092_v45 = vld [vmem:[#allocation2 + $0x1a08] sm:$0xff]  ;;  %v2146_v0 = vld [vmem:[#allocation2 + $0x1bb8] sm:$0xff] }
 0x1e1   : > { %2363 = vmatpush.msrb.mxu2 %v2069_v3  ;;  %2382 = vmatpush.msrb.mxu3 %v2137_v4  ;;  %v2160_v46 = vld [vmem:[#allocation2 + $0x1c28] sm:$0xff]  ;;  %v2029_v48 = vld [vmem:[#allocation2 + $0x1810] sm:$0xff]  ;;  %v2214_v1 = vld [vmem:[#allocation2 + $0x1dd8] sm:$0xff] }
 0x1e2   : > { %2324 = vmatpush.msrb.mxu0 %v2128_v5  ;;  %2343 = vmatpush.msrb.mxu1 %v2196_v7  ;;  %v2097_v50 = vld [vmem:[#allocation2 + $0x1a30] sm:$0xff]  ;;  %v2156_v55 = vld [vmem:[#allocation2 + $0x1c08] sm:$0xff]  ;;  %v2086_v29 = vld [vmem:[#allocation2 + $0x19d8] sm:$0xff] }
 0x1e3   : > { %2364 = vmatpush.msrb.mxu2 %v2065_v8  ;;  %2383 = vmatpush.msrb.mxu3 %v2133_v9  ;;  %v2217_v54 = vld [vmem:[#allocation2 + $0x1df0] sm:$0xff]  ;;  %v2142_v4 = vld [vmem:[#allocation2 + $0x1b98] sm:$0xff] }
 0x1e4   : > { %2325 = vmatpush.msrb.mxu0 %v2124_v11  ;;  %2344 = vmatpush.msrb.mxu1 %v2192_v13  ;;  %v2093_v51 = vld [vmem:[#allocation2 + $0x1a10] sm:$0xff]  ;;  %v2210_v5 = vld [vmem:[#allocation2 + $0x1db8] sm:$0xff] }
 0x1e5   : > { %2365 = vmatpush.msrb.mxu2 %v2061_v10  ;;  %2384 = vmatpush.msrb.mxu3 %v2129_v15  ;;  %v2213_v57 = vld [vmem:[#allocation2 + $0x1dd0] sm:$0xff]  ;;  %v2082_v7 = vld [vmem:[#allocation2 + $0x19b8] sm:$0xff] }
 0x1e6   : > { %2326 = vmatpush.msrb.mxu0 %v2120_v16  ;;  %2345 = vmatpush.msrb.mxu1 %v2188_v18  ;;  %v2209_v63 = vld [vmem:[#allocation2 + $0x1db0] sm:$0xff]  ;;  %v2138_v9 = vld [vmem:[#allocation2 + $0x1b78] sm:$0xff] }
 0x1e7   : > { %2366 = vmatpush.msrb.mxu2 %v2057_v40  ;;  %2385 = vmatpush.msrb.mxu3 %v2125_v20  ;;  %v2205_v3 = vld [vmem:[#allocation2 + $0x1d90] sm:$0xff]  ;;  %v2206_v11 = vld [vmem:[#allocation2 + $0x1d98] sm:$0xff] }
 0x1e8   : > { %2327 = vmatpush.msrb.mxu0 %v2116_v53  ;;  %2346 = vmatpush.msrb.mxu1 %v2184_v21  ;;  %v2201_v8 = vld [vmem:[#allocation2 + $0x1d70] sm:$0xff]  ;;  %v2078_v13 = vld [vmem:[#allocation2 + $0x1998] sm:$0xff] }
 0x1e9   : > { %2367 = vmatpush.msrb.mxu2 %v2053_v22  ;;  %2386 = vmatpush.msrb.mxu3 %v2121_v24  ;;  %v2197_v10 = vld [vmem:[#allocation2 + $0x1d50] sm:$0xff]  ;;  %v2134_v15 = vld [vmem:[#allocation2 + $0x1b58] sm:$0xff] }
 0x1ea   : > { %2328 = vmatpush.msrb.mxu0 %v2112_v25  ;;  %2347 = vmatpush.msrb.mxu1 %v2180_v17  ;;  %v2202_v16 = vld [vmem:[#allocation2 + $0x1d78] sm:$0xff]  ;;  %v2193_v40 = vld [vmem:[#allocation2 + $0x1d30] sm:$0xff] }
 0x1eb   : > { %2368 = vmatpush.msrb.mxu2 %v2049_v26  ;;  %2387 = vmatpush.msrb.mxu3 %v2117_v38  ;;  %v2074_v18 = vld [vmem:[#allocation2 + $0x1978] sm:$0xff]  ;;  %v2189_v22 = vld [vmem:[#allocation2 + $0x1d10] sm:$0xff] }
 0x1ec   : > { %2329 = vmatpush.msrb.mxu0 %v2108_v27  ;;  %2348 = vmatpush.msrb.mxu1 %v2176_v28  ;;  %v2130_v20 = vld [vmem:[#allocation2 + $0x1b38] sm:$0xff]  ;;  %v2185_v26 = vld [vmem:[#allocation2 + $0x1cf0] sm:$0xff] }
 0x1ed   : > { %2369 = vmatpush.msrb.mxu2 %v2045_v30  ;;  %2388 = vmatpush.msrb.mxu3 %v2113_v49  ;;  %v2198_v53 = vld [vmem:[#allocation2 + $0x1d58] sm:$0xff]  ;;  %v2181_v30 = vld [vmem:[#allocation2 + $0x1cd0] sm:$0xff] }
 0x1ee   : > { %2330 = vmatpush.msrb.mxu0 %v2104_v32  ;;  %2349 = vmatpush.msrb.mxu1 %v2172_v33  ;;  %v2070_v21 = vld [vmem:[#allocation2 + $0x1958] sm:$0xff] }
 0x1ef   : > { %2370 = vmatpush.msrb.mxu2 %v2041_v19  ;;  %2389 = vmatpush.msrb.mxu3 %v2109_v61  ;;  %v2126_v24 = vld [vmem:[#allocation2 + $0x1b18] sm:$0xff]  ;;  %v2177_v19 = vld [vmem:[#allocation2 + $0x1cb0] sm:$0xff] }
 0x1f0   : > { %2331 = vmatpush.msrb.mxu0 %v2100_v36  ;;  %2314 = vmatmul.f32.vlgmr.msra.gmra.mxu3 %v3123_v12  ;;  %v2194_v25 = vld [vmem:[#allocation2 + $0x1d38] sm:$0xff] }
 0x1f1   : > { %2350 = vmatpush.msrb.mxu1 %v2168_v37  ;;  %2371 = vmatpush.msrb.mxu2 %v2037_v39  ;;  %v2066_v17 = vld [vmem:[#allocation2 + $0x1938] sm:$0xff]  ;;  %v2173_v37 = vld [vmem:[#allocation2 + $0x1c90] sm:$0xff] }
 0x1f2   : > { %2390 = vmatpush.msrb.mxu3 %v2105_v41  ;;  %2332 = vmatpush.msrb.mxu0 %v2096_v23  ;;  %v2122_v38 = vld [vmem:[#allocation2 + $0x1af8] sm:$0xff] }
 0x1f3   : > { %2351 = vmatpush.msrb.mxu1 %v2164_v42  ;;  %2372 = vmatpush.msrb.mxu2 %v2033_v43  ;;  %v2190_v27 = vld [vmem:[#allocation2 + $0x1d18] sm:$0xff]  ;;  %v2169_v42 = vld [vmem:[#allocation2 + $0x1c70] sm:$0xff] }
 0x1f4   : > { %2391 = vmatpush.msrb.mxu3 %v2101_v44  ;;  %2333 = vmatpush.msrb.mxu0 %v2092_v45  ;;  %v2062_v28 = vld [vmem:[#allocation2 + $0x1918] sm:$0xff]  ;;  %v2165_v45 = vld [vmem:[#allocation2 + $0x1c50] sm:$0xff] }
 0x1f5   : > { %2352 = vmatpush.msrb.mxu1 %v2160_v46  ;;  %2373 = vmatpush.msrb.mxu2 %v2029_v48  ;;  %v2118_v49 = vld [vmem:[#allocation2 + $0x1ad8] sm:$0xff] }
 0x1f6   : > { %2392 = vmatpush.msrb.mxu3 %v2097_v50  ;;  %2334 = vmatmul.f32.vlgmr.msrb.gmra.mxu0 %v3129_v60  ;;  %v2186_v32 = vld [vmem:[#allocation2 + $0x1cf8] sm:$0xff] }
 0x1f7   : > { %2438 = vmatpush.msra.mxu2 %v2154_v52  ;;  %2398 = vmatpush.msra.mxu0 %v2217_v54  ;;  %v2058_v33 = vld [vmem:[#allocation2 + $0x18f8] sm:$0xff]  ;;  %v2161_v52 = vld [vmem:[#allocation2 + $0x1c30] sm:$0xff] }
 0x1f8   : > { %2353 = vmatpush.msrb.mxu1 %v2156_v55  ;;  %2393 = vmatpush.msrb.mxu3 %v2093_v51  ;;  %v2114_v61 = vld [vmem:[#allocation2 + $0x1ab8] sm:$0xff] }
 0x1f9   : > { %2354 = vmatmul.f32.vlgmr.msrb.gmra.mxu1 %v3119_v31  ;;  %2399 = vmatpush.msra.mxu0 %v2213_v57  ;;  %v2182_v36 = vld [vmem:[#allocation2 + $0x1cd8] sm:$0xff]  ;;  %v2157_v57 = vld [vmem:[#allocation2 + $0x1c10] sm:$0xff] }
 0x1fa   : > { %2439 = vmatpush.msra.mxu2 %v2150_v58  ;;  %2458 = vmatpush.msra.mxu3 %v2218_v59  ;;  %v2110_v39 = vld [vmem:[#allocation2 + $0x1a98] sm:$0xff] }
 0x1fb   : > { %2418 = vmatpush.msra.mxu1 %v2090_v62  ;;  %2400 = vmatpush.msra.mxu0 %v2209_v63  ;;  %v2178_v41 = vld [vmem:[#allocation2 + $0x1cb8] sm:$0xff] }
 0x1fc   : > { %2440 = vmatpush.msra.mxu2 %v2146_v0  ;;  %2459 = vmatpush.msra.mxu3 %v2214_v1  ;;  %v2054_v23 = vld [vmem:[#allocation2 + $0x18d8] sm:$0xff] }
 0x1fd   : > { %2419 = vmatpush.msra.mxu1 %v2086_v29  ;;  %2401 = vmatpush.msra.mxu0 %v2205_v3  ;;  %v2106_v43 = vld [vmem:[#allocation2 + $0x1a78] sm:$0xff]  ;;  %v1793_v3 = vpop.f32.mrf.mxu0 }
 0x1fe   : > { %2441 = vmatpush.msra.mxu2 %v2142_v4  ;;  %2460 = vmatpush.msra.mxu3 %v2210_v5  ;;  %v2174_v44 = vld [vmem:[#allocation2 + $0x1c98] sm:$0xff]  ;;  %v1833_v4 = vpop.f32.mrf.mxu2 }
 0x1ff   : > { %2420 = vmatpush.msra.mxu1 %v2082_v7  ;;  %2402 = vmatpush.msra.mxu0 %v2201_v8  ;;  %v2050_v46 = vld [vmem:[#allocation2 + $0x18b8] sm:$0xff]  ;;  %v1813_v7 = vpop.f32.mrf.mxu1 }
 0x200   : > { %2442 = vmatpush.msra.mxu2 %v2138_v9  ;;  %2461 = vmatpush.msra.mxu3 %v2206_v11  ;;  %v2102_v48 = vld [vmem:[#allocation2 + $0x1a58] sm:$0xff] }
 0x201   : > { %2421 = vmatpush.msra.mxu1 %v2078_v13  ;;  %2403 = vmatpush.msra.mxu0 %v2197_v10  ;;  %v2170_v50 = vld [vmem:[#allocation2 + $0x1c78] sm:$0xff] }
 0x202   : > { %2443 = vmatpush.msra.mxu2 %v2134_v15  ;;  %2462 = vmatpush.msra.mxu3 %v2202_v16  ;;  %v2046_v54 = vld [vmem:[#allocation2 + $0x1898] sm:$0xff] }
 0x203   : > { %2422 = vmatpush.msra.mxu1 %v2074_v18  ;;  %2404 = vmatpush.msra.mxu0 %v2193_v40  ;;  %v2098_v55 = vld [vmem:[#allocation2 + $0x1a38] sm:$0xff] }
 0x204   : > { %2444 = vmatpush.msra.mxu2 %v2130_v20  ;;  %2463 = vmatpush.msra.mxu3 %v2198_v53  ;;  %v2166_v51 = vld [vmem:[#allocation2 + $0x1c58] sm:$0xff] }
 0x205   : > { %2423 = vmatpush.msra.mxu1 %v2070_v21  ;;  %2405 = vmatpush.msra.mxu0 %v2189_v22  ;;  %v2042_v58 = vld [vmem:[#allocation2 + $0x1878] sm:$0xff]  ;;  %v1352_v21 = vadd.f32 %v3096_v34, %v3094_v56  ;;  %v1814_v22 = vadd.f32 %v1813_v7, %v1793_v3 }
 0x206   : > { %2445 = vmatpush.msra.mxu2 %v2126_v24  ;;  %2464 = vmatpush.msra.mxu3 %v2194_v25  ;;  %v2094_v59 = vld [vmem:[#allocation2 + $0x1a18] sm:$0xff] }
 0x207   : > { %2424 = vmatpush.msra.mxu1 %v2066_v17  ;;  %2406 = vmatpush.msra.mxu0 %v2185_v26  ;;  %v2162_v62 = vld [vmem:[#allocation2 + $0x1c38] sm:$0xff]  ;;  %v1372_v24 = vadd.f32 %v3107_v35, %v1352_v21  ;;  %v1834_v25 = vadd.f32 %v1833_v4, %v1814_v22 }
 0x208   : > { %2446 = vmatpush.msra.mxu2 %v2122_v38  ;;  %2465 = vmatpush.msra.mxu3 %v2190_v27  ;;  %v2038_v63 = vld [vmem:[#allocation2 + $0x1858] sm:$0xff]  ;;  %v2482_v38 = vld [vmem:[#allocation4] sm:$0xf] }
 0x209   : > { %2425 = vmatpush.msra.mxu1 %v2062_v28  ;;  %2407 = vmatpush.msra.mxu0 %v2181_v30  ;;  %v2158_v0 = vld [vmem:[#allocation2 + $0x1c18] sm:$0xff]  ;;  %v2487_v4 = vperm.slane %v2482_v38, 3 }
 0x20a   : > { %2447 = vmatpush.msra.mxu2 %v2118_v49  ;;  %2466 = vmatpush.msra.mxu3 %v2186_v32  ;;  %v2034_v1 = vld [vmem:[#allocation2 + $0x1838] sm:$0xff]  ;;  %v2484_v32 = vperm.slane %v2482_v38, 0 }
 0x20b   : > { %2426 = vmatpush.msra.mxu1 %v2058_v33  ;;  %2408 = vmatpush.msra.mxu0 %v2177_v19  ;;  %v2030_v29 = vld [vmem:[#allocation2 + $0x1818] sm:$0xff] }
 0x20c   : > { %2448 = vmatpush.msra.mxu2 %v2114_v61  ;;  %2467 = vmatpush.msra.mxu3 %v2182_v36 }
 0x20d   : > { %2374 = vmatmul.f32.vlgmr.msrb.gmra.mxu2 %v3123_v12  ;;  %2409 = vmatpush.msra.mxu0 %v2173_v37  ;;  %v1853_v5 = vpop.f32.mrf.mxu3  ;;  %v1873_v8 = vpop.f32.mrf.mxu0 }
 0x20e   : > { %2449 = vmatpush.msra.mxu2 %v2110_v39  ;;  %2468 = vmatpush.msra.mxu3 %v2178_v41  ;;  %v1874_v19 = vadd.f32 %v1873_v8, %v1853_v5  ;;  %v2485_v41 = vperm.slane %v2482_v38, 1 }
 0x20f   : > { %2427 = vmatpush.msra.mxu1 %v2054_v23  ;;  %2394 = vmatmul.f32.vlgmr.msrb.gmra.mxu3 %v3129_v60 }
 0x210   : > { %2410 = vmatpush.msra.mxu0 %v2169_v42  ;;  %2450 = vmatpush.msra.mxu2 %v2106_v43  ;;  %v1893_v10 = vpop.f32.mrf.mxu1 }
 0x211   : > { %2469 = vmatpush.msra.mxu3 %v2174_v44  ;;  %2428 = vmatpush.msra.mxu1 %v2050_v46  ;;  %v1894_v56 = vadd.f32 %v1893_v10, %v1874_v19  ;;  %v2904_v46 = vmov 0.0  }
 0x212   : > { %2411 = vmatpush.msra.mxu0 %v2165_v45  ;;  %2451 = vmatpush.msra.mxu2 %v2102_v48 }
 0x213   : > { %2470 = vmatpush.msra.mxu3 %v2170_v50  ;;  %2429 = vmatpush.msra.mxu1 %v2046_v54  ;;  %v2017_v37 = vadd.f32 %v1894_v56, %v3101_v2 }
 0x214   : > { %2412 = vmatpush.msra.mxu0 %v2161_v52  ;;  %2452 = vmatpush.msra.mxu2 %v2098_v55 }
 0x215   : > { %2471 = vmatpush.msra.mxu3 %v2166_v51  ;;  %2430 = vmatpush.msra.mxu1 %v2042_v58  ;;  %v2486_v58 = vperm.slane %v2482_v38, 2 }
 0x216   : > { %2413 = vmatpush.msra.mxu0 %v2157_v57  ;;  %2453 = vmatpush.msra.mxu2 %v2094_v59 }
 0x217   : > { %2472 = vmatpush.msra.mxu3 %v2162_v62  ;;  %2414 = vmatmul.f32.vlgmr.msra.gmra.mxu0 %v3119_v31 }
 0x218   : > { %2454 = vmatmul.f32.vlgmr.msra.gmra.mxu2 %v3129_v60  ;;  %2431 = vmatpush.msra.mxu1 %v2038_v63 }
 0x219   : > { %2473 = vmatpush.msra.mxu3 %v2158_v0 }
 0x21a   : > { %2474 = vmatmul.f32.vlgmr.msra.gmra.mxu3 %v3119_v31  ;;  %2432 = vmatpush.msra.mxu1 %v2034_v1 }
 0x21c   : > { %2433 = vmatpush.msra.mxu1 %v2030_v29 }
 0x21d   : > { %2434 = vmatmul.f32.vlgmr.msra.gmra.mxu1 %v3123_v12 }
 0x22c   : > { %v1913_v9 = vpop.f32.mrf.mxu2 }
 0x22d   : > { %v1933_v11 = vpop.f32.mrf.mxu3 }
 0x22e   : > { %v1934_v13 = vadd.f32 %v1933_v11, %v1913_v9 }
 0x22f   : > { %v1953_v60 = vpop.f32.mrf.mxu0 }
 0x230   : > { %v1954_v15 = vadd.f32 %v1953_v60, %v1934_v13 }
 0x232   : > { %v2018_v16 = vadd.f32 %v1954_v15, %v3112_v14  ;;  %v1554_v14 = vadd.f32 %v1372_v24, %v3048_v6  ;;  %v2496_v6 = vlaneseq }
 0x234   : > { %v2016_v30 = vadd.f32 %v1834_v25, %v1554_v14  ;;  %v2499_v42 = vshrl.u32 %v2496_v6, 7  ;;  %v2497_v44 = vand.u32 127, %v2496_v6 }
 0x236   : > { %v1993_v18 = vpop.f32.mrf.mxu2  ;;  %v2500_v45 = vmul.u32 2, %v2499_v42 }
 0x237   : > { %v1973_v31 = vpop.f32.mrf.mxu1 }
 0x238   : > { %v1994_v40 = vadd.f32 %v1993_v18, %v1973_v31  ;;  %vm2501_vm4 = vcmp.eq.s32.totalorder %v2497_v44, %v2500_v45  ;;  %v2504_v50 = vadd.s32 1, %v2500_v45 }
 0x239   : > { %v2013_v20 = vpop.f32.mrf.mxu3  ;;  %v2778_v48 = vsel %vm2501_vm4, 1.0, %v2904_v46 }
 0x23a   : > { %v2014_v53 = vadd.f32 %v2013_v20, %v1994_v40  ;;  %vm2505_vm6 = vcmp.eq.s32.totalorder %v2497_v44, %v2504_v50 }
 0x23b   : > { %v2779_v2 = vsel %vm2505_vm6, 1.0, %v2904_v46 }
 0x23c   : > { %v3144_v12 = vadd.f32 %v2014_v53, %v3126_v47 }
 0x256   : > { %v2255_v17 = vpop.f32.mrf.mxu0  ;;  %v2275_v26 = vpop.f32.mrf.mxu1 }
 0x257   : > { %v2276_v27 = vadd.f32 %v2275_v26, %v2255_v17  ;;  %v2295_v28 = vpop.f32.mrf.mxu2 }
 0x259   : > { %v2296_v49 = vadd.f32 %v2295_v28, %v2276_v27 }
 0x25b   : > { %v2478_v33 = vadd.f32 %v2296_v49, %v2016_v30 }
 0x25d   : > { %v2492_v47 = vadd.f32 %v2484_v32, %v2478_v33 }
 0x25f   : > { %2527 = vmatpush.msrb.mxu0 %v2492_v47 }
 0x260   : > { %2780 = vmatmul.msk.f32.vlgmr.msrb.gmra.mxu0 %vm2508_vm5, %v2778_v48 }
 0x261   : > { %2610 = vmatpush.msra.mxu0 %v2492_v47 }
 0x268   : > { %2784 = vmatmul.msk.f32.vlgmr.msra.gmra.mxu0 %vm2508_vm5, %v2779_v2 }
 0x273   : > { %v2315_v34 = vpop.f32.mrf.mxu3  ;;  %v2335_v61 = vpop.f32.mrf.mxu0 }
 0x274   : > { %v2336_v35 = vadd.f32 %v2335_v61, %v2315_v34 }
 0x276   : > { %v2355_v36 = vpop.f32.mrf.mxu1 }
 0x277   : > { %v2356_v39 = vadd.f32 %v2355_v36, %v2336_v35 }
 0x279   : > { %v2479_v23 = vadd.f32 %v2356_v39, %v2017_v37 }
 0x27b   : > { %v2493_v43 = vadd.f32 %v2485_v41, %v2479_v23 }
 0x27d   : > { %2547 = vmatpush.msrb.mxu1 %v2493_v43 }
 0x27e   : > { %2781 = vmatmul.msk.f32.vlgmr.msrb.gmra.mxu1 %vm2508_vm5, %v2778_v48 }
 0x27f   : > { %2630 = vmatpush.msra.mxu1 %v2493_v43 }
 0x286   : > { %2785 = vmatmul.msk.f32.vlgmr.msra.gmra.mxu1 %vm2508_vm5, %v2779_v2 }
 0x290   : > { %v2375_v52 = vpop.f32.mrf.mxu2 }
 0x292   : > { %v2395_v54 = vpop.f32.mrf.mxu3 }
 0x293   : > { %v2396_v55 = vadd.f32 %v2395_v54, %v2375_v52 }
 0x294   : > { %v2415_v51 = vpop.f32.mrf.mxu0 }
 0x295   : > { %v2416_v57 = vadd.f32 %v2415_v51, %v2396_v55 }
 0x297   : > { %v2480_v59 = vadd.f32 %v2416_v57, %v2018_v16 }
 0x299   : > { %v2494_v62 = vadd.f32 %v2486_v58, %v2480_v59 }
 0x29a   : > { %v2435_v63 = vpop.f32.mrf.mxu1 }
 0x29b   : > { %v2455_v0 = vpop.f32.mrf.mxu2  ;;  %2567 = vmatpush.msrb.mxu2 %v2494_v62 }
 0x29c   : > { %v2456_v1 = vadd.f32 %v2455_v0, %v2435_v63  ;;  %2782 = vmatmul.msk.f32.vlgmr.msrb.gmra.mxu2 %vm2508_vm5, %v2778_v48 }
 0x29d   : > { %v2475_v29 = vpop.f32.mrf.mxu3  ;;  %2650 = vmatpush.msra.mxu2 %v2494_v62 }
 0x29e   : > { %v2476_v3 = vadd.f32 %v2475_v29, %v2456_v1 }
 0x2a0   : > { %v2481_v5 = vadd.f32 %v2476_v3, %v3144_v12 }
 0x2a2   : > { %v2495_v7 = vadd.f32 %v2487_v4, %v2481_v5 }
 0x2a4   : > { %2587 = vmatpush.msrb.mxu3 %v2495_v7  ;;  %2786 = vmatmul.msk.f32.vlgmr.msra.gmra.mxu2 %vm2508_vm5, %v2779_v2 }
 0x2a5   : > { %2783 = vmatmul.msk.f32.vlgmr.msrb.gmra.mxu3 %vm2508_vm5, %v2778_v48 }
 0x2a6   : > { %2670 = vmatpush.msra.mxu3 %v2495_v7 }
 0x2ad   : > { %2787 = vmatmul.msk.f32.vlgmr.msra.gmra.mxu3 %vm2508_vm5, %v2779_v2 }
 0x2dd   : > { %v2529_v8 = vpop.f32.mrf.mxu0 }
 0x2e5   : > { %v2612_v10 = vpop.f32.mrf.mxu0 }
 0x2e6   : > { %v2675_v16 = vmax.f32 %v2529_v8, %v2612_v10 }
 0x2fb   : > { %v2549_v11 = vpop.f32.mrf.mxu1 }
 0x303   : > { %v2632_v15 = vpop.f32.mrf.mxu1 }
 0x304   : > { %v2676_v40 = vmax.f32 %v2549_v11, %v2632_v15 }
 0x31f   : > { %v2569_v9 = vpop.f32.mrf.mxu2 }
 0x327   : > { %v2652_v60 = vpop.f32.mrf.mxu2 }
 0x328   : > { %v2589_v13 = vpop.f32.mrf.mxu3  ;;  %v2677_v18 = vmax.f32 %v2569_v9, %v2652_v60 }
 0x32a   : > { %v2679_v12 = vmax.f32 %v2675_v16, %v2677_v18 }
 0x32c   : > { %v2681_v24 = vmax.f32 %v2679_v12, 0.0 }
 0x330   : > { %v2672_v31 = vpop.f32.mrf.mxu3 }
 0x331   : > { %v2678_v20 = vmax.f32 %v2589_v13, %v2672_v31 }
 0x333   : > { %v2680_v53 = vmax.f32 %v2676_v40, %v2678_v20 }
 0x335   : > { %v2682_v21 = vmax.f32 %v2680_v53, 0.0 }
 0x337   : > { %v2685_v22 = vrot.slane %v2682_v21, 4 }
 0x339   : > { %v2686_v25 = vsel %vm2225_vm3, %v2681_v24, %v2685_v22 }
 0x33a   : > { %2688 = vst [vmem:[%s202_s7] sm:$0xff] %v2686_v25 }
 0x33b PF: > { %s15_s12 = sadd.s32 1, %s2898_s12  }
 0x33c   : > { %p12_p7 = scmp.ge.s32.totalorder %s15_s12, 4  }
 0x33e   :  { %14 = sbr.rel (!%p12_p7) target bundleno = 2 (0x2), region = 75 }
 0x343   :  { %2710 = vsyncpa [#allocation3], 1 }
 0x344   :  { %2712 = vsyncpa [#allocation3 + $0x1], 1 }
 0x345   :  { %2713 = vsyncpa [#allocation5], 1 }

</bundles_post_ra>
